<compile_context>
chip_gen: v7x
topology: tpu7x:2x2x1
jax: 0.10.0
libtpu: 0.0.40
codegen_flags: <defaults>
</compile_context>

<pallas_src>
import functools
import math

import jax
import jax.numpy as jnp
from jax import lax
from jax.experimental import pallas as pl
from jax.experimental.pallas import tpu as pltpu

VMEM_SPEC = pl.BlockSpec(memory_space=pltpu.MemorySpace.VMEM)


# ----------------------------------------------------------------------------
# Fused forward kernel factory
# ----------------------------------------------------------------------------
def _make_fused_kernel(S, B, H, num_layers):
    FH = 4 * H   # per-direction gate width
    GH = 8 * H   # both-direction gate width

    def kernel(xf_ref, ew1_ref, eb1_ref, ew2_ref, eb2_ref, *rest):
        lstm_refs = rest[:3 * num_layers]
        (aw1_ref, ab1_ref, aw2_ref, ab2_ref,
         cw1_ref, cb1_ref, cw2_ref, cb2_ref) = rest[3 * num_layers:3 * num_layers + 8]
        out_ref = rest[3 * num_layers + 8]
        hseq_ref = rest[3 * num_layers + 9]          # VMEM scratch (S*B, 2H)
        f32 = jnp.float32

        # ---- keypoint embedding MLP over all (time, batch) rows at once ----
        h = jnp.dot(xf_ref[...], ew1_ref[...], preferred_element_type=f32) + eb1_ref[...]
        h = jnp.maximum(h, 0.0)
        act = jnp.dot(h, ew2_ref[...], preferred_element_type=f32) + eb2_ref[...]
        act = jnp.maximum(act, 0.0)                  # (S*B, 128)
        # TODO(synk): nn.Dropout is training-only; inference forward = identity.

        # ---- stacked bidirectional LSTM layers (fwd + bwd fused per step) ----
        for l in range(num_layers):
            wih_ref = lstm_refs[3 * l]               # (in_f, 8H)  [Wih_f | Wih_b]
            b_ref = lstm_refs[3 * l + 1]             # (1, 8H)     [b_f   | b_b ]
            whh_ref = lstm_refs[3 * l + 2]           # (2H, 8H)    blockdiag(Whh_f, Whh_b)

            # Hoisted input projection: all timesteps, both directions, one matmul.
            gx = jnp.dot(act, wih_ref[...], preferred_element_type=f32) + b_ref[...]
            whh = whh_ref[...]

            h_f = jnp.zeros((B, H), f32)
            c_f = jnp.zeros((B, H), f32)
            h_b = jnp.zeros((B, H), f32)
            c_b = jnp.zeros((B, H), f32)

            for t in range(S):                       # fully unrolled recurrence
                tb = S - 1 - t                       # time consumed by backward dir
                h_cat = jnp.concatenate([h_f, h_b], axis=1)                # (B, 2H)
                rec = jnp.dot(h_cat, whh, preferred_element_type=f32)      # (B, 8H)
                gx_t = jnp.concatenate(
                    [gx[t * B:(t + 1) * B, 0:FH],
                     gx[tb * B:(tb + 1) * B, FH:GH]], axis=1)              # (B, 8H)
                gates = rec + gx_t
                sg = jax.nn.sigmoid(gates)           # one EUP pass, both directions
                th = jnp.tanh(gates)
                i_f, f_f = sg[:, 0:H], sg[:, H:2 * H]
                g_f, o_f = th[:, 2 * H:3 * H], sg[:, 3 * H:4 * H]
                i_b, f_b = sg[:, FH:FH + H], sg[:, FH + H:FH + 2 * H]
                g_b, o_b = th[:, FH + 2 * H:FH + 3 * H], sg[:, FH + 3 * H:FH + 4 * H]
                c_f = f_f * c_f + i_f * g_f
                c_b = f_b * c_b + i_b * g_b
                tc = jnp.tanh(jnp.concatenate([c_f, c_b], axis=1))         # (B, 2H)
                h_f = o_f * tc[:, 0:H]
                h_b = o_b * tc[:, H:2 * H]
                hseq_ref[t * B:(t + 1) * B, 0:H] = h_f
                hseq_ref[tb * B:(tb + 1) * B, H:2 * H] = h_b

            act = hseq_ref[...]                      # (S*B, 2H) -> next layer / attention

        # ---- attention over the sequence + classifier (batched over B) ----
        ah = jnp.tanh(jnp.dot(act, aw1_ref[...], preferred_element_type=f32) + ab1_ref[...])
        scores = jnp.sum(ah * aw2_ref[...], axis=1, keepdims=True) + ab2_ref[...]   # (S*B, 1)
        row = lax.broadcasted_iota(jnp.int32, (S * B, 1), 0)
        ctx_rows = []
        for b in range(B):                           # cheap masked reductions, no matmuls
            mask = (row % B) == b
            m = jnp.max(jnp.where(mask, scores, -jnp.inf), axis=0, keepdims=True)
            e = jnp.exp(jnp.where(mask, scores - m, -jnp.inf))
            w = e / jnp.sum(e, axis=0, keepdims=True)                                # (S*B, 1)
            ctx_rows.append(jnp.sum(act * w, axis=0, keepdims=True))                 # (1, 2H)
        ctx = jnp.concatenate(ctx_rows, axis=0)                                      # (B, 2H)
        hc = jnp.maximum(
            jnp.dot(ctx, cw1_ref[...], preferred_element_type=f32) + cb1_ref[...], 0.0)
        out_ref[...] = jnp.dot(hc, cw2_ref[...], preferred_element_type=f32) + cb2_ref[...]

    return kernel


# ----------------------------------------------------------------------------
# Wrapper: one reshape/transpose/pad of the raw input + a single pallas_call
# ----------------------------------------------------------------------------
def keypoint_attention_lstm_forward(x, packed, *, num_layers, hidden):
    B, S = x.shape[:2]
    H = hidden
    din_pad = packed[0].shape[0]                     # padded embed-input width
    num_classes = packed[-2].shape[1]

    xf = x.astype(jnp.float32).reshape(B, S, -1)
    xf = jnp.transpose(xf, (1, 0, 2)).reshape(S * B, -1)     # time-major rows r = t*B + b
    pad = din_pad - xf.shape[1]
    if pad:
        xf = jnp.pad(xf, ((0, 0), (0, pad)))                 # fill 128-lane vreg for x @ W1

    kernel = _make_fused_kernel(S, B, H, num_layers)
    n_in = 1 + len(packed)
    return pl.pallas_call(
        kernel,
        out_shape=jax.ShapeDtypeStruct((B, num_classes), jnp.float32),
        in_specs=[VMEM_SPEC] * n_in,
        out_specs=VMEM_SPEC,
        scratch_shapes=[pltpu.VMEM((S * B, 2 * H), jnp.float32)],
    )(xf, *packed)


# ----------------------------------------------------------------------------
# Parameter init (PyTorch-style) and one-time packing for the fused kernel
# ----------------------------------------------------------------------------
def init_params(key, num_classes, max_persons, hidden, num_layers=2):
    input_size = max_persons * 17 * 2
    keys = iter(jax.random.split(key, 64))

    def lin(in_f, out_f):
        bound = 1.0 / math.sqrt(in_f)
        w = jax.random.uniform(next(keys), (in_f, out_f), jnp.float32, -bound, bound)
        b = jax.random.uniform(next(keys), (1, out_f), jnp.float32, -bound, bound)
        return w, b

    p = {'num_layers': num_layers, 'hidden': hidden}
    p['e_w1'], p['e_b1'] = lin(input_size, 256)
    p['e_w2'], p['e_b2'] = lin(256, 128)

    lstm = []
    for l in range(num_layers):
        in_f = 128 if l == 0 else 2 * hidden
        bound = 1.0 / math.sqrt(hidden)
        layer = {}
        for d in ('fwd', 'bwd'):
            wih = jax.random.uniform(next(keys), (in_f, 4 * hidden), jnp.float32, -bound, bound)
            whh = jax.random.uniform(next(keys), (hidden, 4 * hidden), jnp.float32, -bound, bound)
            bih = jax.random.uniform(next(keys), (1, 4 * hidden), jnp.float32, -bound, bound)
            bhh = jax.random.uniform(next(keys), (1, 4 * hidden), jnp.float32, -bound, bound)
            layer[d] = (wih, whh, bih + bhh)
        lstm.append(layer)
    p['lstm'] = lstm

    p['a_w1'], p['a_b1'] = lin(2 * hidden, hidden)
    wa2, ba2 = lin(hidden, 1)
    p['a_w2v'] = wa2.T          # (1, hidden)
    p['a_b2'] = ba2             # (1, 1)
    p['c_w1'], p['c_b1'] = lin(2 * hidden, 64)
    p['c_w2'], p['c_b2'] = lin(64, num_classes)
    return p


def pack_params(p):
    """One-time packing: pad W1, stack Wih fwd/bwd column-wise, block-diag Whh."""
    H = p['hidden']
    din = p['e_w1'].shape[0]
    din_pad = ((din + 127) // 128) * 128
    ew1p = jnp.zeros((din_pad, p['e_w1'].shape[1]), jnp.float32).at[:din].set(p['e_w1'])
    packed = [ew1p, p['e_b1'], p['e_w2'], p['e_b2']]
    for l in range(p['num_layers']):
        wih_f, whh_f, b_f = p['lstm'][l]['fwd']
        wih_b, whh_b, b_b = p['lstm'][l]['bwd']
        wih_both = jnp.concatenate([wih_f, wih_b], axis=1)          # (in_f, 8H)
        b_both = jnp.concatenate([b_f, b_b], axis=1)                # (1, 8H)
        z = jnp.zeros((H, 4 * H), jnp.float32)
        whh_blk = jnp.concatenate(
            [jnp.concatenate([whh_f, z], axis=1),
             jnp.concatenate([z, whh_b], axis=1)], axis=0)          # (2H, 8H)
        packed += [wih_both, b_both, whh_blk]
    packed += [p['a_w1'], p['a_b1'], p['a_w2v'], p['a_b2'],
               p['c_w1'], p['c_b1'], p['c_w2'], p['c_b2']]
    return tuple(packed)


# ----------------------------------------------------------------------------
# Pure-JAX reference (same math, no Pallas) for a correctness check
# ----------------------------------------------------------------------------
def ref_forward(x, p):
    B, S = x.shape[:2]
    H = p['hidden']
    xf = x.reshape(B, S, -1).astype(jnp.float32)
    h = jax.nn.relu(xf @ p['e_w1'] + p['e_b1'])
    out = jax.nn.relu(h @ p['e_w2'] + p['e_b2'])

    def ref_dir(x_t, wih, whh, b):
        Bn = x_t.shape[1]

        def step(carry, xt):
            hh, cc = carry
            g = xt @ wih + hh @ whh + b
            i = jax.nn.sigmoid(g[:, :H])
            f = jax.nn.sigmoid(g[:, H:2 * H])
            gg = jnp.tanh(g[:, 2 * H:3 * H])
            o = jax.nn.sigmoid(g[:, 3 * H:])
            cc = f * cc + i * gg
            hh = o * jnp.tanh(cc)
            return (hh, cc), hh

        _, hs = lax.scan(step, (jnp.zeros((Bn, H)), jnp.zeros((Bn, H))), x_t)
        return hs

    for l in range(p['num_layers']):
        x_t = jnp.transpose(out, (1, 0, 2))
        hf = ref_dir(x_t, *p['lstm'][l]['fwd'])
        hb = jnp.flip(ref_dir(jnp.flip(x_t, 0), *p['lstm'][l]['bwd']), 0)
        out = jnp.transpose(jnp.concatenate([hf, hb], -1), (1, 0, 2))

    ah = jnp.tanh(out @ p['a_w1'] + p['a_b1'])
    scores = jnp.sum(ah * p['a_w2v'], axis=-1, keepdims=True) + p['a_b2']
    w = jax.nn.softmax(scores, axis=1)
    ctx = jnp.sum(out * w, axis=1)
    ch = jax.nn.relu(ctx @ p['c_w1'] + p['c_b1'])
    return ch @ p['c_w2'] + p['c_b2']


if __name__ == "__main__":
    num_classes = 6
    max_persons = 2
    hidden = 32
    num_layers = 2
    B, S = 2, 8

    root = jax.random.PRNGKey(0)
    pkey, xkey = jax.random.split(root)
    params = init_params(pkey, num_classes, max_persons, hidden, num_layers)
    packed = pack_params(params)
    x = jax.random.normal(xkey, (B, S, max_persons, 17, 2), jnp.float32)

    fwd = jax.jit(functools.partial(
        keypoint_attention_lstm_forward, num_layers=num_layers, hidden=hidden))
    out = jax.block_until_ready(fwd(x, packed))

    ref = jax.block_until_ready(ref_forward(x, params))
    assert out.shape == (B, num_classes)
    if not jnp.allclose(out, ref, atol=2e-3, rtol=2e-3):
        raise AssertionError(
            f"mismatch vs reference, max abs diff = {float(jnp.max(jnp.abs(out - ref)))}")

    print("KERNEL_OK")
</pallas_src>

<mosaic_0001>
module attributes {stable_mosaic.version = 11 : i64} {
  func.func @kernel(%arg0: memref<16x128xf32, #tpu.memory_space<vmem>>, %arg1: memref<128x256xf32, #tpu.memory_space<vmem>>, %arg2: memref<1x256xf32, #tpu.memory_space<vmem>>, %arg3: memref<256x128xf32, #tpu.memory_space<vmem>>, %arg4: memref<1x128xf32, #tpu.memory_space<vmem>>, %arg5: memref<128x256xf32, #tpu.memory_space<vmem>>, %arg6: memref<1x256xf32, #tpu.memory_space<vmem>>, %arg7: memref<64x256xf32, #tpu.memory_space<vmem>>, %arg8: memref<64x256xf32, #tpu.memory_space<vmem>>, %arg9: memref<1x256xf32, #tpu.memory_space<vmem>>, %arg10: memref<64x256xf32, #tpu.memory_space<vmem>>, %arg11: memref<64x32xf32, #tpu.memory_space<vmem>>, %arg12: memref<1x32xf32, #tpu.memory_space<vmem>>, %arg13: memref<1x32xf32, #tpu.memory_space<vmem>>, %arg14: memref<1x1xf32, #tpu.memory_space<vmem>>, %arg15: memref<64x64xf32, #tpu.memory_space<vmem>>, %arg16: memref<1x64xf32, #tpu.memory_space<vmem>>, %arg17: memref<64x6xf32, #tpu.memory_space<vmem>>, %arg18: memref<1x6xf32, #tpu.memory_space<vmem>>, %arg19: memref<2x6xf32, #tpu.memory_space<vmem>>, %arg20: memref<16x64xf32, #tpu.memory_space<vmem>>) attributes {dimension_semantics = [], scalar_prefetch = 0 : i64, scratch_operands = 1 : i64, tpu.core_type = #tpu.core_type<tc>} {
    %c0 = arith.constant 0 : index
    %c0_0 = arith.constant 0 : index
    %0 = vector.load %arg0[%c0, %c0_0] : memref<16x128xf32, #tpu.memory_space<vmem>>, vector<16x128xf32>
    %c0_1 = arith.constant 0 : index
    %c0_2 = arith.constant 0 : index
    %1 = vector.load %arg1[%c0_1, %c0_2] : memref<128x256xf32, #tpu.memory_space<vmem>>, vector<128x256xf32>
    %cst = arith.constant dense<0.000000e+00> : vector<16x256xf32>
    %2 = tpu.matmul %0, %1, %cst {dimension_numbers = #tpu.dot_dimension_numbers<[1], [0], [0], [1], [0, 0, 1, 1], [], []>} : vector<16x128xf32>, vector<128x256xf32>, vector<16x256xf32> -> vector<16x256xf32>
    %c0_3 = arith.constant 0 : index
    %c0_4 = arith.constant 0 : index
    %3 = vector.load %arg2[%c0_3, %c0_4] : memref<1x256xf32, #tpu.memory_space<vmem>>, vector<1x256xf32>
    %4 = vector.broadcast %3 : vector<1x256xf32> to vector<16x256xf32>
    %5 = arith.addf %2, %4 : vector<16x256xf32>
    %cst_5 = arith.constant 0.000000e+00 : f32
    %6 = vector.broadcast %cst_5 : f32 to vector<16x256xf32>
    %7 = arith.maximumf %5, %6 : vector<16x256xf32>
    %c0_6 = arith.constant 0 : index
    %c0_7 = arith.constant 0 : index
    %8 = vector.load %arg3[%c0_6, %c0_7] : memref<256x128xf32, #tpu.memory_space<vmem>>, vector<256x128xf32>
    %cst_8 = arith.constant dense<0.000000e+00> : vector<16x128xf32>
    %9 = tpu.matmul %7, %8, %cst_8 {dimension_numbers = #tpu.dot_dimension_numbers<[1], [0], [0], [1], [0, 0, 1, 1], [], []>} : vector<16x256xf32>, vector<256x128xf32>, vector<16x128xf32> -> vector<16x128xf32>
    %c0_9 = arith.constant 0 : index
    %c0_10 = arith.constant 0 : index
    %10 = vector.load %arg4[%c0_9, %c0_10] : memref<1x128xf32, #tpu.memory_space<vmem>>, vector<1x128xf32>
    %11 = vector.broadcast %10 : vector<1x128xf32> to vector<16x128xf32>
    %12 = arith.addf %9, %11 : vector<16x128xf32>
    %cst_11 = arith.constant 0.000000e+00 : f32
    %13 = vector.broadcast %cst_11 : f32 to vector<16x128xf32>
    %14 = arith.maximumf %12, %13 : vector<16x128xf32>
    %c0_12 = arith.constant 0 : index
    %c0_13 = arith.constant 0 : index
    %15 = vector.load %arg5[%c0_12, %c0_13] : memref<128x256xf32, #tpu.memory_space<vmem>>, vector<128x256xf32>
    %cst_14 = arith.constant dense<0.000000e+00> : vector<16x256xf32>
    %16 = tpu.matmul %14, %15, %cst_14 {dimension_numbers = #tpu.dot_dimension_numbers<[1], [0], [0], [1], [0, 0, 1, 1], [], []>} : vector<16x128xf32>, vector<128x256xf32>, vector<16x256xf32> -> vector<16x256xf32>
    %c0_15 = arith.constant 0 : index
    %c0_16 = arith.constant 0 : index
    %17 = vector.load %arg6[%c0_15, %c0_16] : memref<1x256xf32, #tpu.memory_space<vmem>>, vector<1x256xf32>
    %18 = vector.broadcast %17 : vector<1x256xf32> to vector<16x256xf32>
    %19 = arith.addf %16, %18 : vector<16x256xf32>
    %c0_17 = arith.constant 0 : index
    %c0_18 = arith.constant 0 : index
    %20 = vector.load %arg7[%c0_17, %c0_18] : memref<64x256xf32, #tpu.memory_space<vmem>>, vector<64x256xf32>
    %cst_19 = arith.constant 0.000000e+00 : f32
    %21 = vector.broadcast %cst_19 : f32 to vector<2x32xf32>
    %cst_20 = arith.constant 0.000000e+00 : f32
    %22 = vector.broadcast %cst_20 : f32 to vector<2x32xf32>
    %cst_21 = arith.constant 0.000000e+00 : f32
    %23 = vector.broadcast %cst_21 : f32 to vector<2x32xf32>
    %cst_22 = arith.constant 0.000000e+00 : f32
    %24 = vector.broadcast %cst_22 : f32 to vector<2x32xf32>
    %25 = tpu.concatenate %21, %23 in 1 : vector<2x32xf32>, vector<2x32xf32> -> vector<2x64xf32>
    %cst_23 = arith.constant dense<0.000000e+00> : vector<2x256xf32>
    %26 = tpu.matmul %25, %20, %cst_23 {dimension_numbers = #tpu.dot_dimension_numbers<[1], [0], [0], [1], [0, 0, 1, 1], [], []>} : vector<2x64xf32>, vector<64x256xf32>, vector<2x256xf32> -> vector<2x256xf32>
    %27 = vector.extract_strided_slice %19 {offsets = [0, 0], sizes = [2, 128], strides = [1, 1]} : vector<16x256xf32> to vector<2x128xf32>
    %28 = vector.extract_strided_slice %19 {offsets = [14, 128], sizes = [2, 128], strides = [1, 1]} : vector<16x256xf32> to vector<2x128xf32>
    %29 = tpu.concatenate %27, %28 in 1 : vector<2x128xf32>, vector<2x128xf32> -> vector<2x256xf32>
    %30 = arith.addf %26, %29 : vector<2x256xf32>
    %31 = arith.negf %30 : vector<2x256xf32>
    %32 = math.exp %31 : vector<2x256xf32>
    %cst_24 = arith.constant 1.000000e+00 : f32
    %33 = vector.broadcast %cst_24 : f32 to vector<2x256xf32>
    %34 = arith.addf %33, %32 : vector<2x256xf32>
    %35 = arith.divf %33, %34 : vector<2x256xf32>
    %36 = math.tanh %30 : vector<2x256xf32>
    %37 = vector.extract_strided_slice %35 {offsets = [0, 0], sizes = [2, 32], strides = [1, 1]} : vector<2x256xf32> to vector<2x32xf32>
    %38 = vector.extract_strided_slice %35 {offsets = [0, 32], sizes = [2, 32], strides = [1, 1]} : vector<2x256xf32> to vector<2x32xf32>
    %39 = vector.extract_strided_slice %36 {offsets = [0, 64], sizes = [2, 32], strides = [1, 1]} : vector<2x256xf32> to vector<2x32xf32>
    %40 = vector.extract_strided_slice %35 {offsets = [0, 96], sizes = [2, 32], strides = [1, 1]} : vector<2x256xf32> to vector<2x32xf32>
    %41 = vector.extract_strided_slice %35 {offsets = [0, 128], sizes = [2, 32], strides = [1, 1]} : vector<2x256xf32> to vector<2x32xf32>
    %42 = vector.extract_strided_slice %35 {offsets = [0, 160], sizes = [2, 32], strides = [1, 1]} : vector<2x256xf32> to vector<2x32xf32>
    %43 = vector.extract_strided_slice %36 {offsets = [0, 192], sizes = [2, 32], strides = [1, 1]} : vector<2x256xf32> to vector<2x32xf32>
    %44 = vector.extract_strided_slice %35 {offsets = [0, 224], sizes = [2, 32], strides = [1, 1]} : vector<2x256xf32> to vector<2x32xf32>
    %45 = arith.mulf %38, %22 : vector<2x32xf32>
    %46 = arith.mulf %37, %39 : vector<2x32xf32>
    %47 = arith.addf %45, %46 : vector<2x32xf32>
    %48 = arith.mulf %42, %24 : vector<2x32xf32>
    %49 = arith.mulf %41, %43 : vector<2x32xf32>
    %50 = arith.addf %48, %49 : vector<2x32xf32>
    %51 = tpu.concatenate %47, %50 in 1 : vector<2x32xf32>, vector<2x32xf32> -> vector<2x64xf32>
    %52 = math.tanh %51 : vector<2x64xf32>
    %53 = vector.extract_strided_slice %52 {offsets = [0, 0], sizes = [2, 32], strides = [1, 1]} : vector<2x64xf32> to vector<2x32xf32>
    %54 = arith.mulf %40, %53 : vector<2x32xf32>
    %55 = vector.extract_strided_slice %52 {offsets = [0, 32], sizes = [2, 32], strides = [1, 1]} : vector<2x64xf32> to vector<2x32xf32>
    %56 = arith.mulf %44, %55 : vector<2x32xf32>
    %c0_25 = arith.constant 0 : index
    %c0_26 = arith.constant 0 : index
    %57 = vector.load %arg20[%c0_25, %c0_26] : memref<16x64xf32, #tpu.memory_space<vmem>>, vector<2x32xf32>
    tpu.vector_store %arg20[%c0_25, %c0_26], %54 {strides = array<i32>} : memref<16x64xf32, #tpu.memory_space<vmem>>, vector<2x32xf32>,
    %c14 = arith.constant 14 : index
    %c32 = arith.constant 32 : index
    %58 = vector.load %arg20[%c14, %c32] : memref<16x64xf32, #tpu.memory_space<vmem>>, vector<2x32xf32>
    tpu.vector_store %arg20[%c14, %c32], %56 {strides = array<i32>} : memref<16x64xf32, #tpu.memory_space<vmem>>, vector<2x32xf32>,
    %59 = tpu.concatenate %54, %56 in 1 : vector<2x32xf32>, vector<2x32xf32> -> vector<2x64xf32>
    %cst_27 = arith.constant dense<0.000000e+00> : vector<2x256xf32>
    %60 = tpu.matmul %59, %20, %cst_27 {dimension_numbers = #tpu.dot_dimension_numbers<[1], [0], [0], [1], [0, 0, 1, 1], [], []>} : vector<2x64xf32>, vector<64x256xf32>, vector<2x256xf32> -> vector<2x256xf32>
    %61 = vector.extract_strided_slice %19 {offsets = [2, 0], sizes = [2, 128], strides = [1, 1]} : vector<16x256xf32> to vector<2x128xf32>
    %62 = vector.extract_strided_slice %19 {offsets = [12, 128], sizes = [2, 128], strides = [1, 1]} : vector<16x256xf32> to vector<2x128xf32>
    %63 = tpu.concatenate %61, %62 in 1 : vector<2x128xf32>, vector<2x128xf32> -> vector<2x256xf32>
    %64 = arith.addf %60, %63 : vector<2x256xf32>
    %65 = arith.negf %64 : vector<2x256xf32>
    %66 = math.exp %65 : vector<2x256xf32>
    %cst_28 = arith.constant 1.000000e+00 : f32
    %67 = vector.broadcast %cst_28 : f32 to vector<2x256xf32>
    %68 = arith.addf %67, %66 : vector<2x256xf32>
    %69 = arith.divf %67, %68 : vector<2x256xf32>
    %70 = math.tanh %64 : vector<2x256xf32>
    %71 = vector.extract_strided_slice %69 {offsets = [0, 0], sizes = [2, 32], strides = [1, 1]} : vector<2x256xf32> to vector<2x32xf32>
    %72 = vector.extract_strided_slice %69 {offsets = [0, 32], sizes = [2, 32], strides = [1, 1]} : vector<2x256xf32> to vector<2x32xf32>
    %73 = vector.extract_strided_slice %70 {offsets = [0, 64], sizes = [2, 32], strides = [1, 1]} : vector<2x256xf32> to vector<2x32xf32>
    %74 = vector.extract_strided_slice %69 {offsets = [0, 96], sizes = [2, 32], strides = [1, 1]} : vector<2x256xf32> to vector<2x32xf32>
    %75 = vector.extract_strided_slice %69 {offsets = [0, 128], sizes = [2, 32], strides = [1, 1]} : vector<2x256xf32> to vector<2x32xf32>
    %76 = vector.extract_strided_slice %69 {offsets = [0, 160], sizes = [2, 32], strides = [1, 1]} : vector<2x256xf32> to vector<2x32xf32>
    %77 = vector.extract_strided_slice %70 {offsets = [0, 192], sizes = [2, 32], strides = [1, 1]} : vector<2x256xf32> to vector<2x32xf32>
    %78 = vector.extract_strided_slice %69 {offsets = [0, 224], sizes = [2, 32], strides = [1, 1]} : vector<2x256xf32> to vector<2x32xf32>
    %79 = arith.mulf %72, %47 : vector<2x32xf32>
    %80 = arith.mulf %71, %73 : vector<2x32xf32>
    %81 = arith.addf %79, %80 : vector<2x32xf32>
    %82 = arith.mulf %76, %50 : vector<2x32xf32>
    %83 = arith.mulf %75, %77 : vector<2x32xf32>
    %84 = arith.addf %82, %83 : vector<2x32xf32>
    %85 = tpu.concatenate %81, %84 in 1 : vector<2x32xf32>, vector<2x32xf32> -> vector<2x64xf32>
    %86 = math.tanh %85 : vector<2x64xf32>
    %87 = vector.extract_strided_slice %86 {offsets = [0, 0], sizes = [2, 32], strides = [1, 1]} : vector<2x64xf32> to vector<2x32xf32>
    %88 = arith.mulf %74, %87 : vector<2x32xf32>
    %89 = vector.extract_strided_slice %86 {offsets = [0, 32], sizes = [2, 32], strides = [1, 1]} : vector<2x64xf32> to vector<2x32xf32>
    %90 = arith.mulf %78, %89 : vector<2x32xf32>
    %c2 = arith.constant 2 : index
    %c0_29 = arith.constant 0 : index
    %91 = vector.load %arg20[%c2, %c0_29] : memref<16x64xf32, #tpu.memory_space<vmem>>, vector<2x32xf32>
    tpu.vector_store %arg20[%c2, %c0_29], %88 {strides = array<i32>} : memref<16x64xf32, #tpu.memory_space<vmem>>, vector<2x32xf32>,
    %c12 = arith.constant 12 : index
    %c32_30 = arith.constant 32 : index
    %92 = vector.load %arg20[%c12, %c32_30] : memref<16x64xf32, #tpu.memory_space<vmem>>, vector<2x32xf32>
    tpu.vector_store %arg20[%c12, %c32_30], %90 {strides = array<i32>} : memref<16x64xf32, #tpu.memory_space<vmem>>, vector<2x32xf32>,
    %93 = tpu.concatenate %88, %90 in 1 : vector<2x32xf32>, vector<2x32xf32> -> vector<2x64xf32>
    %cst_31 = arith.constant dense<0.000000e+00> : vector<2x256xf32>
    %94 = tpu.matmul %93, %20, %cst_31 {dimension_numbers = #tpu.dot_dimension_numbers<[1], [0], [0], [1], [0, 0, 1, 1], [], []>} : vector<2x64xf32>, vector<64x256xf32>, vector<2x256xf32> -> vector<2x256xf32>
    %95 = vector.extract_strided_slice %19 {offsets = [4, 0], sizes = [2, 128], strides = [1, 1]} : vector<16x256xf32> to vector<2x128xf32>
    %96 = vector.extract_strided_slice %19 {offsets = [10, 128], sizes = [2, 128], strides = [1, 1]} : vector<16x256xf32> to vector<2x128xf32>
    %97 = tpu.concatenate %95, %96 in 1 : vector<2x128xf32>, vector<2x128xf32> -> vector<2x256xf32>
    %98 = arith.addf %94, %97 : vector<2x256xf32>
    %99 = arith.negf %98 : vector<2x256xf32>
    %100 = math.exp %99 : vector<2x256xf32>
    %cst_32 = arith.constant 1.000000e+00 : f32
    %101 = vector.broadcast %cst_32 : f32 to vector<2x256xf32>
    %102 = arith.addf %101, %100 : vector<2x256xf32>
    %103 = arith.divf %101, %102 : vector<2x256xf32>
    %104 = math.tanh %98 : vector<2x256xf32>
    %105 = vector.extract_strided_slice %103 {offsets = [0, 0], sizes = [2, 32], strides = [1, 1]} : vector<2x256xf32> to vector<2x32xf32>
    %106 = vector.extract_strided_slice %103 {offsets = [0, 32], sizes = [2, 32], strides = [1, 1]} : vector<2x256xf32> to vector<2x32xf32>
    %107 = vector.extract_strided_slice %104 {offsets = [0, 64], sizes = [2, 32], strides = [1, 1]} : vector<2x256xf32> to vector<2x32xf32>
    %108 = vector.extract_strided_slice %103 {offsets = [0, 96], sizes = [2, 32], strides = [1, 1]} : vector<2x256xf32> to vector<2x32xf32>
    %109 = vector.extract_strided_slice %103 {offsets = [0, 128], sizes = [2, 32], strides = [1, 1]} : vector<2x256xf32> to vector<2x32xf32>
    %110 = vector.extract_strided_slice %103 {offsets = [0, 160], sizes = [2, 32], strides = [1, 1]} : vector<2x256xf32> to vector<2x32xf32>
    %111 = vector.extract_strided_slice %104 {offsets = [0, 192], sizes = [2, 32], strides = [1, 1]} : vector<2x256xf32> to vector<2x32xf32>
    %112 = vector.extract_strided_slice %103 {offsets = [0, 224], sizes = [2, 32], strides = [1, 1]} : vector<2x256xf32> to vector<2x32xf32>
    %113 = arith.mulf %106, %81 : vector<2x32xf32>
    %114 = arith.mulf %105, %107 : vector<2x32xf32>
    %115 = arith.addf %113, %114 : vector<2x32xf32>
    %116 = arith.mulf %110, %84 : vector<2x32xf32>
    %117 = arith.mulf %109, %111 : vector<2x32xf32>
    %118 = arith.addf %116, %117 : vector<2x32xf32>
    %119 = tpu.concatenate %115, %118 in 1 : vector<2x32xf32>, vector<2x32xf32> -> vector<2x64xf32>
    %120 = math.tanh %119 : vector<2x64xf32>
    %121 = vector.extract_strided_slice %120 {offsets = [0, 0], sizes = [2, 32], strides = [1, 1]} : vector<2x64xf32> to vector<2x32xf32>
    %122 = arith.mulf %108, %121 : vector<2x32xf32>
    %123 = vector.extract_strided_slice %120 {offsets = [0, 32], sizes = [2, 32], strides = [1, 1]} : vector<2x64xf32> to vector<2x32xf32>
    %124 = arith.mulf %112, %123 : vector<2x32xf32>
    %c4 = arith.constant 4 : index
    %c0_33 = arith.constant 0 : index
    %125 = vector.load %arg20[%c4, %c0_33] : memref<16x64xf32, #tpu.memory_space<vmem>>, vector<2x32xf32>
    tpu.vector_store %arg20[%c4, %c0_33], %122 {strides = array<i32>} : memref<16x64xf32, #tpu.memory_space<vmem>>, vector<2x32xf32>,
    %c10 = arith.constant 10 : index
    %c32_34 = arith.constant 32 : index
    %126 = vector.load %arg20[%c10, %c32_34] : memref<16x64xf32, #tpu.memory_space<vmem>>, vector<2x32xf32>
    tpu.vector_store %arg20[%c10, %c32_34], %124 {strides = array<i32>} : memref<16x64xf32, #tpu.memory_space<vmem>>, vector<2x32xf32>,
    %127 = tpu.concatenate %122, %124 in 1 : vector<2x32xf32>, vector<2x32xf32> -> vector<2x64xf32>
    %cst_35 = arith.constant dense<0.000000e+00> : vector<2x256xf32>
    %128 = tpu.matmul %127, %20, %cst_35 {dimension_numbers = #tpu.dot_dimension_numbers<[1], [0], [0], [1], [0, 0, 1, 1], [], []>} : vector<2x64xf32>, vector<64x256xf32>, vector<2x256xf32> -> vector<2x256xf32>
    %129 = vector.extract_strided_slice %19 {offsets = [6, 0], sizes = [2, 128], strides = [1, 1]} : vector<16x256xf32> to vector<2x128xf32>
    %130 = vector.extract_strided_slice %19 {offsets = [8, 128], sizes = [2, 128], strides = [1, 1]} : vector<16x256xf32> to vector<2x128xf32>
    %131 = tpu.concatenate %129, %130 in 1 : vector<2x128xf32>, vector<2x128xf32> -> vector<2x256xf32>
    %132 = arith.addf %128, %131 : vector<2x256xf32>
    %133 = arith.negf %132 : vector<2x256xf32>
    %134 = math.exp %133 : vector<2x256xf32>
    %cst_36 = arith.constant 1.000000e+00 : f32
    %135 = vector.broadcast %cst_36 : f32 to vector<2x256xf32>
    %136 = arith.addf %135, %134 : vector<2x256xf32>
    %137 = arith.divf %135, %136 : vector<2x256xf32>
    %138 = math.tanh %132 : vector<2x256xf32>
    %139 = vector.extract_strided_slice %137 {offsets = [0, 0], sizes = [2, 32], strides = [1, 1]} : vector<2x256xf32> to vector<2x32xf32>
    %140 = vector.extract_strided_slice %137 {offsets = [0, 32], sizes = [2, 32], strides = [1, 1]} : vector<2x256xf32> to vector<2x32xf32>
    %141 = vector.extract_strided_slice %138 {offsets = [0, 64], sizes = [2, 32], strides = [1, 1]} : vector<2x256xf32> to vector<2x32xf32>
    %142 = vector.extract_strided_slice %137 {offsets = [0, 96], sizes = [2, 32], strides = [1, 1]} : vector<2x256xf32> to vector<2x32xf32>
    %143 = vector.extract_strided_slice %137 {offsets = [0, 128], sizes = [2, 32], strides = [1, 1]} : vector<2x256xf32> to vector<2x32xf32>
    %144 = vector.extract_strided_slice %137 {offsets = [0, 160], sizes = [2, 32], strides = [1, 1]} : vector<2x256xf32> to vector<2x32xf32>
    %145 = vector.extract_strided_slice %138 {offsets = [0, 192], sizes = [2, 32], strides = [1, 1]} : vector<2x256xf32> to vector<2x32xf32>
    %146 = vector.extract_strided_slice %137 {offsets = [0, 224], sizes = [2, 32], strides = [1, 1]} : vector<2x256xf32> to vector<2x32xf32>
    %147 = arith.mulf %140, %115 : vector<2x32xf32>
    %148 = arith.mulf %139, %141 : vector<2x32xf32>
    %149 = arith.addf %147, %148 : vector<2x32xf32>
    %150 = arith.mulf %144, %118 : vector<2x32xf32>
    %151 = arith.mulf %143, %145 : vector<2x32xf32>
    %152 = arith.addf %150, %151 : vector<2x32xf32>
    %153 = tpu.concatenate %149, %152 in 1 : vector<2x32xf32>, vector<2x32xf32> -> vector<2x64xf32>
    %154 = math.tanh %153 : vector<2x64xf32>
    %155 = vector.extract_strided_slice %154 {offsets = [0, 0], sizes = [2, 32], strides = [1, 1]} : vector<2x64xf32> to vector<2x32xf32>
    %156 = arith.mulf %142, %155 : vector<2x32xf32>
    %157 = vector.extract_strided_slice %154 {offsets = [0, 32], sizes = [2, 32], strides = [1, 1]} : vector<2x64xf32> to vector<2x32xf32>
    %158 = arith.mulf %146, %157 : vector<2x32xf32>
    %c6 = arith.constant 6 : index
    %c0_37 = arith.constant 0 : index
    %159 = vector.load %arg20[%c6, %c0_37] : memref<16x64xf32, #tpu.memory_space<vmem>>, vector<2x32xf32>
    tpu.vector_store %arg20[%c6, %c0_37], %156 {strides = array<i32>} : memref<16x64xf32, #tpu.memory_space<vmem>>, vector<2x32xf32>,
    %c8 = arith.constant 8 : index
    %c32_38 = arith.constant 32 : index
    %160 = vector.load %arg20[%c8, %c32_38] : memref<16x64xf32, #tpu.memory_space<vmem>>, vector<2x32xf32>
    tpu.vector_store %arg20[%c8, %c32_38], %158 {strides = array<i32>} : memref<16x64xf32, #tpu.memory_space<vmem>>, vector<2x32xf32>,
    %161 = tpu.concatenate %156, %158 in 1 : vector<2x32xf32>, vector<2x32xf32> -> vector<2x64xf32>
    %cst_39 = arith.constant dense<0.000000e+00> : vector<2x256xf32>
    %162 = tpu.matmul %161, %20, %cst_39 {dimension_numbers = #tpu.dot_dimension_numbers<[1], [0], [0], [1], [0, 0, 1, 1], [], []>} : vector<2x64xf32>, vector<64x256xf32>, vector<2x256xf32> -> vector<2x256xf32>
    %163 = vector.extract_strided_slice %19 {offsets = [8, 0], sizes = [2, 128], strides = [1, 1]} : vector<16x256xf32> to vector<2x128xf32>
    %164 = vector.extract_strided_slice %19 {offsets = [6, 128], sizes = [2, 128], strides = [1, 1]} : vector<16x256xf32> to vector<2x128xf32>
    %165 = tpu.concatenate %163, %164 in 1 : vector<2x128xf32>, vector<2x128xf32> -> vector<2x256xf32>
    %166 = arith.addf %162, %165 : vector<2x256xf32>
    %167 = arith.negf %166 : vector<2x256xf32>
    %168 = math.exp %167 : vector<2x256xf32>
    %cst_40 = arith.constant 1.000000e+00 : f32
    %169 = vector.broadcast %cst_40 : f32 to vector<2x256xf32>
    %170 = arith.addf %169, %168 : vector<2x256xf32>
    %171 = arith.divf %169, %170 : vector<2x256xf32>
    %172 = math.tanh %166 : vector<2x256xf32>
    %173 = vector.extract_strided_slice %171 {offsets = [0, 0], sizes = [2, 32], strides = [1, 1]} : vector<2x256xf32> to vector<2x32xf32>
    %174 = vector.extract_strided_slice %171 {offsets = [0, 32], sizes = [2, 32], strides = [1, 1]} : vector<2x256xf32> to vector<2x32xf32>
    %175 = vector.extract_strided_slice %172 {offsets = [0, 64], sizes = [2, 32], strides = [1, 1]} : vector<2x256xf32> to vector<2x32xf32>
    %176 = vector.extract_strided_slice %171 {offsets = [0, 96], sizes = [2, 32], strides = [1, 1]} : vector<2x256xf32> to vector<2x32xf32>
    %177 = vector.extract_strided_slice %171 {offsets = [0, 128], sizes = [2, 32], strides = [1, 1]} : vector<2x256xf32> to vector<2x32xf32>
    %178 = vector.extract_strided_slice %171 {offsets = [0, 160], sizes = [2, 32], strides = [1, 1]} : vector<2x256xf32> to vector<2x32xf32>
    %179 = vector.extract_strided_slice %172 {offsets = [0, 192], sizes = [2, 32], strides = [1, 1]} : vector<2x256xf32> to vector<2x32xf32>
    %180 = vector.extract_strided_slice %171 {offsets = [0, 224], sizes = [2, 32], strides = [1, 1]} : vector<2x256xf32> to vector<2x32xf32>
    %181 = arith.mulf %174, %149 : vector<2x32xf32>
    %182 = arith.mulf %173, %175 : vector<2x32xf32>
    %183 = arith.addf %181, %182 : vector<2x32xf32>
    %184 = arith.mulf %178, %152 : vector<2x32xf32>
    %185 = arith.mulf %177, %179 : vector<2x32xf32>
    %186 = arith.addf %184, %185 : vector<2x32xf32>
    %187 = tpu.concatenate %183, %186 in 1 : vector<2x32xf32>, vector<2x32xf32> -> vector<2x64xf32>
    %188 = math.tanh %187 : vector<2x64xf32>
    %189 = vector.extract_strided_slice %188 {offsets = [0, 0], sizes = [2, 32], strides = [1, 1]} : vector<2x64xf32> to vector<2x32xf32>
    %190 = arith.mulf %176, %189 : vector<2x32xf32>
    %191 = vector.extract_strided_slice %188 {offsets = [0, 32], sizes = [2, 32], strides = [1, 1]} : vector<2x64xf32> to vector<2x32xf32>
    %192 = arith.mulf %180, %191 : vector<2x32xf32>
    %c8_41 = arith.constant 8 : index
    %c0_42 = arith.constant 0 : index
    %193 = vector.load %arg20[%c8_41, %c0_42] : memref<16x64xf32, #tpu.memory_space<vmem>>, vector<2x32xf32>
    tpu.vector_store %arg20[%c8_41, %c0_42], %190 {strides = array<i32>} : memref<16x64xf32, #tpu.memory_space<vmem>>, vector<2x32xf32>,
    %c6_43 = arith.constant 6 : index
    %c32_44 = arith.constant 32 : index
    %194 = vector.load %arg20[%c6_43, %c32_44] : memref<16x64xf32, #tpu.memory_space<vmem>>, vector<2x32xf32>
    tpu.vector_store %arg20[%c6_43, %c32_44], %192 {strides = array<i32>} : memref<16x64xf32, #tpu.memory_space<vmem>>, vector<2x32xf32>,
    %195 = tpu.concatenate %190, %192 in 1 : vector<2x32xf32>, vector<2x32xf32> -> vector<2x64xf32>
    %cst_45 = arith.constant dense<0.000000e+00> : vector<2x256xf32>
    %196 = tpu.matmul %195, %20, %cst_45 {dimension_numbers = #tpu.dot_dimension_numbers<[1], [0], [0], [1], [0, 0, 1, 1], [], []>} : vector<2x64xf32>, vector<64x256xf32>, vector<2x256xf32> -> vector<2x256xf32>
    %197 = vector.extract_strided_slice %19 {offsets = [10, 0], sizes = [2, 128], strides = [1, 1]} : vector<16x256xf32> to vector<2x128xf32>
    %198 = vector.extract_strided_slice %19 {offsets = [4, 128], sizes = [2, 128], strides = [1, 1]} : vector<16x256xf32> to vector<2x128xf32>
    %199 = tpu.concatenate %197, %198 in 1 : vector<2x128xf32>, vector<2x128xf32> -> vector<2x256xf32>
    %200 = arith.addf %196, %199 : vector<2x256xf32>
    %201 = arith.negf %200 : vector<2x256xf32>
    %202 = math.exp %201 : vector<2x256xf32>
    %cst_46 = arith.constant 1.000000e+00 : f32
    %203 = vector.broadcast %cst_46 : f32 to vector<2x256xf32>
    %204 = arith.addf %203, %202 : vector<2x256xf32>
    %205 = arith.divf %203, %204 : vector<2x256xf32>
    %206 = math.tanh %200 : vector<2x256xf32>
    %207 = vector.extract_strided_slice %205 {offsets = [0, 0], sizes = [2, 32], strides = [1, 1]} : vector<2x256xf32> to vector<2x32xf32>
    %208 = vector.extract_strided_slice %205 {offsets = [0, 32], sizes = [2, 32], strides = [1, 1]} : vector<2x256xf32> to vector<2x32xf32>
    %209 = vector.extract_strided_slice %206 {offsets = [0, 64], sizes = [2, 32], strides = [1, 1]} : vector<2x256xf32> to vector<2x32xf32>
    %210 = vector.extract_strided_slice %205 {offsets = [0, 96], sizes = [2, 32], strides = [1, 1]} : vector<2x256xf32> to vector<2x32xf32>
    %211 = vector.extract_strided_slice %205 {offsets = [0, 128], sizes = [2, 32], strides = [1, 1]} : vector<2x256xf32> to vector<2x32xf32>
    %212 = vector.extract_strided_slice %205 {offsets = [0, 160], sizes = [2, 32], strides = [1, 1]} : vector<2x256xf32> to vector<2x32xf32>
    %213 = vector.extract_strided_slice %206 {offsets = [0, 192], sizes = [2, 32], strides = [1, 1]} : vector<2x256xf32> to vector<2x32xf32>
    %214 = vector.extract_strided_slice %205 {offsets = [0, 224], sizes = [2, 32], strides = [1, 1]} : vector<2x256xf32> to vector<2x32xf32>
    %215 = arith.mulf %208, %183 : vector<2x32xf32>
    %216 = arith.mulf %207, %209 : vector<2x32xf32>
    %217 = arith.addf %215, %216 : vector<2x32xf32>
    %218 = arith.mulf %212, %186 : vector<2x32xf32>
    %219 = arith.mulf %211, %213 : vector<2x32xf32>
    %220 = arith.addf %218, %219 : vector<2x32xf32>
    %221 = tpu.concatenate %217, %220 in 1 : vector<2x32xf32>, vector<2x32xf32> -> vector<2x64xf32>
    %222 = math.tanh %221 : vector<2x64xf32>
    %223 = vector.extract_strided_slice %222 {offsets = [0, 0], sizes = [2, 32], strides = [1, 1]} : vector<2x64xf32> to vector<2x32xf32>
    %224 = arith.mulf %210, %223 : vector<2x32xf32>
    %225 = vector.extract_strided_slice %222 {offsets = [0, 32], sizes = [2, 32], strides = [1, 1]} : vector<2x64xf32> to vector<2x32xf32>
    %226 = arith.mulf %214, %225 : vector<2x32xf32>
    %c10_47 = arith.constant 10 : index
    %c0_48 = arith.constant 0 : index
    %227 = vector.load %arg20[%c10_47, %c0_48] : memref<16x64xf32, #tpu.memory_space<vmem>>, vector<2x32xf32>
    tpu.vector_store %arg20[%c10_47, %c0_48], %224 {strides = array<i32>} : memref<16x64xf32, #tpu.memory_space<vmem>>, vector<2x32xf32>,
    %c4_49 = arith.constant 4 : index
    %c32_50 = arith.constant 32 : index
    %228 = vector.load %arg20[%c4_49, %c32_50] : memref<16x64xf32, #tpu.memory_space<vmem>>, vector<2x32xf32>
    tpu.vector_store %arg20[%c4_49, %c32_50], %226 {strides = array<i32>} : memref<16x64xf32, #tpu.memory_space<vmem>>, vector<2x32xf32>,
    %229 = tpu.concatenate %224, %226 in 1 : vector<2x32xf32>, vector<2x32xf32> -> vector<2x64xf32>
    %cst_51 = arith.constant dense<0.000000e+00> : vector<2x256xf32>
    %230 = tpu.matmul %229, %20, %cst_51 {dimension_numbers = #tpu.dot_dimension_numbers<[1], [0], [0], [1], [0, 0, 1, 1], [], []>} : vector<2x64xf32>, vector<64x256xf32>, vector<2x256xf32> -> vector<2x256xf32>
    %231 = vector.extract_strided_slice %19 {offsets = [12, 0], sizes = [2, 128], strides = [1, 1]} : vector<16x256xf32> to vector<2x128xf32>
    %232 = vector.extract_strided_slice %19 {offsets = [2, 128], sizes = [2, 128], strides = [1, 1]} : vector<16x256xf32> to vector<2x128xf32>
    %233 = tpu.concatenate %231, %232 in 1 : vector<2x128xf32>, vector<2x128xf32> -> vector<2x256xf32>
    %234 = arith.addf %230, %233 : vector<2x256xf32>
    %235 = arith.negf %234 : vector<2x256xf32>
    %236 = math.exp %235 : vector<2x256xf32>
    %cst_52 = arith.constant 1.000000e+00 : f32
    %237 = vector.broadcast %cst_52 : f32 to vector<2x256xf32>
    %238 = arith.addf %237, %236 : vector<2x256xf32>
    %239 = arith.divf %237, %238 : vector<2x256xf32>
    %240 = math.tanh %234 : vector<2x256xf32>
    %241 = vector.extract_strided_slice %239 {offsets = [0, 0], sizes = [2, 32], strides = [1, 1]} : vector<2x256xf32> to vector<2x32xf32>
    %242 = vector.extract_strided_slice %239 {offsets = [0, 32], sizes = [2, 32], strides = [1, 1]} : vector<2x256xf32> to vector<2x32xf32>
    %243 = vector.extract_strided_slice %240 {offsets = [0, 64], sizes = [2, 32], strides = [1, 1]} : vector<2x256xf32> to vector<2x32xf32>
    %244 = vector.extract_strided_slice %239 {offsets = [0, 96], sizes = [2, 32], strides = [1, 1]} : vector<2x256xf32> to vector<2x32xf32>
    %245 = vector.extract_strided_slice %239 {offsets = [0, 128], sizes = [2, 32], strides = [1, 1]} : vector<2x256xf32> to vector<2x32xf32>
    %246 = vector.extract_strided_slice %239 {offsets = [0, 160], sizes = [2, 32], strides = [1, 1]} : vector<2x256xf32> to vector<2x32xf32>
    %247 = vector.extract_strided_slice %240 {offsets = [0, 192], sizes = [2, 32], strides = [1, 1]} : vector<2x256xf32> to vector<2x32xf32>
    %248 = vector.extract_strided_slice %239 {offsets = [0, 224], sizes = [2, 32], strides = [1, 1]} : vector<2x256xf32> to vector<2x32xf32>
    %249 = arith.mulf %242, %217 : vector<2x32xf32>
    %250 = arith.mulf %241, %243 : vector<2x32xf32>
    %251 = arith.addf %249, %250 : vector<2x32xf32>
    %252 = arith.mulf %246, %220 : vector<2x32xf32>
    %253 = arith.mulf %245, %247 : vector<2x32xf32>
    %254 = arith.addf %252, %253 : vector<2x32xf32>
    %255 = tpu.concatenate %251, %254 in 1 : vector<2x32xf32>, vector<2x32xf32> -> vector<2x64xf32>
    %256 = math.tanh %255 : vector<2x64xf32>
    %257 = vector.extract_strided_slice %256 {offsets = [0, 0], sizes = [2, 32], strides = [1, 1]} : vector<2x64xf32> to vector<2x32xf32>
    %258 = arith.mulf %244, %257 : vector<2x32xf32>
    %259 = vector.extract_strided_slice %256 {offsets = [0, 32], sizes = [2, 32], strides = [1, 1]} : vector<2x64xf32> to vector<2x32xf32>
    %260 = arith.mulf %248, %259 : vector<2x32xf32>
    %c12_53 = arith.constant 12 : index
    %c0_54 = arith.constant 0 : index
    %261 = vector.load %arg20[%c12_53, %c0_54] : memref<16x64xf32, #tpu.memory_space<vmem>>, vector<2x32xf32>
    tpu.vector_store %arg20[%c12_53, %c0_54], %258 {strides = array<i32>} : memref<16x64xf32, #tpu.memory_space<vmem>>, vector<2x32xf32>,
    %c2_55 = arith.constant 2 : index
    %c32_56 = arith.constant 32 : index
    %262 = vector.load %arg20[%c2_55, %c32_56] : memref<16x64xf32, #tpu.memory_space<vmem>>, vector<2x32xf32>
    tpu.vector_store %arg20[%c2_55, %c32_56], %260 {strides = array<i32>} : memref<16x64xf32, #tpu.memory_space<vmem>>, vector<2x32xf32>,
    %263 = tpu.concatenate %258, %260 in 1 : vector<2x32xf32>, vector<2x32xf32> -> vector<2x64xf32>
    %cst_57 = arith.constant dense<0.000000e+00> : vector<2x256xf32>
    %264 = tpu.matmul %263, %20, %cst_57 {dimension_numbers = #tpu.dot_dimension_numbers<[1], [0], [0], [1], [0, 0, 1, 1], [], []>} : vector<2x64xf32>, vector<64x256xf32>, vector<2x256xf32> -> vector<2x256xf32>
    %265 = vector.extract_strided_slice %19 {offsets = [14, 0], sizes = [2, 128], strides = [1, 1]} : vector<16x256xf32> to vector<2x128xf32>
    %266 = vector.extract_strided_slice %19 {offsets = [0, 128], sizes = [2, 128], strides = [1, 1]} : vector<16x256xf32> to vector<2x128xf32>
    %267 = tpu.concatenate %265, %266 in 1 : vector<2x128xf32>, vector<2x128xf32> -> vector<2x256xf32>
    %268 = arith.addf %264, %267 : vector<2x256xf32>
    %269 = arith.negf %268 : vector<2x256xf32>
    %270 = math.exp %269 : vector<2x256xf32>
    %cst_58 = arith.constant 1.000000e+00 : f32
    %271 = vector.broadcast %cst_58 : f32 to vector<2x256xf32>
    %272 = arith.addf %271, %270 : vector<2x256xf32>
    %273 = arith.divf %271, %272 : vector<2x256xf32>
    %274 = math.tanh %268 : vector<2x256xf32>
    %275 = vector.extract_strided_slice %273 {offsets = [0, 0], sizes = [2, 32], strides = [1, 1]} : vector<2x256xf32> to vector<2x32xf32>
    %276 = vector.extract_strided_slice %273 {offsets = [0, 32], sizes = [2, 32], strides = [1, 1]} : vector<2x256xf32> to vector<2x32xf32>
    %277 = vector.extract_strided_slice %274 {offsets = [0, 64], sizes = [2, 32], strides = [1, 1]} : vector<2x256xf32> to vector<2x32xf32>
    %278 = vector.extract_strided_slice %273 {offsets = [0, 96], sizes = [2, 32], strides = [1, 1]} : vector<2x256xf32> to vector<2x32xf32>
    %279 = vector.extract_strided_slice %273 {offsets = [0, 128], sizes = [2, 32], strides = [1, 1]} : vector<2x256xf32> to vector<2x32xf32>
    %280 = vector.extract_strided_slice %273 {offsets = [0, 160], sizes = [2, 32], strides = [1, 1]} : vector<2x256xf32> to vector<2x32xf32>
    %281 = vector.extract_strided_slice %274 {offsets = [0, 192], sizes = [2, 32], strides = [1, 1]} : vector<2x256xf32> to vector<2x32xf32>
    %282 = vector.extract_strided_slice %273 {offsets = [0, 224], sizes = [2, 32], strides = [1, 1]} : vector<2x256xf32> to vector<2x32xf32>
    %283 = arith.mulf %276, %251 : vector<2x32xf32>
    %284 = arith.mulf %275, %277 : vector<2x32xf32>
    %285 = arith.addf %283, %284 : vector<2x32xf32>
    %286 = arith.mulf %280, %254 : vector<2x32xf32>
    %287 = arith.mulf %279, %281 : vector<2x32xf32>
    %288 = arith.addf %286, %287 : vector<2x32xf32>
    %289 = tpu.concatenate %285, %288 in 1 : vector<2x32xf32>, vector<2x32xf32> -> vector<2x64xf32>
    %290 = math.tanh %289 : vector<2x64xf32>
    %291 = vector.extract_strided_slice %290 {offsets = [0, 0], sizes = [2, 32], strides = [1, 1]} : vector<2x64xf32> to vector<2x32xf32>
    %292 = arith.mulf %278, %291 : vector<2x32xf32>
    %293 = vector.extract_strided_slice %290 {offsets = [0, 32], sizes = [2, 32], strides = [1, 1]} : vector<2x64xf32> to vector<2x32xf32>
    %294 = arith.mulf %282, %293 : vector<2x32xf32>
    %c14_59 = arith.constant 14 : index
    %c0_60 = arith.constant 0 : index
    %295 = vector.load %arg20[%c14_59, %c0_60] : memref<16x64xf32, #tpu.memory_space<vmem>>, vector<2x32xf32>
    tpu.vector_store %arg20[%c14_59, %c0_60], %292 {strides = array<i32>} : memref<16x64xf32, #tpu.memory_space<vmem>>, vector<2x32xf32>,
    %c0_61 = arith.constant 0 : index
    %c32_62 = arith.constant 32 : index
    %296 = vector.load %arg20[%c0_61, %c32_62] : memref<16x64xf32, #tpu.memory_space<vmem>>, vector<2x32xf32>
    tpu.vector_store %arg20[%c0_61, %c32_62], %294 {strides = array<i32>} : memref<16x64xf32, #tpu.memory_space<vmem>>, vector<2x32xf32>,
    %c0_63 = arith.constant 0 : index
    %c0_64 = arith.constant 0 : index
    %297 = vector.load %arg20[%c0_63, %c0_64] : memref<16x64xf32, #tpu.memory_space<vmem>>, vector<16x64xf32>
    %c0_65 = arith.constant 0 : index
    %c0_66 = arith.constant 0 : index
    %298 = vector.load %arg8[%c0_65, %c0_66] : memref<64x256xf32, #tpu.memory_space<vmem>>, vector<64x256xf32>
    %cst_67 = arith.constant dense<0.000000e+00> : vector<16x256xf32>
    %299 = tpu.matmul %297, %298, %cst_67 {dimension_numbers = #tpu.dot_dimension_numbers<[1], [0], [0], [1], [0, 0, 1, 1], [], []>} : vector<16x64xf32>, vector<64x256xf32>, vector<16x256xf32> -> vector<16x256xf32>
    %c0_68 = arith.constant 0 : index
    %c0_69 = arith.constant 0 : index
    %300 = vector.load %arg9[%c0_68, %c0_69] : memref<1x256xf32, #tpu.memory_space<vmem>>, vector<1x256xf32>
    %301 = vector.broadcast %300 : vector<1x256xf32> to vector<16x256xf32>
    %302 = arith.addf %299, %301 : vector<16x256xf32>
    %c0_70 = arith.constant 0 : index
    %c0_71 = arith.constant 0 : index
    %303 = vector.load %arg10[%c0_70, %c0_71] : memref<64x256xf32, #tpu.memory_space<vmem>>, vector<64x256xf32>
    %cst_72 = arith.constant 0.000000e+00 : f32
    %304 = vector.broadcast %cst_72 : f32 to vector<2x32xf32>
    %cst_73 = arith.constant 0.000000e+00 : f32
    %305 = vector.broadcast %cst_73 : f32 to vector<2x32xf32>
    %cst_74 = arith.constant 0.000000e+00 : f32
    %306 = vector.broadcast %cst_74 : f32 to vector<2x32xf32>
    %cst_75 = arith.constant 0.000000e+00 : f32
    %307 = vector.broadcast %cst_75 : f32 to vector<2x32xf32>
    %308 = tpu.concatenate %304, %306 in 1 : vector<2x32xf32>, vector<2x32xf32> -> vector<2x64xf32>
    %cst_76 = arith.constant dense<0.000000e+00> : vector<2x256xf32>
    %309 = tpu.matmul %308, %303, %cst_76 {dimension_numbers = #tpu.dot_dimension_numbers<[1], [0], [0], [1], [0, 0, 1, 1], [], []>} : vector<2x64xf32>, vector<64x256xf32>, vector<2x256xf32> -> vector<2x256xf32>
    %310 = vector.extract_strided_slice %302 {offsets = [0, 0], sizes = [2, 128], strides = [1, 1]} : vector<16x256xf32> to vector<2x128xf32>
    %311 = vector.extract_strided_slice %302 {offsets = [14, 128], sizes = [2, 128], strides = [1, 1]} : vector<16x256xf32> to vector<2x128xf32>
    %312 = tpu.concatenate %310, %311 in 1 : vector<2x128xf32>, vector<2x128xf32> -> vector<2x256xf32>
    %313 = arith.addf %309, %312 : vector<2x256xf32>
    %314 = arith.negf %313 : vector<2x256xf32>
    %315 = math.exp %314 : vector<2x256xf32>
    %cst_77 = arith.constant 1.000000e+00 : f32
    %316 = vector.broadcast %cst_77 : f32 to vector<2x256xf32>
    %317 = arith.addf %316, %315 : vector<2x256xf32>
    %318 = arith.divf %316, %317 : vector<2x256xf32>
    %319 = math.tanh %313 : vector<2x256xf32>
    %320 = vector.extract_strided_slice %318 {offsets = [0, 0], sizes = [2, 32], strides = [1, 1]} : vector<2x256xf32> to vector<2x32xf32>
    %321 = vector.extract_strided_slice %318 {offsets = [0, 32], sizes = [2, 32], strides = [1, 1]} : vector<2x256xf32> to vector<2x32xf32>
    %322 = vector.extract_strided_slice %319 {offsets = [0, 64], sizes = [2, 32], strides = [1, 1]} : vector<2x256xf32> to vector<2x32xf32>
    %323 = vector.extract_strided_slice %318 {offsets = [0, 96], sizes = [2, 32], strides = [1, 1]} : vector<2x256xf32> to vector<2x32xf32>
    %324 = vector.extract_strided_slice %318 {offsets = [0, 128], sizes = [2, 32], strides = [1, 1]} : vector<2x256xf32> to vector<2x32xf32>
    %325 = vector.extract_strided_slice %318 {offsets = [0, 160], sizes = [2, 32], strides = [1, 1]} : vector<2x256xf32> to vector<2x32xf32>
    %326 = vector.extract_strided_slice %319 {offsets = [0, 192], sizes = [2, 32], strides = [1, 1]} : vector<2x256xf32> to vector<2x32xf32>
    %327 = vector.extract_strided_slice %318 {offsets = [0, 224], sizes = [2, 32], strides = [1, 1]} : vector<2x256xf32> to vector<2x32xf32>
    %328 = arith.mulf %321, %305 : vector<2x32xf32>
    %329 = arith.mulf %320, %322 : vector<2x32xf32>
    %330 = arith.addf %328, %329 : vector<2x32xf32>
    %331 = arith.mulf %325, %307 : vector<2x32xf32>
    %332 = arith.mulf %324, %326 : vector<2x32xf32>
    %333 = arith.addf %331, %332 : vector<2x32xf32>
    %334 = tpu.concatenate %330, %333 in 1 : vector<2x32xf32>, vector<2x32xf32> -> vector<2x64xf32>
    %335 = math.tanh %334 : vector<2x64xf32>
    %336 = vector.extract_strided_slice %335 {offsets = [0, 0], sizes = [2, 32], strides = [1, 1]} : vector<2x64xf32> to vector<2x32xf32>
    %337 = arith.mulf %323, %336 : vector<2x32xf32>
    %338 = vector.extract_strided_slice %335 {offsets = [0, 32], sizes = [2, 32], strides = [1, 1]} : vector<2x64xf32> to vector<2x32xf32>
    %339 = arith.mulf %327, %338 : vector<2x32xf32>
    %c0_78 = arith.constant 0 : index
    %c0_79 = arith.constant 0 : index
    %340 = vector.load %arg20[%c0_78, %c0_79] : memref<16x64xf32, #tpu.memory_space<vmem>>, vector<2x32xf32>
    tpu.vector_store %arg20[%c0_78, %c0_79], %337 {strides = array<i32>} : memref<16x64xf32, #tpu.memory_space<vmem>>, vector<2x32xf32>,
    %c14_80 = arith.constant 14 : index
    %c32_81 = arith.constant 32 : index
    %341 = vector.load %arg20[%c14_80, %c32_81] : memref<16x64xf32, #tpu.memory_space<vmem>>, vector<2x32xf32>
    tpu.vector_store %arg20[%c14_80, %c32_81], %339 {strides = array<i32>} : memref<16x64xf32, #tpu.memory_space<vmem>>, vector<2x32xf32>,
    %342 = tpu.concatenate %337, %339 in 1 : vector<2x32xf32>, vector<2x32xf32> -> vector<2x64xf32>
    %cst_82 = arith.constant dense<0.000000e+00> : vector<2x256xf32>
    %343 = tpu.matmul %342, %303, %cst_82 {dimension_numbers = #tpu.dot_dimension_numbers<[1], [0], [0], [1], [0, 0, 1, 1], [], []>} : vector<2x64xf32>, vector<64x256xf32>, vector<2x256xf32> -> vector<2x256xf32>
    %344 = vector.extract_strided_slice %302 {offsets = [2, 0], sizes = [2, 128], strides = [1, 1]} : vector<16x256xf32> to vector<2x128xf32>
    %345 = vector.extract_strided_slice %302 {offsets = [12, 128], sizes = [2, 128], strides = [1, 1]} : vector<16x256xf32> to vector<2x128xf32>
    %346 = tpu.concatenate %344, %345 in 1 : vector<2x128xf32>, vector<2x128xf32> -> vector<2x256xf32>
    %347 = arith.addf %343, %346 : vector<2x256xf32>
    %348 = arith.negf %347 : vector<2x256xf32>
    %349 = math.exp %348 : vector<2x256xf32>
    %cst_83 = arith.constant 1.000000e+00 : f32
    %350 = vector.broadcast %cst_83 : f32 to vector<2x256xf32>
    %351 = arith.addf %350, %349 : vector<2x256xf32>
    %352 = arith.divf %350, %351 : vector<2x256xf32>
    %353 = math.tanh %347 : vector<2x256xf32>
    %354 = vector.extract_strided_slice %352 {offsets = [0, 0], sizes = [2, 32], strides = [1, 1]} : vector<2x256xf32> to vector<2x32xf32>
    %355 = vector.extract_strided_slice %352 {offsets = [0, 32], sizes = [2, 32], strides = [1, 1]} : vector<2x256xf32> to vector<2x32xf32>
    %356 = vector.extract_strided_slice %353 {offsets = [0, 64], sizes = [2, 32], strides = [1, 1]} : vector<2x256xf32> to vector<2x32xf32>
    %357 = vector.extract_strided_slice %352 {offsets = [0, 96], sizes = [2, 32], strides = [1, 1]} : vector<2x256xf32> to vector<2x32xf32>
    %358 = vector.extract_strided_slice %352 {offsets = [0, 128], sizes = [2, 32], strides = [1, 1]} : vector<2x256xf32> to vector<2x32xf32>
    %359 = vector.extract_strided_slice %352 {offsets = [0, 160], sizes = [2, 32], strides = [1, 1]} : vector<2x256xf32> to vector<2x32xf32>
    %360 = vector.extract_strided_slice %353 {offsets = [0, 192], sizes = [2, 32], strides = [1, 1]} : vector<2x256xf32> to vector<2x32xf32>
    %361 = vector.extract_strided_slice %352 {offsets = [0, 224], sizes = [2, 32], strides = [1, 1]} : vector<2x256xf32> to vector<2x32xf32>
    %362 = arith.mulf %355, %330 : vector<2x32xf32>
    %363 = arith.mulf %354, %356 : vector<2x32xf32>
    %364 = arith.addf %362, %363 : vector<2x32xf32>
    %365 = arith.mulf %359, %333 : vector<2x32xf32>
    %366 = arith.mulf %358, %360 : vector<2x32xf32>
    %367 = arith.addf %365, %366 : vector<2x32xf32>
    %368 = tpu.concatenate %364, %367 in 1 : vector<2x32xf32>, vector<2x32xf32> -> vector<2x64xf32>
    %369 = math.tanh %368 : vector<2x64xf32>
    %370 = vector.extract_strided_slice %369 {offsets = [0, 0], sizes = [2, 32], strides = [1, 1]} : vector<2x64xf32> to vector<2x32xf32>
    %371 = arith.mulf %357, %370 : vector<2x32xf32>
    %372 = vector.extract_strided_slice %369 {offsets = [0, 32], sizes = [2, 32], strides = [1, 1]} : vector<2x64xf32> to vector<2x32xf32>
    %373 = arith.mulf %361, %372 : vector<2x32xf32>
    %c2_84 = arith.constant 2 : index
    %c0_85 = arith.constant 0 : index
    %374 = vector.load %arg20[%c2_84, %c0_85] : memref<16x64xf32, #tpu.memory_space<vmem>>, vector<2x32xf32>
    tpu.vector_store %arg20[%c2_84, %c0_85], %371 {strides = array<i32>} : memref<16x64xf32, #tpu.memory_space<vmem>>, vector<2x32xf32>,
    %c12_86 = arith.constant 12 : index
    %c32_87 = arith.constant 32 : index
    %375 = vector.load %arg20[%c12_86, %c32_87] : memref<16x64xf32, #tpu.memory_space<vmem>>, vector<2x32xf32>
    tpu.vector_store %arg20[%c12_86, %c32_87], %373 {strides = array<i32>} : memref<16x64xf32, #tpu.memory_space<vmem>>, vector<2x32xf32>,
    %376 = tpu.concatenate %371, %373 in 1 : vector<2x32xf32>, vector<2x32xf32> -> vector<2x64xf32>
    %cst_88 = arith.constant dense<0.000000e+00> : vector<2x256xf32>
    %377 = tpu.matmul %376, %303, %cst_88 {dimension_numbers = #tpu.dot_dimension_numbers<[1], [0], [0], [1], [0, 0, 1, 1], [], []>} : vector<2x64xf32>, vector<64x256xf32>, vector<2x256xf32> -> vector<2x256xf32>
    %378 = vector.extract_strided_slice %302 {offsets = [4, 0], sizes = [2, 128], strides = [1, 1]} : vector<16x256xf32> to vector<2x128xf32>
    %379 = vector.extract_strided_slice %302 {offsets = [10, 128], sizes = [2, 128], strides = [1, 1]} : vector<16x256xf32> to vector<2x128xf32>
    %380 = tpu.concatenate %378, %379 in 1 : vector<2x128xf32>, vector<2x128xf32> -> vector<2x256xf32>
    %381 = arith.addf %377, %380 : vector<2x256xf32>
    %382 = arith.negf %381 : vector<2x256xf32>
    %383 = math.exp %382 : vector<2x256xf32>
    %cst_89 = arith.constant 1.000000e+00 : f32
    %384 = vector.broadcast %cst_89 : f32 to vector<2x256xf32>
    %385 = arith.addf %384, %383 : vector<2x256xf32>
    %386 = arith.divf %384, %385 : vector<2x256xf32>
    %387 = math.tanh %381 : vector<2x256xf32>
    %388 = vector.extract_strided_slice %386 {offsets = [0, 0], sizes = [2, 32], strides = [1, 1]} : vector<2x256xf32> to vector<2x32xf32>
    %389 = vector.extract_strided_slice %386 {offsets = [0, 32], sizes = [2, 32], strides = [1, 1]} : vector<2x256xf32> to vector<2x32xf32>
    %390 = vector.extract_strided_slice %387 {offsets = [0, 64], sizes = [2, 32], strides = [1, 1]} : vector<2x256xf32> to vector<2x32xf32>
    %391 = vector.extract_strided_slice %386 {offsets = [0, 96], sizes = [2, 32], strides = [1, 1]} : vector<2x256xf32> to vector<2x32xf32>
    %392 = vector.extract_strided_slice %386 {offsets = [0, 128], sizes = [2, 32], strides = [1, 1]} : vector<2x256xf32> to vector<2x32xf32>
    %393 = vector.extract_strided_slice %386 {offsets = [0, 160], sizes = [2, 32], strides = [1, 1]} : vector<2x256xf32> to vector<2x32xf32>
    %394 = vector.extract_strided_slice %387 {offsets = [0, 192], sizes = [2, 32], strides = [1, 1]} : vector<2x256xf32> to vector<2x32xf32>
    %395 = vector.extract_strided_slice %386 {offsets = [0, 224], sizes = [2, 32], strides = [1, 1]} : vector<2x256xf32> to vector<2x32xf32>
    %396 = arith.mulf %389, %364 : vector<2x32xf32>
    %397 = arith.mulf %388, %390 : vector<2x32xf32>
    %398 = arith.addf %396, %397 : vector<2x32xf32>
    %399 = arith.mulf %393, %367 : vector<2x32xf32>
    %400 = arith.mulf %392, %394 : vector<2x32xf32>
    %401 = arith.addf %399, %400 : vector<2x32xf32>
    %402 = tpu.concatenate %398, %401 in 1 : vector<2x32xf32>, vector<2x32xf32> -> vector<2x64xf32>
    %403 = math.tanh %402 : vector<2x64xf32>
    %404 = vector.extract_strided_slice %403 {offsets = [0, 0], sizes = [2, 32], strides = [1, 1]} : vector<2x64xf32> to vector<2x32xf32>
    %405 = arith.mulf %391, %404 : vector<2x32xf32>
    %406 = vector.extract_strided_slice %403 {offsets = [0, 32], sizes = [2, 32], strides = [1, 1]} : vector<2x64xf32> to vector<2x32xf32>
    %407 = arith.mulf %395, %406 : vector<2x32xf32>
    %c4_90 = arith.constant 4 : index
    %c0_91 = arith.constant 0 : index
    %408 = vector.load %arg20[%c4_90, %c0_91] : memref<16x64xf32, #tpu.memory_space<vmem>>, vector<2x32xf32>
    tpu.vector_store %arg20[%c4_90, %c0_91], %405 {strides = array<i32>} : memref<16x64xf32, #tpu.memory_space<vmem>>, vector<2x32xf32>,
    %c10_92 = arith.constant 10 : index
    %c32_93 = arith.constant 32 : index
    %409 = vector.load %arg20[%c10_92, %c32_93] : memref<16x64xf32, #tpu.memory_space<vmem>>, vector<2x32xf32>
    tpu.vector_store %arg20[%c10_92, %c32_93], %407 {strides = array<i32>} : memref<16x64xf32, #tpu.memory_space<vmem>>, vector<2x32xf32>,
    %410 = tpu.concatenate %405, %407 in 1 : vector<2x32xf32>, vector<2x32xf32> -> vector<2x64xf32>
    %cst_94 = arith.constant dense<0.000000e+00> : vector<2x256xf32>
    %411 = tpu.matmul %410, %303, %cst_94 {dimension_numbers = #tpu.dot_dimension_numbers<[1], [0], [0], [1], [0, 0, 1, 1], [], []>} : vector<2x64xf32>, vector<64x256xf32>, vector<2x256xf32> -> vector<2x256xf32>
    %412 = vector.extract_strided_slice %302 {offsets = [6, 0], sizes = [2, 128], strides = [1, 1]} : vector<16x256xf32> to vector<2x128xf32>
    %413 = vector.extract_strided_slice %302 {offsets = [8, 128], sizes = [2, 128], strides = [1, 1]} : vector<16x256xf32> to vector<2x128xf32>
    %414 = tpu.concatenate %412, %413 in 1 : vector<2x128xf32>, vector<2x128xf32> -> vector<2x256xf32>
    %415 = arith.addf %411, %414 : vector<2x256xf32>
    %416 = arith.negf %415 : vector<2x256xf32>
    %417 = math.exp %416 : vector<2x256xf32>
    %cst_95 = arith.constant 1.000000e+00 : f32
    %418 = vector.broadcast %cst_95 : f32 to vector<2x256xf32>
    %419 = arith.addf %418, %417 : vector<2x256xf32>
    %420 = arith.divf %418, %419 : vector<2x256xf32>
    %421 = math.tanh %415 : vector<2x256xf32>
    %422 = vector.extract_strided_slice %420 {offsets = [0, 0], sizes = [2, 32], strides = [1, 1]} : vector<2x256xf32> to vector<2x32xf32>
    %423 = vector.extract_strided_slice %420 {offsets = [0, 32], sizes = [2, 32], strides = [1, 1]} : vector<2x256xf32> to vector<2x32xf32>
    %424 = vector.extract_strided_slice %421 {offsets = [0, 64], sizes = [2, 32], strides = [1, 1]} : vector<2x256xf32> to vector<2x32xf32>
    %425 = vector.extract_strided_slice %420 {offsets = [0, 96], sizes = [2, 32], strides = [1, 1]} : vector<2x256xf32> to vector<2x32xf32>
    %426 = vector.extract_strided_slice %420 {offsets = [0, 128], sizes = [2, 32], strides = [1, 1]} : vector<2x256xf32> to vector<2x32xf32>
    %427 = vector.extract_strided_slice %420 {offsets = [0, 160], sizes = [2, 32], strides = [1, 1]} : vector<2x256xf32> to vector<2x32xf32>
    %428 = vector.extract_strided_slice %421 {offsets = [0, 192], sizes = [2, 32], strides = [1, 1]} : vector<2x256xf32> to vector<2x32xf32>
    %429 = vector.extract_strided_slice %420 {offsets = [0, 224], sizes = [2, 32], strides = [1, 1]} : vector<2x256xf32> to vector<2x32xf32>
    %430 = arith.mulf %423, %398 : vector<2x32xf32>
    %431 = arith.mulf %422, %424 : vector<2x32xf32>
    %432 = arith.addf %430, %431 : vector<2x32xf32>
    %433 = arith.mulf %427, %401 : vector<2x32xf32>
    %434 = arith.mulf %426, %428 : vector<2x32xf32>
    %435 = arith.addf %433, %434 : vector<2x32xf32>
    %436 = tpu.concatenate %432, %435 in 1 : vector<2x32xf32>, vector<2x32xf32> -> vector<2x64xf32>
    %437 = math.tanh %436 : vector<2x64xf32>
    %438 = vector.extract_strided_slice %437 {offsets = [0, 0], sizes = [2, 32], strides = [1, 1]} : vector<2x64xf32> to vector<2x32xf32>
    %439 = arith.mulf %425, %438 : vector<2x32xf32>
    %440 = vector.extract_strided_slice %437 {offsets = [0, 32], sizes = [2, 32], strides = [1, 1]} : vector<2x64xf32> to vector<2x32xf32>
    %441 = arith.mulf %429, %440 : vector<2x32xf32>
    %c6_96 = arith.constant 6 : index
    %c0_97 = arith.constant 0 : index
    %442 = vector.load %arg20[%c6_96, %c0_97] : memref<16x64xf32, #tpu.memory_space<vmem>>, vector<2x32xf32>
    tpu.vector_store %arg20[%c6_96, %c0_97], %439 {strides = array<i32>} : memref<16x64xf32, #tpu.memory_space<vmem>>, vector<2x32xf32>,
    %c8_98 = arith.constant 8 : index
    %c32_99 = arith.constant 32 : index
    %443 = vector.load %arg20[%c8_98, %c32_99] : memref<16x64xf32, #tpu.memory_space<vmem>>, vector<2x32xf32>
    tpu.vector_store %arg20[%c8_98, %c32_99], %441 {strides = array<i32>} : memref<16x64xf32, #tpu.memory_space<vmem>>, vector<2x32xf32>,
    %444 = tpu.concatenate %439, %441 in 1 : vector<2x32xf32>, vector<2x32xf32> -> vector<2x64xf32>
    %cst_100 = arith.constant dense<0.000000e+00> : vector<2x256xf32>
    %445 = tpu.matmul %444, %303, %cst_100 {dimension_numbers = #tpu.dot_dimension_numbers<[1], [0], [0], [1], [0, 0, 1, 1], [], []>} : vector<2x64xf32>, vector<64x256xf32>, vector<2x256xf32> -> vector<2x256xf32>
    %446 = vector.extract_strided_slice %302 {offsets = [8, 0], sizes = [2, 128], strides = [1, 1]} : vector<16x256xf32> to vector<2x128xf32>
    %447 = vector.extract_strided_slice %302 {offsets = [6, 128], sizes = [2, 128], strides = [1, 1]} : vector<16x256xf32> to vector<2x128xf32>
    %448 = tpu.concatenate %446, %447 in 1 : vector<2x128xf32>, vector<2x128xf32> -> vector<2x256xf32>
    %449 = arith.addf %445, %448 : vector<2x256xf32>
    %450 = arith.negf %449 : vector<2x256xf32>
    %451 = math.exp %450 : vector<2x256xf32>
    %cst_101 = arith.constant 1.000000e+00 : f32
    %452 = vector.broadcast %cst_101 : f32 to vector<2x256xf32>
    %453 = arith.addf %452, %451 : vector<2x256xf32>
    %454 = arith.divf %452, %453 : vector<2x256xf32>
    %455 = math.tanh %449 : vector<2x256xf32>
    %456 = vector.extract_strided_slice %454 {offsets = [0, 0], sizes = [2, 32], strides = [1, 1]} : vector<2x256xf32> to vector<2x32xf32>
    %457 = vector.extract_strided_slice %454 {offsets = [0, 32], sizes = [2, 32], strides = [1, 1]} : vector<2x256xf32> to vector<2x32xf32>
    %458 = vector.extract_strided_slice %455 {offsets = [0, 64], sizes = [2, 32], strides = [1, 1]} : vector<2x256xf32> to vector<2x32xf32>
    %459 = vector.extract_strided_slice %454 {offsets = [0, 96], sizes = [2, 32], strides = [1, 1]} : vector<2x256xf32> to vector<2x32xf32>
    %460 = vector.extract_strided_slice %454 {offsets = [0, 128], sizes = [2, 32], strides = [1, 1]} : vector<2x256xf32> to vector<2x32xf32>
    %461 = vector.extract_strided_slice %454 {offsets = [0, 160], sizes = [2, 32], strides = [1, 1]} : vector<2x256xf32> to vector<2x32xf32>
    %462 = vector.extract_strided_slice %455 {offsets = [0, 192], sizes = [2, 32], strides = [1, 1]} : vector<2x256xf32> to vector<2x32xf32>
    %463 = vector.extract_strided_slice %454 {offsets = [0, 224], sizes = [2, 32], strides = [1, 1]} : vector<2x256xf32> to vector<2x32xf32>
    %464 = arith.mulf %457, %432 : vector<2x32xf32>
    %465 = arith.mulf %456, %458 : vector<2x32xf32>
    %466 = arith.addf %464, %465 : vector<2x32xf32>
    %467 = arith.mulf %461, %435 : vector<2x32xf32>
    %468 = arith.mulf %460, %462 : vector<2x32xf32>
    %469 = arith.addf %467, %468 : vector<2x32xf32>
    %470 = tpu.concatenate %466, %469 in 1 : vector<2x32xf32>, vector<2x32xf32> -> vector<2x64xf32>
    %471 = math.tanh %470 : vector<2x64xf32>
    %472 = vector.extract_strided_slice %471 {offsets = [0, 0], sizes = [2, 32], strides = [1, 1]} : vector<2x64xf32> to vector<2x32xf32>
    %473 = arith.mulf %459, %472 : vector<2x32xf32>
    %474 = vector.extract_strided_slice %471 {offsets = [0, 32], sizes = [2, 32], strides = [1, 1]} : vector<2x64xf32> to vector<2x32xf32>
    %475 = arith.mulf %463, %474 : vector<2x32xf32>
    %c8_102 = arith.constant 8 : index
    %c0_103 = arith.constant 0 : index
    %476 = vector.load %arg20[%c8_102, %c0_103] : memref<16x64xf32, #tpu.memory_space<vmem>>, vector<2x32xf32>
    tpu.vector_store %arg20[%c8_102, %c0_103], %473 {strides = array<i32>} : memref<16x64xf32, #tpu.memory_space<vmem>>, vector<2x32xf32>,
    %c6_104 = arith.constant 6 : index
    %c32_105 = arith.constant 32 : index
    %477 = vector.load %arg20[%c6_104, %c32_105] : memref<16x64xf32, #tpu.memory_space<vmem>>, vector<2x32xf32>
    tpu.vector_store %arg20[%c6_104, %c32_105], %475 {strides = array<i32>} : memref<16x64xf32, #tpu.memory_space<vmem>>, vector<2x32xf32>,
    %478 = tpu.concatenate %473, %475 in 1 : vector<2x32xf32>, vector<2x32xf32> -> vector<2x64xf32>
    %cst_106 = arith.constant dense<0.000000e+00> : vector<2x256xf32>
    %479 = tpu.matmul %478, %303, %cst_106 {dimension_numbers = #tpu.dot_dimension_numbers<[1], [0], [0], [1], [0, 0, 1, 1], [], []>} : vector<2x64xf32>, vector<64x256xf32>, vector<2x256xf32> -> vector<2x256xf32>
    %480 = vector.extract_strided_slice %302 {offsets = [10, 0], sizes = [2, 128], strides = [1, 1]} : vector<16x256xf32> to vector<2x128xf32>
    %481 = vector.extract_strided_slice %302 {offsets = [4, 128], sizes = [2, 128], strides = [1, 1]} : vector<16x256xf32> to vector<2x128xf32>
    %482 = tpu.concatenate %480, %481 in 1 : vector<2x128xf32>, vector<2x128xf32> -> vector<2x256xf32>
    %483 = arith.addf %479, %482 : vector<2x256xf32>
    %484 = arith.negf %483 : vector<2x256xf32>
    %485 = math.exp %484 : vector<2x256xf32>
    %cst_107 = arith.constant 1.000000e+00 : f32
    %486 = vector.broadcast %cst_107 : f32 to vector<2x256xf32>
    %487 = arith.addf %486, %485 : vector<2x256xf32>
    %488 = arith.divf %486, %487 : vector<2x256xf32>
    %489 = math.tanh %483 : vector<2x256xf32>
    %490 = vector.extract_strided_slice %488 {offsets = [0, 0], sizes = [2, 32], strides = [1, 1]} : vector<2x256xf32> to vector<2x32xf32>
    %491 = vector.extract_strided_slice %488 {offsets = [0, 32], sizes = [2, 32], strides = [1, 1]} : vector<2x256xf32> to vector<2x32xf32>
    %492 = vector.extract_strided_slice %489 {offsets = [0, 64], sizes = [2, 32], strides = [1, 1]} : vector<2x256xf32> to vector<2x32xf32>
    %493 = vector.extract_strided_slice %488 {offsets = [0, 96], sizes = [2, 32], strides = [1, 1]} : vector<2x256xf32> to vector<2x32xf32>
    %494 = vector.extract_strided_slice %488 {offsets = [0, 128], sizes = [2, 32], strides = [1, 1]} : vector<2x256xf32> to vector<2x32xf32>
    %495 = vector.extract_strided_slice %488 {offsets = [0, 160], sizes = [2, 32], strides = [1, 1]} : vector<2x256xf32> to vector<2x32xf32>
    %496 = vector.extract_strided_slice %489 {offsets = [0, 192], sizes = [2, 32], strides = [1, 1]} : vector<2x256xf32> to vector<2x32xf32>
    %497 = vector.extract_strided_slice %488 {offsets = [0, 224], sizes = [2, 32], strides = [1, 1]} : vector<2x256xf32> to vector<2x32xf32>
    %498 = arith.mulf %491, %466 : vector<2x32xf32>
    %499 = arith.mulf %490, %492 : vector<2x32xf32>
    %500 = arith.addf %498, %499 : vector<2x32xf32>
    %501 = arith.mulf %495, %469 : vector<2x32xf32>
    %502 = arith.mulf %494, %496 : vector<2x32xf32>
    %503 = arith.addf %501, %502 : vector<2x32xf32>
    %504 = tpu.concatenate %500, %503 in 1 : vector<2x32xf32>, vector<2x32xf32> -> vector<2x64xf32>
    %505 = math.tanh %504 : vector<2x64xf32>
    %506 = vector.extract_strided_slice %505 {offsets = [0, 0], sizes = [2, 32], strides = [1, 1]} : vector<2x64xf32> to vector<2x32xf32>
    %507 = arith.mulf %493, %506 : vector<2x32xf32>
    %508 = vector.extract_strided_slice %505 {offsets = [0, 32], sizes = [2, 32], strides = [1, 1]} : vector<2x64xf32> to vector<2x32xf32>
    %509 = arith.mulf %497, %508 : vector<2x32xf32>
    %c10_108 = arith.constant 10 : index
    %c0_109 = arith.constant 0 : index
    %510 = vector.load %arg20[%c10_108, %c0_109] : memref<16x64xf32, #tpu.memory_space<vmem>>, vector<2x32xf32>
    tpu.vector_store %arg20[%c10_108, %c0_109], %507 {strides = array<i32>} : memref<16x64xf32, #tpu.memory_space<vmem>>, vector<2x32xf32>,
    %c4_110 = arith.constant 4 : index
    %c32_111 = arith.constant 32 : index
    %511 = vector.load %arg20[%c4_110, %c32_111] : memref<16x64xf32, #tpu.memory_space<vmem>>, vector<2x32xf32>
    tpu.vector_store %arg20[%c4_110, %c32_111], %509 {strides = array<i32>} : memref<16x64xf32, #tpu.memory_space<vmem>>, vector<2x32xf32>,
    %512 = tpu.concatenate %507, %509 in 1 : vector<2x32xf32>, vector<2x32xf32> -> vector<2x64xf32>
    %cst_112 = arith.constant dense<0.000000e+00> : vector<2x256xf32>
    %513 = tpu.matmul %512, %303, %cst_112 {dimension_numbers = #tpu.dot_dimension_numbers<[1], [0], [0], [1], [0, 0, 1, 1], [], []>} : vector<2x64xf32>, vector<64x256xf32>, vector<2x256xf32> -> vector<2x256xf32>
    %514 = vector.extract_strided_slice %302 {offsets = [12, 0], sizes = [2, 128], strides = [1, 1]} : vector<16x256xf32> to vector<2x128xf32>
    %515 = vector.extract_strided_slice %302 {offsets = [2, 128], sizes = [2, 128], strides = [1, 1]} : vector<16x256xf32> to vector<2x128xf32>
    %516 = tpu.concatenate %514, %515 in 1 : vector<2x128xf32>, vector<2x128xf32> -> vector<2x256xf32>
    %517 = arith.addf %513, %516 : vector<2x256xf32>
    %518 = arith.negf %517 : vector<2x256xf32>
    %519 = math.exp %518 : vector<2x256xf32>
    %cst_113 = arith.constant 1.000000e+00 : f32
    %520 = vector.broadcast %cst_113 : f32 to vector<2x256xf32>
    %521 = arith.addf %520, %519 : vector<2x256xf32>
    %522 = arith.divf %520, %521 : vector<2x256xf32>
    %523 = math.tanh %517 : vector<2x256xf32>
    %524 = vector.extract_strided_slice %522 {offsets = [0, 0], sizes = [2, 32], strides = [1, 1]} : vector<2x256xf32> to vector<2x32xf32>
    %525 = vector.extract_strided_slice %522 {offsets = [0, 32], sizes = [2, 32], strides = [1, 1]} : vector<2x256xf32> to vector<2x32xf32>
    %526 = vector.extract_strided_slice %523 {offsets = [0, 64], sizes = [2, 32], strides = [1, 1]} : vector<2x256xf32> to vector<2x32xf32>
    %527 = vector.extract_strided_slice %522 {offsets = [0, 96], sizes = [2, 32], strides = [1, 1]} : vector<2x256xf32> to vector<2x32xf32>
    %528 = vector.extract_strided_slice %522 {offsets = [0, 128], sizes = [2, 32], strides = [1, 1]} : vector<2x256xf32> to vector<2x32xf32>
    %529 = vector.extract_strided_slice %522 {offsets = [0, 160], sizes = [2, 32], strides = [1, 1]} : vector<2x256xf32> to vector<2x32xf32>
    %530 = vector.extract_strided_slice %523 {offsets = [0, 192], sizes = [2, 32], strides = [1, 1]} : vector<2x256xf32> to vector<2x32xf32>
    %531 = vector.extract_strided_slice %522 {offsets = [0, 224], sizes = [2, 32], strides = [1, 1]} : vector<2x256xf32> to vector<2x32xf32>
    %532 = arith.mulf %525, %500 : vector<2x32xf32>
    %533 = arith.mulf %524, %526 : vector<2x32xf32>
    %534 = arith.addf %532, %533 : vector<2x32xf32>
    %535 = arith.mulf %529, %503 : vector<2x32xf32>
    %536 = arith.mulf %528, %530 : vector<2x32xf32>
    %537 = arith.addf %535, %536 : vector<2x32xf32>
    %538 = tpu.concatenate %534, %537 in 1 : vector<2x32xf32>, vector<2x32xf32> -> vector<2x64xf32>
    %539 = math.tanh %538 : vector<2x64xf32>
    %540 = vector.extract_strided_slice %539 {offsets = [0, 0], sizes = [2, 32], strides = [1, 1]} : vector<2x64xf32> to vector<2x32xf32>
    %541 = arith.mulf %527, %540 : vector<2x32xf32>
    %542 = vector.extract_strided_slice %539 {offsets = [0, 32], sizes = [2, 32], strides = [1, 1]} : vector<2x64xf32> to vector<2x32xf32>
    %543 = arith.mulf %531, %542 : vector<2x32xf32>
    %c12_114 = arith.constant 12 : index
    %c0_115 = arith.constant 0 : index
    %544 = vector.load %arg20[%c12_114, %c0_115] : memref<16x64xf32, #tpu.memory_space<vmem>>, vector<2x32xf32>
    tpu.vector_store %arg20[%c12_114, %c0_115], %541 {strides = array<i32>} : memref<16x64xf32, #tpu.memory_space<vmem>>, vector<2x32xf32>,
    %c2_116 = arith.constant 2 : index
    %c32_117 = arith.constant 32 : index
    %545 = vector.load %arg20[%c2_116, %c32_117] : memref<16x64xf32, #tpu.memory_space<vmem>>, vector<2x32xf32>
    tpu.vector_store %arg20[%c2_116, %c32_117], %543 {strides = array<i32>} : memref<16x64xf32, #tpu.memory_space<vmem>>, vector<2x32xf32>,
    %546 = tpu.concatenate %541, %543 in 1 : vector<2x32xf32>, vector<2x32xf32> -> vector<2x64xf32>
    %cst_118 = arith.constant dense<0.000000e+00> : vector<2x256xf32>
    %547 = tpu.matmul %546, %303, %cst_118 {dimension_numbers = #tpu.dot_dimension_numbers<[1], [0], [0], [1], [0, 0, 1, 1], [], []>} : vector<2x64xf32>, vector<64x256xf32>, vector<2x256xf32> -> vector<2x256xf32>
    %548 = vector.extract_strided_slice %302 {offsets = [14, 0], sizes = [2, 128], strides = [1, 1]} : vector<16x256xf32> to vector<2x128xf32>
    %549 = vector.extract_strided_slice %302 {offsets = [0, 128], sizes = [2, 128], strides = [1, 1]} : vector<16x256xf32> to vector<2x128xf32>
    %550 = tpu.concatenate %548, %549 in 1 : vector<2x128xf32>, vector<2x128xf32> -> vector<2x256xf32>
    %551 = arith.addf %547, %550 : vector<2x256xf32>
    %552 = arith.negf %551 : vector<2x256xf32>
    %553 = math.exp %552 : vector<2x256xf32>
    %cst_119 = arith.constant 1.000000e+00 : f32
    %554 = vector.broadcast %cst_119 : f32 to vector<2x256xf32>
    %555 = arith.addf %554, %553 : vector<2x256xf32>
    %556 = arith.divf %554, %555 : vector<2x256xf32>
    %557 = math.tanh %551 : vector<2x256xf32>
    %558 = vector.extract_strided_slice %556 {offsets = [0, 0], sizes = [2, 32], strides = [1, 1]} : vector<2x256xf32> to vector<2x32xf32>
    %559 = vector.extract_strided_slice %556 {offsets = [0, 32], sizes = [2, 32], strides = [1, 1]} : vector<2x256xf32> to vector<2x32xf32>
    %560 = vector.extract_strided_slice %557 {offsets = [0, 64], sizes = [2, 32], strides = [1, 1]} : vector<2x256xf32> to vector<2x32xf32>
    %561 = vector.extract_strided_slice %556 {offsets = [0, 96], sizes = [2, 32], strides = [1, 1]} : vector<2x256xf32> to vector<2x32xf32>
    %562 = vector.extract_strided_slice %556 {offsets = [0, 128], sizes = [2, 32], strides = [1, 1]} : vector<2x256xf32> to vector<2x32xf32>
    %563 = vector.extract_strided_slice %556 {offsets = [0, 160], sizes = [2, 32], strides = [1, 1]} : vector<2x256xf32> to vector<2x32xf32>
    %564 = vector.extract_strided_slice %557 {offsets = [0, 192], sizes = [2, 32], strides = [1, 1]} : vector<2x256xf32> to vector<2x32xf32>
    %565 = vector.extract_strided_slice %556 {offsets = [0, 224], sizes = [2, 32], strides = [1, 1]} : vector<2x256xf32> to vector<2x32xf32>
    %566 = arith.mulf %559, %534 : vector<2x32xf32>
    %567 = arith.mulf %558, %560 : vector<2x32xf32>
    %568 = arith.addf %566, %567 : vector<2x32xf32>
    %569 = arith.mulf %563, %537 : vector<2x32xf32>
    %570 = arith.mulf %562, %564 : vector<2x32xf32>
    %571 = arith.addf %569, %570 : vector<2x32xf32>
    %572 = tpu.concatenate %568, %571 in 1 : vector<2x32xf32>, vector<2x32xf32> -> vector<2x64xf32>
    %573 = math.tanh %572 : vector<2x64xf32>
    %574 = vector.extract_strided_slice %573 {offsets = [0, 0], sizes = [2, 32], strides = [1, 1]} : vector<2x64xf32> to vector<2x32xf32>
    %575 = arith.mulf %561, %574 : vector<2x32xf32>
    %576 = vector.extract_strided_slice %573 {offsets = [0, 32], sizes = [2, 32], strides = [1, 1]} : vector<2x64xf32> to vector<2x32xf32>
    %577 = arith.mulf %565, %576 : vector<2x32xf32>
    %c14_120 = arith.constant 14 : index
    %c0_121 = arith.constant 0 : index
    %578 = vector.load %arg20[%c14_120, %c0_121] : memref<16x64xf32, #tpu.memory_space<vmem>>, vector<2x32xf32>
    tpu.vector_store %arg20[%c14_120, %c0_121], %575 {strides = array<i32>} : memref<16x64xf32, #tpu.memory_space<vmem>>, vector<2x32xf32>,
    %c0_122 = arith.constant 0 : index
    %c32_123 = arith.constant 32 : index
    %579 = vector.load %arg20[%c0_122, %c32_123] : memref<16x64xf32, #tpu.memory_space<vmem>>, vector<2x32xf32>
    tpu.vector_store %arg20[%c0_122, %c32_123], %577 {strides = array<i32>} : memref<16x64xf32, #tpu.memory_space<vmem>>, vector<2x32xf32>,
    %c0_124 = arith.constant 0 : index
    %c0_125 = arith.constant 0 : index
    %580 = vector.load %arg20[%c0_124, %c0_125] : memref<16x64xf32, #tpu.memory_space<vmem>>, vector<16x64xf32>
    %c0_126 = arith.constant 0 : index
    %c0_127 = arith.constant 0 : index
    %581 = vector.load %arg11[%c0_126, %c0_127] : memref<64x32xf32, #tpu.memory_space<vmem>>, vector<64x32xf32>
    %cst_128 = arith.constant dense<0.000000e+00> : vector<16x32xf32>
    %582 = tpu.matmul %580, %581, %cst_128 {dimension_numbers = #tpu.dot_dimension_numbers<[1], [0], [0], [1], [0, 0, 1, 1], [], []>} : vector<16x64xf32>, vector<64x32xf32>, vector<16x32xf32> -> vector<16x32xf32>
    %c0_129 = arith.constant 0 : index
    %c0_130 = arith.constant 0 : index
    %583 = vector.load %arg12[%c0_129, %c0_130] : memref<1x32xf32, #tpu.memory_space<vmem>>, vector<1x32xf32>
    %584 = vector.broadcast %583 : vector<1x32xf32> to vector<16x32xf32>
    %585 = arith.addf %582, %584 : vector<16x32xf32>
    %586 = math.tanh %585 : vector<16x32xf32>
    %c0_131 = arith.constant 0 : index
    %c0_132 = arith.constant 0 : index
    %587 = vector.load %arg13[%c0_131, %c0_132] : memref<1x32xf32, #tpu.memory_space<vmem>>, vector<1x32xf32>
    %588 = vector.broadcast %587 : vector<1x32xf32> to vector<16x32xf32>
    %589 = arith.mulf %586, %588 : vector<16x32xf32>
    %cst_133 = arith.constant dense<0.000000e+00> : vector<16xf32>
    %590 = vector.multi_reduction <add>, %589, %cst_133 [1] : vector<16x32xf32> to vector<16xf32>
    %591 = vector.shape_cast %590 : vector<16xf32> to vector<16x1xf32>
    %c0_134 = arith.constant 0 : index
    %c0_135 = arith.constant 0 : index
    %592 = vector.load %arg14[%c0_134, %c0_135] : memref<1x1xf32, #tpu.memory_space<vmem>>, vector<1x1xf32>
    %593 = vector.broadcast %592 : vector<1x1xf32> to vector<16x1xf32>
    %594 = arith.addf %591, %593 : vector<16x1xf32>
    %595 = tpu.iota {dimensions = array<i32: 0>} : vector<16x1xi32>
    %c2_i32 = arith.constant 2 : i32
    %c0_i32 = arith.constant 0 : i32
    %596 = arith.cmpi eq, %c2_i32, %c0_i32 : i32
    %c1_i32 = arith.constant 1 : i32
    %597 = arith.select %596, %c1_i32, %c2_i32 : i32
    %598 = vector.broadcast %597 : i32 to vector<16x1xi32>
    %599 = arith.remsi %595, %598 : vector<16x1xi32>
    %c0_i32_136 = arith.constant 0 : i32
    %600 = vector.broadcast %c0_i32_136 : i32 to vector<16x1xi32>
    %601 = arith.cmpi ne, %599, %600 : vector<16x1xi32>
    %c0_i32_137 = arith.constant 0 : i32
    %602 = vector.broadcast %c0_i32_137 : i32 to vector<16x1xi32>
    %603 = arith.cmpi slt, %599, %602 : vector<16x1xi32>
    %c0_i32_138 = arith.constant 0 : i32
    %604 = arith.cmpi slt, %597, %c0_i32_138 : i32
    %605 = vector.broadcast %604 : i1 to vector<16x1xi1>
    %606 = vector.broadcast %605 : vector<16x1xi1> to vector<16x1xi1>
    %607 = arith.xori %603, %606 : vector<16x1xi1>
    %608 = arith.andi %607, %601 : vector<16x1xi1>
    %609 = vector.broadcast %597 : i32 to vector<16x1xi32>
    %610 = arith.addi %599, %609 : vector<16x1xi32>
    %611 = arith.select %608, %610, %599 : vector<16x1xi1>, vector<16x1xi32>
    %c0_i32_139 = arith.constant 0 : i32
    %612 = vector.broadcast %c0_i32_139 : i32 to vector<16x1xi32>
    %613 = arith.cmpi eq, %611, %612 : vector<16x1xi32>
    %cst_140 = arith.constant 0xFF800000 : f32
    %614 = vector.broadcast %cst_140 : f32 to vector<16x1xf32>
    %615 = arith.select %613, %594, %614 : vector<16x1xi1>, vector<16x1xf32>
    %cst_141 = arith.constant dense<0xFF800000> : vector<1xf32>
    %616 = vector.multi_reduction <maximumf>, %615, %cst_141 [0] : vector<16x1xf32> to vector<1xf32>
    %617 = vector.shape_cast %616 : vector<1xf32> to vector<1x1xf32>
    %618 = vector.broadcast %617 : vector<1x1xf32> to vector<16x1xf32>
    %619 = arith.subf %594, %618 : vector<16x1xf32>
    %cst_142 = arith.constant 0xFF800000 : f32
    %620 = vector.broadcast %cst_142 : f32 to vector<16x1xf32>
    %621 = arith.select %613, %619, %620 : vector<16x1xi1>, vector<16x1xf32>
    %622 = math.exp %621 : vector<16x1xf32>
    %cst_143 = arith.constant dense<0.000000e+00> : vector<1xf32>
    %623 = vector.multi_reduction <add>, %622, %cst_143 [0] : vector<16x1xf32> to vector<1xf32>
    %624 = vector.shape_cast %623 : vector<1xf32> to vector<1x1xf32>
    %625 = vector.broadcast %624 : vector<1x1xf32> to vector<16x1xf32>
    %626 = arith.divf %622, %625 : vector<16x1xf32>
    %627 = vector.broadcast %626 : vector<16x1xf32> to vector<16x64xf32>
    %628 = arith.mulf %580, %627 : vector<16x64xf32>
    %cst_144 = arith.constant dense<0.000000e+00> : vector<64xf32>
    %629 = vector.multi_reduction <add>, %628, %cst_144 [0] : vector<16x64xf32> to vector<64xf32>
    %630 = vector.shape_cast %629 : vector<64xf32> to vector<1x64xf32>
    %c2_i32_145 = arith.constant 2 : i32
    %c0_i32_146 = arith.constant 0 : i32
    %631 = arith.cmpi eq, %c2_i32_145, %c0_i32_146 : i32
    %c1_i32_147 = arith.constant 1 : i32
    %632 = arith.select %631, %c1_i32_147, %c2_i32_145 : i32
    %633 = vector.broadcast %632 : i32 to vector<16x1xi32>
    %634 = arith.remsi %595, %633 : vector<16x1xi32>
    %c0_i32_148 = arith.constant 0 : i32
    %635 = vector.broadcast %c0_i32_148 : i32 to vector<16x1xi32>
    %636 = arith.cmpi ne, %634, %635 : vector<16x1xi32>
    %c0_i32_149 = arith.constant 0 : i32
    %637 = vector.broadcast %c0_i32_149 : i32 to vector<16x1xi32>
    %638 = arith.cmpi slt, %634, %637 : vector<16x1xi32>
    %c0_i32_150 = arith.constant 0 : i32
    %639 = arith.cmpi slt, %632, %c0_i32_150 : i32
    %640 = vector.broadcast %639 : i1 to vector<16x1xi1>
    %641 = vector.broadcast %640 : vector<16x1xi1> to vector<16x1xi1>
    %642 = arith.xori %638, %641 : vector<16x1xi1>
    %643 = arith.andi %642, %636 : vector<16x1xi1>
    %644 = vector.broadcast %632 : i32 to vector<16x1xi32>
    %645 = arith.addi %634, %644 : vector<16x1xi32>
    %646 = arith.select %643, %645, %634 : vector<16x1xi1>, vector<16x1xi32>
    %c1_i32_151 = arith.constant 1 : i32
    %647 = vector.broadcast %c1_i32_151 : i32 to vector<16x1xi32>
    %648 = arith.cmpi eq, %646, %647 : vector<16x1xi32>
    %cst_152 = arith.constant 0xFF800000 : f32
    %649 = vector.broadcast %cst_152 : f32 to vector<16x1xf32>
    %650 = arith.select %648, %594, %649 : vector<16x1xi1>, vector<16x1xf32>
    %cst_153 = arith.constant dense<0xFF800000> : vector<1xf32>
    %651 = vector.multi_reduction <maximumf>, %650, %cst_153 [0] : vector<16x1xf32> to vector<1xf32>
    %652 = vector.shape_cast %651 : vector<1xf32> to vector<1x1xf32>
    %653 = vector.broadcast %652 : vector<1x1xf32> to vector<16x1xf32>
    %654 = arith.subf %594, %653 : vector<16x1xf32>
    %cst_154 = arith.constant 0xFF800000 : f32
    %655 = vector.broadcast %cst_154 : f32 to vector<16x1xf32>
    %656 = arith.select %648, %654, %655 : vector<16x1xi1>, vector<16x1xf32>
    %657 = math.exp %656 : vector<16x1xf32>
    %cst_155 = arith.constant dense<0.000000e+00> : vector<1xf32>
    %658 = vector.multi_reduction <add>, %657, %cst_155 [0] : vector<16x1xf32> to vector<1xf32>
    %659 = vector.shape_cast %658 : vector<1xf32> to vector<1x1xf32>
    %660 = vector.broadcast %659 : vector<1x1xf32> to vector<16x1xf32>
    %661 = arith.divf %657, %660 : vector<16x1xf32>
    %662 = vector.broadcast %661 : vector<16x1xf32> to vector<16x64xf32>
    %663 = arith.mulf %580, %662 : vector<16x64xf32>
    %cst_156 = arith.constant dense<0.000000e+00> : vector<64xf32>
    %664 = vector.multi_reduction <add>, %663, %cst_156 [0] : vector<16x64xf32> to vector<64xf32>
    %665 = vector.shape_cast %664 : vector<64xf32> to vector<1x64xf32>
    %666 = tpu.concatenate %630, %665 in 0 : vector<1x64xf32>, vector<1x64xf32> -> vector<2x64xf32>
    %c0_157 = arith.constant 0 : index
    %c0_158 = arith.constant 0 : index
    %667 = vector.load %arg15[%c0_157, %c0_158] : memref<64x64xf32, #tpu.memory_space<vmem>>, vector<64x64xf32>
    %cst_159 = arith.constant dense<0.000000e+00> : vector<2x64xf32>
    %668 = tpu.matmul %666, %667, %cst_159 {dimension_numbers = #tpu.dot_dimension_numbers<[1], [0], [0], [1], [0, 0, 1, 1], [], []>} : vector<2x64xf32>, vector<64x64xf32>, vector<2x64xf32> -> vector<2x64xf32>
    %c0_160 = arith.constant 0 : index
    %c0_161 = arith.constant 0 : index
    %669 = vector.load %arg16[%c0_160, %c0_161] : memref<1x64xf32, #tpu.memory_space<vmem>>, vector<1x64xf32>
    %670 = vector.broadcast %669 : vector<1x64xf32> to vector<2x64xf32>
    %671 = arith.addf %668, %670 : vector<2x64xf32>
    %cst_162 = arith.constant 0.000000e+00 : f32
    %672 = vector.broadcast %cst_162 : f32 to vector<2x64xf32>
    %673 = arith.maximumf %671, %672 : vector<2x64xf32>
    %c0_163 = arith.constant 0 : index
    %c0_164 = arith.constant 0 : index
    %674 = vector.load %arg17[%c0_163, %c0_164] : memref<64x6xf32, #tpu.memory_space<vmem>>, vector<64x6xf32>
    %cst_165 = arith.constant dense<0.000000e+00> : vector<2x6xf32>
    %675 = tpu.matmul %673, %674, %cst_165 {dimension_numbers = #tpu.dot_dimension_numbers<[1], [0], [0], [1], [0, 0, 1, 1], [], []>} : vector<2x64xf32>, vector<64x6xf32>, vector<2x6xf32> -> vector<2x6xf32>
    %c0_166 = arith.constant 0 : index
    %c0_167 = arith.constant 0 : index
    %676 = vector.load %arg18[%c0_166, %c0_167] : memref<1x6xf32, #tpu.memory_space<vmem>>, vector<1x6xf32>
    %677 = vector.broadcast %676 : vector<1x6xf32> to vector<2x6xf32>
    %678 = arith.addf %675, %677 : vector<2x6xf32>
    %c0_168 = arith.constant 0 : index
    %c0_169 = arith.constant 0 : index
    %679 = vector.load %arg19[%c0_168, %c0_169] : memref<2x6xf32, #tpu.memory_space<vmem>>, vector<2x6xf32>
    tpu.vector_store %arg19[%c0_168, %c0_169], %678 {strides = array<i32>} : memref<2x6xf32, #tpu.memory_space<vmem>>, vector<2x6xf32>,
    return
  }
}

</mosaic_0001>

<bundles_post_ra>
// kernel: keypoint_attention_lstm_forward.1
= control target key start
LH: loop header
LB: loop body
LE: loop exit
PB: predicated region body
PF: predicated region fallthrough
CT: control target
= control target key end

     0   :  { %s5425_s0 = inlined_call_operand.vmem [shape: f32[16,128], index: 0, kind: input, shape index: {}]   ;;  %s5426_s1 = inlined_call_operand.vmem [shape: f32[128,256], index: 1, kind: input, shape index: {}]   ;;  %s5427_s2 = inlined_call_operand.vmem [shape: f32[1,256], index: 2, kind: input, shape index: {}]   ;;  %s5428_s3 = inlined_call_operand.vmem [shape: f32[256,128], index: 3, kind: input, shape index: {}]   ;;  %s5429_s4 = inlined_call_operand.vmem [shape: f32[1,128], index: 4, kind: input, shape index: {}]   ;;  %s5430_s5 = inlined_call_operand.hbm [shape: f32[128,256], index: 5, kind: input, shape index: {}]   ;;  %s5431_s6 = inlined_call_operand.vmem [shape: f32[1,256], index: 6, kind: input, shape index: {}]   ;;  %s5432_s7 = inlined_call_operand.hbm [shape: f32[64,256], index: 7, kind: input, shape index: {}]   ;;  %s5433_s8 = inlined_call_operand.hbm [shape: f32[64,256], index: 8, kind: input, shape index: {}]   ;;  %s5434_s9 = inlined_call_operand.vmem [shape: f32[1,256], index: 9, kind: input, shape index: {}]   ;;  %s5435_s10 = inlined_call_operand.hbm [shape: f32[64,256], index: 10, kind: input, shape index: {}]   ;;  %s5436_s11 = inlined_call_operand.vmem [shape: f32[64,32], index: 11, kind: input, shape index: {}]   ;;  %s5437_s12 = inlined_call_operand.vmem [shape: f32[1,32], index: 12, kind: input, shape index: {}]   ;;  %s5438_s13 = inlined_call_operand.vmem [shape: f32[1,32], index: 13, kind: input, shape index: {}]   ;;  %s5439_s14 = inlined_call_operand.<no memory space> [shape: f32[1,1], index: 14, kind: input, shape index: {}]   ;;  %s5440_s15 = inlined_call_operand.hbm [shape: f32[64,64], index: 15, kind: input, shape index: {}]   ;;  %s5441_s16 = inlined_call_operand.vmem [shape: f32[1,64], index: 16, kind: input, shape index: {}]   ;;  %s5442_s17 = inlined_call_operand.vmem [shape: f32[64,6], index: 17, kind: input, shape index: {}]   ;;  %s5443_s18 = inlined_call_operand.vmem [shape: f32[1,6], index: 18, kind: input, shape index: {}]   ;;  %s5444_s19 = inlined_call_operand.hbm [shape: f32[2,6], index: 19, kind: output, shape index: {}]  }
   0x1   :  { %5448 = sst [smem:[#allocation18_spill]] %s5425_s0  ;;  %v24_v0 = vstv %s5439_s14 }
   0x2   :  { %5449 = sst [smem:[#allocation19_spill]] %s5426_s1  ;;  %25 = vst [vmem:[#allocation3] sm:$0x1] %v24_v0 }
   0x3   :  { %5450 = sst [smem:[#allocation20_spill]] %s5427_s2 }
   0x4   :  { %5451 = sst [smem:[#allocation21_spill]] %s5428_s3 }
   0x5   :  { %26 = vsyncpa [#allocation5], 0 }
   0x6   :  { %27 = vsyncpa [#allocation8], 0 }
   0x7   :  { %28 = vsyncpa [#allocation11], 0 }
   0x8   :  { %29 = vsyncpa [#allocation6], 0  ;;  %s4331_s20 = smov [#allocation7]   ;;  %s4332_s1 = smov [#allocation10]  }
   0x9   :  { %s59_s21 = sshll.u32 %s4331_s20, 4  ;;  %s85_s22 = sshll.u32 %s4332_s1, 4  ;;  %s60_s21 = int_to_ptr.vmem [resolvable:$true] %s59_s21  ;;  %s4451_s22 = int_to_ptr.vmem [resolvable:$true] %s85_s22 }
   0xa   :  { %s4191_s24 = scalar_lea.hbm %s5432_s7, 2048 }
   0xb   :  { %p4192_p0 = scmp.ne.s32.totalorder %s5432_s7, %s4191_s24  ;;  %p4195_p1 = scmp.lt.u32.totalorder %s4191_s24, %s5432_s7 }
   0xd   :  { %p4197_p2 = pnand %p4195_p1, %p4192_p0 }
   0xf   :  { %4200 = shalt.err (!%p4197_p2)
}
  0x10   :  { %s4201_s27 = scalar_lea.vmem %s60_s21, 2048  ;;  %p4206_p4 = scmp.lt.s32.totalorder %s60_s21, %s60_s21 }
  0x11   :  { %p4202_p3 = scmp.ne.s32.totalorder %s60_s21, %s4201_s27  ;;  %p4207_p5 = scmp.lt.s32.totalorder %s4201_s27, %s4201_s27 }
  0x13   :  { %p4208_p6 = por %p4207_p5, %p4206_p4 }
  0x15   :  { %p4209_p7 = pnand %p4208_p6, %p4202_p3 }
  0x17   :  { %4212 = shalt.err (!%p4209_p7)
}
  0x18   :  { %s4333_s28 = smov 256   ;;  %s4334_s29 = smov 16  }
  0x19   :  { %65 = dma.hbm_to_vmem [thread:$0]  %s5432_s7, 2048, %s60_s21, [#allocation8], %s4333_s28, %s4333_s28, %s4334_s29  }
  0x1a   :  { %s4213_s2 = scalar_lea.hbm %s5435_s10, 2048 }
  0x1b   :  { %p4214_p8 = scmp.ne.s32.totalorder %s5435_s10, %s4213_s2  ;;  %p4217_p9 = scmp.lt.u32.totalorder %s4213_s2, %s5435_s10 }
  0x1d   :  { %p4219_p10 = pnand %p4217_p9, %p4214_p8 }
  0x1f   :  { %4222 = shalt.err (!%p4219_p10)
}
  0x20   :  { %s4223_s14 = scalar_lea.vmem %s4451_s22, 2048  ;;  %p4228_p12 = scmp.lt.s32.totalorder %s4451_s22, %s4451_s22 }
  0x21   :  { %p4224_p11 = scmp.ne.s32.totalorder %s4451_s22, %s4223_s14  ;;  %p4229_p13 = scmp.lt.s32.totalorder %s4223_s14, %s4223_s14 }
  0x23   :  { %p4230_p0 = por %p4229_p13, %p4228_p12 }
  0x25   :  { %p4231_p1 = pnand %p4230_p0, %p4224_p11 }
  0x27   :  { %4234 = shalt.err (!%p4231_p1)
}
  0x28   :  { %91 = dma.hbm_to_vmem [thread:$0]  %s5435_s10, 2048, %s4451_s22, [#allocation11], %s4333_s28, %s4333_s28, %s4334_s29  }
  0x29   :  { %s4335_s26 = smov [#allocation4]   ;;  %s4336_s0 = smov [#allocation9]  }
  0x2a   :  { %s45_s27 = sshll.u32 %s4335_s26, 4  ;;  %s71_s30 = sshll.u32 %s4336_s0, 4  ;;  %s46_s27 = int_to_ptr.vmem [resolvable:$true] %s45_s27  ;;  %s4488_s30 = int_to_ptr.vmem [resolvable:$true] %s71_s30 }
  0x2b   :  { %s4235_s2 = scalar_lea.hbm %s5430_s5, 4096 }
  0x2c   :  { %p4236_p2 = scmp.ne.s32.totalorder %s5430_s5, %s4235_s2  ;;  %p4239_p3 = scmp.lt.u32.totalorder %s4235_s2, %s5430_s5 }
  0x2e   :  { %p4241_p4 = pnand %p4239_p3, %p4236_p2 }
  0x30   :  { %4244 = shalt.err (!%p4241_p4)
}
  0x31   :  { %s4245_s10 = scalar_lea.vmem %s46_s27, 4096  ;;  %p4250_p6 = scmp.lt.s32.totalorder %s46_s27, %s46_s27 }
  0x32   :  { %p4246_p5 = scmp.ne.s32.totalorder %s46_s27, %s4245_s10  ;;  %p4251_p7 = scmp.lt.s32.totalorder %s4245_s10, %s4245_s10 }
  0x34   :  { %p4252_p8 = por %p4251_p7, %p4250_p6 }
  0x36   :  { %p4253_p9 = pnand %p4252_p8, %p4246_p5 }
  0x38   :  { %4256 = shalt.err (!%p4253_p9)
}
  0x39   :  { %51 = dma.hbm_to_vmem [thread:$0]  %s5430_s5, 4096, %s46_s27, [#allocation5], %s4333_s28, %s4333_s28, %s4334_s29  }
  0x3a   :  { %s4257_s26 = scalar_lea.hbm %s5433_s8, 2048 }
  0x3b   :  { %p4258_p10 = scmp.ne.s32.totalorder %s5433_s8, %s4257_s26  ;;  %p4261_p11 = scmp.lt.u32.totalorder %s4257_s26, %s5433_s8 }
  0x3d   :  { %p4263_p12 = pnand %p4261_p11, %p4258_p10 }
  0x3f   :  { %4266 = shalt.err (!%p4263_p12)
}
  0x40   :  { %s4267_s23 = scalar_lea.vmem %s4488_s30, 2048  ;;  %p4272_p0 = scmp.lt.s32.totalorder %s4488_s30, %s4488_s30 }
  0x41   :  { %p4268_p13 = scmp.ne.s32.totalorder %s4488_s30, %s4267_s23  ;;  %p4273_p1 = scmp.lt.s32.totalorder %s4267_s23, %s4267_s23 }
  0x43   :  { %p4274_p2 = por %p4273_p1, %p4272_p0 }
  0x45   :  { %p4275_p3 = pnand %p4274_p2, %p4268_p13 }
  0x47   :  { %4278 = shalt.err (!%p4275_p3)
}
  0x48   :  { %77 = dma.hbm_to_vmem [thread:$0]  %s5433_s8, 2048, %s4488_s30, [#allocation8], %s4333_s28, %s4333_s28, %s4334_s29  }
  0x49   :  { %s4337_s24 = smov [#allocation12]   ;;  %s4279_s22 = scalar_lea.hbm %s5440_s15, 1024 }
  0x4a   :  { %s105_s25 = sshll.u32 %s4337_s24, 4  ;;  %p4280_p4 = scmp.ne.s32.totalorder %s5440_s15, %s4279_s22  ;;  %s106_s25 = int_to_ptr.vmem [resolvable:$true] %s105_s25 }
  0x4b   :  { %p4283_p5 = scmp.lt.u32.totalorder %s4279_s22, %s5440_s15 }
  0x4d   :  { %p4285_p6 = pnand %p4283_p5, %p4280_p4 }
  0x4f   :  { %4288 = shalt.err (!%p4285_p6)
}
  0x50   :  { %s4289_s0 = scalar_lea.vmem %s106_s25, 1024  ;;  %p4294_p8 = scmp.lt.s32.totalorder %s106_s25, %s106_s25 }
  0x51   :  { %p4290_p7 = scmp.ne.s32.totalorder %s106_s25, %s4289_s0  ;;  %p4295_p9 = scmp.lt.s32.totalorder %s4289_s0, %s4289_s0 }
  0x53   :  { %p4296_p10 = por %p4295_p9, %p4294_p8 }
  0x55   :  { %p4297_p11 = pnand %p4296_p10, %p4290_p7 }
  0x57   :  { %4300 = shalt.err (!%p4297_p11)
}
  0x58   :  { %s4338_s8 = smov 128   ;;  %s4339_s28 = smov 8  }
  0x59   :  { %111 = dma.hbm_to_vmem [thread:$0]  %s5440_s15, 1024, %s106_s25, [#allocation11], %s4338_s8, %s4338_s8, %s4339_s28  }
  0x5a   :  { %4323 = dma.done.wait [#allocation5], 4096  }
  0x5b   :  { %4324 = vsyncadd [#allocation5], 4294963200 }
  0x5c   :  { %4325 = dma.done.wait [#allocation8], 4096  }
  0x5d   :  { %4326 = vsyncadd [#allocation8], 4294963200 }
  0x5e   :  { %4327 = dma.done.wait [#allocation11], 3072  }
  0x5f   :  { %4328 = vsyncadd [#allocation11], 4294964224  ;;  %v4340_v1 = vmov 0.0   ;;  %s5452_s2 = sld [smem:[#allocation19_spill]]  ;;  %s5453_s23 = sld [smem:[#allocation21_spill]]  ;;  %vm631_vm0 = vcmask 261120  }
  0x60   :  { %243 = vmatprep.mubr.f32.mxu0 %v4340_v1  ;;  %s5454_s1 = sld [smem:[#allocation18_spill]]  ;;  %s5455_s28 = sld [smem:[#allocation20_spill]]  ;;  %vm653_vm1 = vcmask 517376   ;;  %vm647_vm2 = vcmask 254976   ;;  %vm516_vm3 = vcmask 523264   ;;  %vm3040_vm6 = vcmask 7168  }
  0x61   :  { %s4343_s5 = smov 96   ;;  %vm4346_vm9 = vmmov 0   ;;  %vm3145_vm10 = vcmask 1040384   ;;  %s4347_s8 = smov [#allocation13]   ;;  %vm3324_vm11 = vcmask 41984  }
  0x65   :  { %v136_v2 = vld [vmem:[%s5452_s2 + $0x8] sm:$0xff]  ;;  %v138_v3 = vld [vmem:[%s5452_s2 + $0x18] sm:$0xff]  ;;  %v135_v4 = vld [vmem:[%s5452_s2] sm:$0xff] }
  0x66   :  { %v3524_v5 = vpack.c.bf16 %v138_v3, %v136_v2  ;;  %v137_v6 = vld [vmem:[%s5452_s2 + $0x10] sm:$0xff]  ;;  %v140_v7 = vld [vmem:[%s5452_s2 + $0x28] sm:$0xff]  ;;  %v142_v8 = vld [vmem:[%s5452_s2 + $0x38] sm:$0xff] }
  0x67   :  { %v3526_v9 = vpack.c.bf16 %v137_v6, %v135_v4  ;;  %v3528_v10 = vpack.c.bf16 %v142_v8, %v140_v7  ;;  %v139_v11 = vld [vmem:[%s5452_s2 + $0x20] sm:$0xff]  ;;  %v141_v12 = vld [vmem:[%s5452_s2 + $0x30] sm:$0xff]  ;;  %v144_v13 = vld [vmem:[%s5452_s2 + $0x48] sm:$0xff] }
  0x68   :  { %3525 = vmatprep.subr.bf16.mxu0 %v3524_v5  ;;  %v146_v14 = vld [vmem:[%s5452_s2 + $0x58] sm:$0xff]  ;;  %v3530_v15 = vpack.c.bf16 %v141_v12, %v139_v11  ;;  %v143_v17 = vld [vmem:[%s5452_s2 + $0x40] sm:$0xff]  ;;  %v145_v18 = vld [vmem:[%s5452_s2 + $0x50] sm:$0xff] }
  0x69   :  { %3527 = vmatpush1.bf16.msra.mxu0 %v3526_v9  ;;  %v3532_v16 = vpack.c.bf16 %v146_v14, %v144_v13  ;;  %v148_v19 = vld [vmem:[%s5452_s2 + $0x68] sm:$0xff]  ;;  %v150_v20 = vld [vmem:[%s5452_s2 + $0x78] sm:$0xff]  ;;  %v3534_v21 = vpack.c.bf16 %v145_v18, %v143_v17  ;;  %v147_v23 = vld [vmem:[%s5452_s2 + $0x60] sm:$0xff] }
  0x6a   :  { %3529 = vmatprep.subr.bf16.mxu0 %v3528_v10  ;;  %v3536_v22 = vpack.c.bf16 %v150_v20, %v148_v19  ;;  %v149_v24 = vld [vmem:[%s5452_s2 + $0x70] sm:$0xff]  ;;  %v152_v25 = vld [vmem:[%s5452_s2 + $0x88] sm:$0xff]  ;;  %v154_v26 = vld [vmem:[%s5452_s2 + $0x98] sm:$0xff] }
  0x6b   :  { %v151_v27 = vld [vmem:[%s5452_s2 + $0x80] sm:$0xff]  ;;  %v153_v28 = vld [vmem:[%s5452_s2 + $0x90] sm:$0xff]  ;;  %v277_v30 = vld [vmem:[%s5453_s23 + $0x88] sm:$0xff]  ;;  %v3538_v31 = vpack.c.bf16 %v149_v24, %v147_v23  ;;  %v3540_v37 = vpack.c.bf16 %v154_v26, %v152_v25 }
  0x6c   :  { %v276_v29 = vld [vmem:[%s5453_s23 + $0x80] sm:$0xff]  ;;  %v156_v32 = vld [vmem:[%s5452_s2 + $0xa8] sm:$0xff]  ;;  %v278_v36 = vld [vmem:[%s5453_s23 + $0x90] sm:$0xff]  ;;  %v3542_v47 = vpack.c.bf16 %v153_v28, %v151_v27 }
  0x6d   :  { %3531 = vmatpush1.bf16.msra.mxu0 %v3530_v15  ;;  %v3556_v33 = vpack.c.bf16 %v277_v30, %v276_v29  ;;  %v260_v34 = vld [vmem:[%s5453_s23] sm:$0xff]  ;;  %v261_v35 = vld [vmem:[%s5453_s23 + $0x8] sm:$0xff]  ;;  %v279_v39 = vld [vmem:[%s5453_s23 + $0x98] sm:$0xff] }
  0x6e   :  { %3533 = vmatprep.subr.bf16.mxu0 %v3532_v16  ;;  %v3558_v38 = vpack.c.bf16 %v261_v35, %v260_v34  ;;  %v262_v40 = vld [vmem:[%s5453_s23 + $0x10] sm:$0xff]  ;;  %v263_v41 = vld [vmem:[%s5453_s23 + $0x18] sm:$0xff]  ;;  %v3560_v43 = vpack.c.bf16 %v279_v39, %v278_v36  ;;  %v280_v44 = vld [vmem:[%s5453_s23 + $0xa0] sm:$0xff] }
  0x6f   :  { %v158_v42 = vld [vmem:[%s5452_s2 + $0xb8] sm:$0xff]  ;;  %3557 = vmatprep.subr.bf16.mxu1 %v3556_v33  ;;  %v281_v45 = vld [vmem:[%s5453_s23 + $0xa8] sm:$0xff]  ;;  %v3562_v46 = vpack.c.bf16 %v263_v41, %v262_v40  ;;  %v155_v48 = vld [vmem:[%s5452_s2 + $0xa0] sm:$0xff] }
  0x70   :  { %3559 = vmatpush3.bf16.msra.mxu1 %v3558_v38  ;;  %v3564_v49 = vpack.c.bf16 %v281_v45, %v280_v44  ;;  %v264_v50 = vld [vmem:[%s5453_s23 + $0x20] sm:$0xff]  ;;  %v265_v51 = vld [vmem:[%s5453_s23 + $0x28] sm:$0xff]  ;;  %v3544_v52 = vpack.c.bf16 %v158_v42, %v156_v32  ;;  %v157_v53 = vld [vmem:[%s5452_s2 + $0xb0] sm:$0xff] }
  0x71   :  { %3535 = vmatpush1.bf16.msra.mxu0 %v3534_v21  ;;  %3561 = vmatprep.subr.bf16.mxu1 %v3560_v43  ;;  %v282_v54 = vld [vmem:[%s5453_s23 + $0xb0] sm:$0xff]  ;;  %v283_v55 = vld [vmem:[%s5453_s23 + $0xb8] sm:$0xff]  ;;  %v160_v56 = vld [vmem:[%s5452_s2 + $0xc8] sm:$0xff]  ;;  %v3566_v58 = vpack.c.bf16 %v265_v51, %v264_v50  ;;  %v3546_v59 = vpack.c.bf16 %v157_v53, %v155_v48 }
  0x72   :  { %3537 = vmatprep.subr.bf16.mxu0 %v3536_v22  ;;  %v162_v57 = vld [vmem:[%s5452_s2 + $0xd8] sm:$0xff]  ;;  %v159_v60 = vld [vmem:[%s5452_s2 + $0xc0] sm:$0xff]  ;;  %v3568_v61 = vpack.c.bf16 %v283_v55, %v282_v54  ;;  %v266_v62 = vld [vmem:[%s5453_s23 + $0x30] sm:$0xff] }
  0x73   :  { %v267_v63 = vld [vmem:[%s5453_s23 + $0x38] sm:$0xff]  ;;  %v3548_v0 = vpack.c.bf16 %v162_v57, %v160_v56  ;;  %v161_v2 = vld [vmem:[%s5452_s2 + $0xd0] sm:$0xff]  ;;  %v284_v3 = vld [vmem:[%s5453_s23 + $0xc0] sm:$0xff] }
  0x74   :  { %3563 = vmatpush3.bf16.msra.mxu1 %v3562_v46  ;;  %v285_v4 = vld [vmem:[%s5453_s23 + $0xc8] sm:$0xff]  ;;  %v166_v6 = vld [vmem:[%s5452_s2 + $0xf8] sm:$0xff]  ;;  %v3570_v7 = vpack.c.bf16 %v267_v63, %v266_v62  ;;  %v3550_v8 = vpack.c.bf16 %v161_v2, %v159_v60  ;;  %v163_v9 = vld [vmem:[%s5452_s2 + $0xe0] sm:$0xff] }
  0x75   :  { %3539 = vmatpush1.bf16.msra.mxu0 %v3538_v31  ;;  %3565 = vmatprep.subr.bf16.mxu1 %v3564_v49  ;;  %v164_v5 = vld [vmem:[%s5452_s2 + $0xe8] sm:$0xff]  ;;  %v3572_v10 = vpack.c.bf16 %v285_v4, %v284_v3  ;;  %v268_v11 = vld [vmem:[%s5453_s23 + $0x40] sm:$0xff]  ;;  %v165_v14 = vld [vmem:[%s5452_s2 + $0xf0] sm:$0xff] }
  0x76   :  { %3541 = vmatprep.subr.bf16.mxu0 %v3540_v37  ;;  %v269_v12 = vld [vmem:[%s5453_s23 + $0x48] sm:$0xff]  ;;  %v3552_v13 = vpack.c.bf16 %v166_v6, %v164_v5  ;;  %v286_v15 = vld [vmem:[%s5453_s23 + $0xd0] sm:$0xff]  ;;  %v287_v16 = vld [vmem:[%s5453_s23 + $0xd8] sm:$0xff]  ;;  %v3554_v18 = vpack.c.bf16 %v165_v14, %v163_v9 }
  0x77   :  { %v3574_v17 = vpack.c.bf16 %v269_v12, %v268_v11  ;;  %v3576_v19 = vpack.c.bf16 %v287_v16, %v286_v15  ;;  %v270_v20 = vld [vmem:[%s5453_s23 + $0x50] sm:$0xff]  ;;  %v271_v21 = vld [vmem:[%s5453_s23 + $0x58] sm:$0xff]  ;;  %v288_v22 = vld [vmem:[%s5453_s23 + $0xe0] sm:$0xff] }
  0x78   :  { %3567 = vmatpush3.bf16.msra.mxu1 %v3566_v58  ;;  %v289_v23 = vld [vmem:[%s5453_s23 + $0xe8] sm:$0xff]  ;;  %v3578_v24 = vpack.c.bf16 %v271_v21, %v270_v20  ;;  %v133_v25 = vld [vmem:[%s5454_s1] sm:$0xff]  ;;  %v290_v31 = vld [vmem:[%s5453_s23 + $0xf0] sm:$0xff] }
  0x79   :  { %3543 = vmatpush1.bf16.msra.mxu0 %v3542_v47  ;;  %3569 = vmatprep.subr.bf16.mxu1 %v3568_v61  ;;  %v3580_v26 = vpack.c.bf16 %v289_v23, %v288_v22  ;;  %v134_v27 = vld [vmem:[%s5454_s1 + $0x8] sm:$0xff]  ;;  %v272_v28 = vld [vmem:[%s5453_s23 + $0x60] sm:$0xff]  ;;  %v291_v32 = vld [vmem:[%s5453_s23 + $0xf8] sm:$0xff]  ;;  %s4342_s1 = smov 32  }
  0x7a   :  { %3545 = vmatprep.subr.bf16.mxu0 %v3544_v52  ;;  %v273_v29 = vld [vmem:[%s5453_s23 + $0x68] sm:$0xff]  ;;  %v3584_v33 = vpack.c.bf16 %v291_v32, %v290_v31  ;;  %v274_v34 = vld [vmem:[%s5453_s23 + $0x70] sm:$0xff]  ;;  %v275_v35 = vld [vmem:[%s5453_s23 + $0x78] sm:$0xff] }
  0x7b   :  { %v3582_v30 = vpack.c.bf16 %v273_v29, %v272_v28  ;;  %v3586_v36 = vpack.c.bf16 %v275_v35, %v274_v34  ;;  %v377_v37 = vld [vmem:[#allocation4 + $0x8] sm:$0xff]  ;;  %v379_v38 = vld [vmem:[#allocation4 + $0x18] sm:$0xff]  ;;  %v376_v39 = vld [vmem:[#allocation4] sm:$0xff] }
  0x7c   :  { %3571 = vmatpush3.bf16.msra.mxu1 %v3570_v7  ;;  %v3588_v40 = vpack.c.bf16 %v379_v38, %v377_v37  ;;  %v378_v41 = vld [vmem:[#allocation4 + $0x10] sm:$0xff]  ;;  %v381_v42 = vld [vmem:[#allocation4 + $0x28] sm:$0xff]  ;;  %v383_v43 = vld [vmem:[#allocation4 + $0x38] sm:$0xff] }
  0x7d   :  { %3547 = vmatpush1.bf16.msra.mxu0 %v3546_v59  ;;  %3573 = vmatprep.subr.bf16.mxu1 %v3572_v10  ;;  %v3590_v44 = vpack.c.bf16 %v378_v41, %v376_v39  ;;  %v3592_v45 = vpack.c.bf16 %v383_v43, %v381_v42  ;;  %v380_v46 = vld [vmem:[#allocation4 + $0x20] sm:$0xff]  ;;  %v382_v47 = vld [vmem:[#allocation4 + $0x30] sm:$0xff]  ;;  %v385_v48 = vld [vmem:[#allocation4 + $0x48] sm:$0xff] }
  0x7e   :  { %3549 = vmatprep.subr.bf16.mxu0 %v3548_v0  ;;  %v387_v49 = vld [vmem:[#allocation4 + $0x58] sm:$0xff]  ;;  %v3594_v50 = vpack.c.bf16 %v382_v47, %v380_v46  ;;  %v384_v52 = vld [vmem:[#allocation4 + $0x40] sm:$0xff]  ;;  %v386_v53 = vld [vmem:[#allocation4 + $0x50] sm:$0xff] }
  0x7f   :  { %v3596_v51 = vpack.c.bf16 %v387_v49, %v385_v48  ;;  %v389_v54 = vld [vmem:[#allocation4 + $0x68] sm:$0xff]  ;;  %v391_v55 = vld [vmem:[#allocation4 + $0x78] sm:$0xff]  ;;  %v3598_v58 = vpack.c.bf16 %v386_v53, %v384_v52  ;;  %v388_v61 = vld [vmem:[#allocation4 + $0x60] sm:$0xff] }
  0x80   :  { %3575 = vmatpush3.bf16.msra.mxu1 %v3574_v17  ;;  %v498_v56 = vld [vmem:[#allocation7 + $0x8] sm:$0xff]  ;;  %v500_v57 = vld [vmem:[#allocation7 + $0x18] sm:$0xff]  ;;  %v3600_v60 = vpack.c.bf16 %v391_v55, %v389_v54  ;;  %v390_v62 = vld [vmem:[#allocation4 + $0x70] sm:$0xff] }
  0x81   :  { %3551 = vmatpush1.bf16.msra.mxu0 %v3550_v8  ;;  %3577 = vmatprep.subr.bf16.mxu1 %v3576_v19  ;;  %v4738_v59 = vpack.c.bf16 %v500_v57, %v498_v56  ;;  %v393_v63 = vld [vmem:[#allocation4 + $0x88] sm:$0xff]  ;;  %v395_v0 = vld [vmem:[#allocation4 + $0x98] sm:$0xff]  ;;  %v3602_v2 = vpack.c.bf16 %v390_v62, %v388_v61  ;;  %v392_v4 = vld [vmem:[#allocation4 + $0x80] sm:$0xff] }
  0x82   :  { %3553 = vmatprep.subr.bf16.mxu0 %v3552_v13  ;;  %v3604_v3 = vpack.c.bf16 %v395_v0, %v393_v63  ;;  %v394_v5 = vld [vmem:[#allocation4 + $0x90] sm:$0xff]  ;;  %v397_v6 = vld [vmem:[#allocation4 + $0xa8] sm:$0xff]  ;;  %v399_v7 = vld [vmem:[#allocation4 + $0xb8] sm:$0xff]  ;;  %v169_v13 = vlaneseq }
  0x83   :  { %v3606_v8 = vpack.c.bf16 %v394_v5, %v392_v4  ;;  %v3608_v9 = vpack.c.bf16 %v399_v7, %v397_v6  ;;  %v396_v10 = vld [vmem:[#allocation4 + $0xa0] sm:$0xff]  ;;  %v398_v11 = vld [vmem:[#allocation4 + $0xb0] sm:$0xff]  ;;  %v401_v41 = vld [vmem:[#allocation4 + $0xc8] sm:$0xff] }
  0x84   :  { %3579 = vmatpush3.bf16.msra.mxu1 %v3578_v24  ;;  %v3610_v12 = vpack.c.bf16 %v398_v11, %v396_v10  ;;  %v4741_v14 = vshrl.u32 %v169_v13, 7  ;;  %v167_v16 = vld [vmem:[%s5455_s28] sm:$0x3]  ;;  %v497_v23 = vld [vmem:[#allocation7] sm:$0xff]  ;;  %v403_v42 = vld [vmem:[#allocation4 + $0xd8] sm:$0xff]  ;;  %s3332_s28 = sshll.u32 %s4347_s8, 4  ;;  %s3333_s28 = int_to_ptr.vmem [resolvable:$true] %s3332_s28 }
  0x85   :  { %3555 = vmatpush1.bf16.msra.mxu0 %v3554_v18  ;;  %3581 = vmatprep.subr.bf16.mxu1 %v3580_v26  ;;  %v499_v24 = vld [vmem:[#allocation7 + $0x10] sm:$0xff]  ;;  %v502_v26 = vld [vmem:[#allocation7 + $0x28] sm:$0xff]  ;;  %v501_v35 = vld [vmem:[#allocation7 + $0x20] sm:$0xff]  ;;  %v3612_v43 = vpack.c.bf16 %v403_v42, %v401_v41  ;;  %p4306_p13 = scmp.lt.s32.totalorder %s3333_s28, %s3333_s28 }
  0x86   :  { %3589 = vmatprep.subr.bf16.mxu0 %v3588_v40  ;;  %v4744_v15 = vsub.s32 0, %v4741_v14  ;;  %v4750_v17 = vsub.s32 1, %v4741_v14  ;;  %v506_v46 = vld [vmem:[#allocation7 + $0x48] sm:$0xff]  ;;  %v508_v48 = vld [vmem:[#allocation7 + $0x58] sm:$0xff]  ;;  %v505_v49 = vld [vmem:[#allocation7 + $0x40] sm:$0xff] }
  0x87   :  { %v405_v53 = vld [vmem:[#allocation4 + $0xe8] sm:$0xff]  ;;  %v407_v54 = vld [vmem:[#allocation4 + $0xf8] sm:$0xff]  ;;  %v404_v56 = vld [vmem:[#allocation4 + $0xe0] sm:$0xff] }
  0x88   :  { %244 = vmatmul.mubr.f32.vlgmr.msra.gmra.mrb[0].mxu0 %v133_v25  ;;  %3583 = vmatpush3.bf16.msra.mxu1 %v3582_v30  ;;  %v172_v18 = vrot.slane %v167_v16, %v4744_v15  ;;  %v176_v19 = vrot.slane %v167_v16, %v4750_v17  ;;  %v4754_v30 = vpack.c.bf16 %v499_v24, %v497_v23  ;;  %v406_v57 = vld [vmem:[#allocation4 + $0xf0] sm:$0xff]  ;;  %v512_v61 = vld [vmem:[#allocation7 + $0x78] sm:$0xff]  ;;  %v509_v62 = vld [vmem:[#allocation7 + $0x60] sm:$0xff] }
  0x89   :  { %249 = vmatprep.mubr.f32.mxu0 %v4340_v1  ;;  %3585 = vmatprep.subr.bf16.mxu1 %v3584_v33  ;;  %v3616_v55 = vpack.c.bf16 %v407_v54, %v405_v53  ;;  %v511_v63 = vld [vmem:[#allocation7 + $0x70] sm:$0xff]  ;;  %v3343_v4 = vld [vmem:[%s5429_s4] ss:$0 sm:$0xff] }
  0x8a   :  { %3591 = vmatpush1.bf16.msra.mxu0 %v3590_v44  ;;  %v400_v44 = vld [vmem:[#allocation4 + $0xc0] sm:$0xff] }
  0x8b   :  { %3593 = vmatprep.subr.bf16.mxu0 %v3592_v45  ;;  %v402_v45 = vld [vmem:[#allocation4 + $0xd0] sm:$0xff] }
  0x8c   :  { %250 = vmatmul.mubr.f32.gmra.mrb[2].mxu0 %v134_v27  ;;  %3587 = vmatpush3.bf16.msra.mxu1 %v3586_v36  ;;  %v504_v27 = vld [vmem:[#allocation7 + $0x38] sm:$0xff]  ;;  %v503_v36 = vld [vmem:[#allocation7 + $0x30] sm:$0xff]  ;;  %v3614_v47 = vpack.c.bf16 %v402_v45, %v400_v44 }
  0x8d   :  { %484 = vmatprep.mubr.f32.mxu0 %v4340_v1  ;;  %3621 = vmatprep.subr.bf16.mxu1 %v4738_v59  ;;  %v4756_v34 = vpack.c.bf16 %v504_v27, %v502_v26  ;;  %v4759_v40 = vpack.c.bf16 %v503_v36, %v501_v35 }
  0x8e   :  { %3595 = vmatpush1.bf16.msra.mxu0 %v3594_v50  ;;  %v507_v50 = vld [vmem:[#allocation7 + $0x50] sm:$0xff] }
  0x8f   :  { %3597 = vmatprep.subr.bf16.mxu0 %v3596_v51  ;;  %v4764_v51 = vpack.c.bf16 %v508_v48, %v506_v46  ;;  %v4766_v52 = vpack.c.bf16 %v507_v50, %v505_v49 }
  0x92   :  { %3599 = vmatpush1.bf16.msra.mxu0 %v3598_v58  ;;  %v510_v58 = vld [vmem:[#allocation7 + $0x68] sm:$0xff] }
  0x93   :  { %3601 = vmatprep.subr.bf16.mxu0 %v3600_v60  ;;  %v3618_v60 = vpack.c.bf16 %v406_v57, %v404_v56  ;;  %v4770_v0 = vpack.c.bf16 %v512_v61, %v510_v58 }
  0x96   :  { %3603 = vmatpush1.bf16.msra.mxu0 %v3602_v2  ;;  %v4772_v2 = vpack.c.bf16 %v511_v63, %v509_v62 }
  0x97   :  { %3605 = vmatprep.subr.bf16.mxu0 %v3604_v3 }
  0x9a   :  { %3607 = vmatpush1.bf16.msra.mxu0 %v3606_v8 }
  0x9b   :  { %3609 = vmatprep.subr.bf16.mxu0 %v3608_v9 }
  0x9e   :  { %3611 = vmatpush1.bf16.msra.mxu0 %v3610_v12 }
  0x9f   :  { %3613 = vmatprep.subr.bf16.mxu0 %v3612_v43 }
  0xa2   :  { %3615 = vmatpush1.bf16.msra.mxu0 %v3614_v47 }
  0xa3   :  { %3617 = vmatprep.subr.bf16.mxu0 %v3616_v55 }
  0xa6   :  { %3619 = vmatpush1.bf16.msra.mxu0 %v3618_v60 }
  0xa7   :  { %3653 = vmatprep.subr.bf16.mxu0 %v4738_v59 }
 0x15b   :  { %v245_v20 = vpop.f32.mrb[0].mxu0 }
 0x15c   :  { %v246_v21 = vadd.f32 %v245_v20, %v172_v18  ;;  %v247_v22 = vpop.f32.mrb[1].mxu0 }
 0x15d   :  { %v248_v25 = vadd.f32 %v247_v22, %v176_v19 }
 0x15e   :  { %v256_v31 = vmax.f32 %v246_v21, 0.0 }
 0x15f   :  { %v251_v28 = vpop.f32.mrb[2].mxu0  ;;  %v257_v29 = vmax.f32 %v248_v25, 0.0 }
 0x160   :  { %v252_v32 = vadd.f32 %v251_v28, %v172_v18  ;;  %v253_v33 = vpop.f32.mrb[3].mxu0 }
 0x161   :  { %v254_v37 = vadd.f32 %v253_v33, %v176_v19  ;;  %363 = vmatprep.mubr.f32.mxu1 %v257_v29  ;;  %v408_v19 = vld [vmem:[%s5431_s6] sm:$0x3]  ;;  %s4341_s6 = smov 64  }
 0x162   :  { %v258_v38 = vmax.f32 %v252_v32, 0.0  ;;  %364 = vmatmul.mubr.f32.vlgmr.msra.gmra.mrb[0].mxu1 %v256_v31  ;;  %v413_v20 = vrot.slane %v408_v19, %v4744_v15  ;;  %v417_v21 = vrot.slane %v408_v19, %v4750_v17 }
 0x163   :  { %v259_v39 = vmax.f32 %v254_v37, 0.0  ;;  %3623 = vmatpush1.bf16.msra.mxu1 %v4754_v30 }
 0x164   :  { %3625 = vmatprep.subr.bf16.mxu1 %v4756_v34 }
 0x165   :  { %368 = vmatprep.mubr.f32.mxu1 %v259_v39 }
 0x166   :  { %369 = vmatmul.mubr.f32.gmra.mrb[2].mxu1 %v258_v38 }
 0x167   :  { %3627 = vmatpush1.bf16.msra.mxu1 %v4759_v40  ;;  %584 = vmatprep.mubr.f32.mxu1 %v4340_v1 }
 0x168   :  { %3629 = vmatprep.subr.bf16.mxu1 %v4764_v51 }
 0x16b   :  { %3631 = vmatpush1.bf16.msra.mxu1 %v4766_v52 }
 0x16c   :  { %3633 = vmatprep.subr.bf16.mxu1 %v4770_v0 }
 0x16f   :  { %3635 = vmatpush1.bf16.msra.mxu1 %v4772_v2 }
 0x170   :  { %3637 = vmatprep.subr.bf16.mxu1 %v4738_v59 }
 0x172   :  { %585 = vmatmul.mubr.f32.vlgmr.msra.gmra.mrb[4].mxu1 %v4340_v1 }
 0x173   :  { %3639 = vmatpush1.bf16.msra.mxu1 %v4754_v30  ;;  %729 = vmatprep.mubr.f32.mxu1 %v4340_v1 }
 0x174   :  { %3641 = vmatprep.subr.bf16.mxu1 %v4756_v34 }
 0x177   :  { %3643 = vmatpush1.bf16.msra.mxu1 %v4759_v40 }
 0x178   :  { %3645 = vmatprep.subr.bf16.mxu1 %v4764_v51 }
 0x17b   :  { %3647 = vmatpush1.bf16.msra.mxu1 %v4766_v52 }
 0x17c   :  { %3649 = vmatprep.subr.bf16.mxu1 %v4770_v0 }
 0x17f   :  { %3651 = vmatpush1.bf16.msra.mxu1 %v4772_v2 }
 0x180   :  { %3669 = vmatprep.subr.bf16.mxu1 %v4738_v59 }
 0x235   :  { %v3433_v3 = vpop.f32.mrb[0].mxu1 }
 0x236   :  { %v3434_v5 = vpop.f32.mrb[1].mxu1 }
 0x237   :  { %v3435_v6 = vadd.f32 %v3434_v5, %v3433_v3 }
 0x239   :  { %v366_v7 = vadd.f32 %v3435_v6, %v3343_v4  ;;  %v3436_v8 = vpop.f32.mrb[2].mxu1 }
 0x23a   :  { %v3437_v9 = vpop.f32.mrb[3].mxu1 }
 0x23b   :  { %v374_v10 = vmax.f32 %v366_v7, 0.0  ;;  %v3438_v11 = vadd.f32 %v3437_v9, %v3436_v8 }
 0x23d   :  { %v371_v12 = vadd.f32 %v3438_v11, %v3343_v4  ;;  %485 = vmatmul.mubr.f32.vlgmr.msra.gmra.mrb[4].mxu0 %v374_v10 }
 0x23e   :  { %490 = vmatprep.mubr.f32.mxu0 %v4340_v1  ;;  %3655 = vmatpush1.bf16.msra.mxu0 %v4754_v30 }
 0x23f   :  { %v375_v13 = vmax.f32 %v371_v12, 0.0  ;;  %3657 = vmatprep.subr.bf16.mxu0 %v4756_v34 }
 0x241   :  { %491 = vmatmul.mubr.f32.gmra.mrb[6].mxu0 %v375_v13 }
 0x242   :  { %3659 = vmatpush1.bf16.msra.mxu0 %v4759_v40  ;;  %869 = vmatprep.mubr.f32.mxu0 %v4340_v1 }
 0x243   :  { %3661 = vmatprep.subr.bf16.mxu0 %v4764_v51 }
 0x245   :  { %v586_v16 = vpop.f32.mrb[4].mxu1 }
 0x246   :  { %3663 = vmatpush1.bf16.msra.mxu0 %v4766_v52  ;;  %v588_v18 = vpop.f32.mrb[5].mxu1 }
 0x247   :  { %3665 = vmatprep.subr.bf16.mxu0 %v4770_v0 }
 0x24a   :  { %3667 = vmatpush1.bf16.msra.mxu0 %v4772_v2 }
 0x24b   :  { %3685 = vmatprep.subr.bf16.mxu0 %v4738_v59 }
 0x310   :  { %v486_v22 = vpop.f32.mrb[4].mxu0 }
 0x311   :  { %v4806_v23 = vadd.f32 %v486_v22, %v413_v20  ;;  %v488_v24 = vpop.f32.mrb[5].mxu0 }
 0x312   :  { %v4808_v25 = vadd.f32 %v488_v24, %v417_v21 }
 0x313   :  { %v587_v26 = vadd.f32 %v586_v16, %v4806_v23  ;;  %v658_v9 = vrot.slane %v4806_v23, 2 }
 0x314   :  { %v492_v27 = vpop.f32.mrb[6].mxu0 }
 0x315   :  { %3951 = vtanh.f32 %v587_v26  ;;  %v4811_v28 = vadd.f32 %v492_v27, %v413_v20  ;;  %v494_v29 = vpop.f32.mrb[7].mxu0  ;;  %v3344_v37 = vmul.f32 -1.442695, %v587_v26 }
 0x316   :  { %v4813_v31 = vadd.f32 %v494_v29, %v417_v21 }
 0x318   :  { %v514_v32 = vrot.slane %v4813_v31, 6  ;;  %v656_v8 = vrot.slane %v4813_v31, 2 }
 0x31a   :  { %v589_v33 = vadd.f32 %v588_v18, %v514_v32  ;;  %v659_v11 = vrot.slane %v656_v8, 2 }
 0x31c   :  { %3953 = vtanh.f32 %v589_v33  ;;  %v3345_v38 = vmul.f32 -1.442695, %v589_v33 }
 0x31d   :  { %3955 = vpow2.f32 %v3344_v37 }
 0x31e   :  { %3957 = vpow2.f32 %v3345_v38 }
 0x31f   :  { %v3952_v35 = vpop.eup %3951 }
 0x320   :  { %607 = vrot.lane.b32.xlu0 %v3952_v35, %s4341_s6 }
 0x326   :  { %v3954_v36 = vpop.eup %3953 }
 0x327   :  { %618 = vrot.lane.b32.xlu0 %v3954_v36, %s4341_s6  ;;  %v3956_v39 = vpop.eup %3955 }
 0x328   :  { %v597_v41 = vadd.f32 1.0, %v3956_v39  ;;  %v3958_v42 = vpop.eup %3957 }
 0x329   :  { %v598_v43 = vadd.f32 1.0, %v3958_v42 }
 0x32a   :  { %3959 = vrcp.f32 %v597_v41 }
 0x32b   :  { %3961 = vrcp.f32 %v598_v43 }
 0x334   :  { %v3960_v44 = vpop.eup %3959 }
 0x335   :  { %v3962_v47 = vpop.eup %3961  ;;  %v605_v50 = vmul.f32 0.0, %v3960_v44 }
 0x336   :  { %v616_v56 = vmul.f32 0.0, %v3962_v47 }
 0x392   :  { %v608_v45 = vpop.permute.xlu0 %607 }
 0x393   :  { %v610_v46 = vmul.f32 %v3960_v44, %v608_v45 }
 0x395   :  { %612 = vrot.lane.b32.xlu1 %v610_v46, %s4342_s1 }
 0x399   :  { %v619_v48 = vpop.permute.xlu0 %618 }
 0x39a   :  { %v621_v49 = vmul.f32 %v3962_v47, %v619_v48 }
 0x39c   :  { %623 = vrot.lane.b32.xlu1 %v621_v49, %s4342_s1 }
 0x407   :  { %v613_v53 = vpop.permute.xlu1 %612 }
 0x408   :  { %v4822_v54 = vadd.f32 %v613_v53, %v605_v50 }
 0x40a   :  { %628 = vrot.lane.b32.xlu0 %v4822_v54, %s4343_s5 }
 0x40e   :  { %v624_v55 = vpop.permute.xlu1 %623 }
 0x40f   :  { %v4826_v57 = vadd.f32 %v624_v55, %v616_v56 }
 0x47c   :  { %v629_v58 = vpop.permute.xlu0 %628 }
 0x47d   :  { %v632_v60 = vsel %vm631_vm0, %v629_v58, %v4826_v57  ;;  %v798_v58 = vrot.slane %v4806_v23, 4 }
 0x47e   :  { %3963 = vtanh.f32 %v632_v60 }
 0x488   :  { %v3964_v61 = vpop.eup %3963 }
 0x489   :  { %639 = vrot.lane.b32.xlu0 %v3964_v61, %s4341_s6  ;;  %635 = vrot.lane.b32.xlu1 %v3964_v61, %s4343_s5  ;;  %v799_v61 = vrot.slane %v514_v32, 4 }
 0x4fb   :  { %v640_v62 = vpop.permute.xlu0 %639  ;;  %v636_v63 = vpop.permute.xlu1 %635 }
 0x4fc   :  { %v642_v3 = vmul.f32 %v3962_v47, %v640_v62  ;;  %v638_v4 = vmul.f32 %v3960_v44, %v636_v63 }
 0x4fe   :  { %650 = vrot.lane.b32.xlu0 %v642_v3, %s4341_s6  ;;  %644 = vrot.lane.b32.xlu1 %v638_v4, %s4342_s1 }
 0x570   :  { %v651_v5 = vpop.permute.xlu0 %650  ;;  %v645_v6 = vpop.permute.xlu1 %644 }
 0x571   :  { %654 = vst.msk [vmem:[#allocation2 + $0xe] sm:$0x3] %vm653_vm1, %v651_v5  ;;  %v655_v7 = vsel %vm631_vm0, %v645_v6, %v651_v5 }
 0x572   :  { %648 = vst.msk [vmem:[#allocation2] sm:$0x3] %vm647_vm2, %v645_v6  ;;  %3346 = vmatmul.mubr.msk.f32.vlgmr.msra.gmra.mrb[6].mxu1 %vm516_vm3, %v655_v7 }
 0x573   :  { %3671 = vmatpush1.bf16.msra.mxu1 %v4754_v30  ;;  %1009 = vmatprep.mubr.f32.mxu1 %v4340_v1 }
 0x574   :  { %3673 = vmatprep.subr.bf16.mxu1 %v4756_v34 }
 0x577   :  { %3675 = vmatpush1.bf16.msra.mxu1 %v4759_v40 }
 0x578   :  { %3677 = vmatprep.subr.bf16.mxu1 %v4764_v51 }
 0x57b   :  { %3679 = vmatpush1.bf16.msra.mxu1 %v4766_v52 }
 0x57c   :  { %3681 = vmatprep.subr.bf16.mxu1 %v4770_v0 }
 0x57f   :  { %3683 = vmatpush1.bf16.msra.mxu1 %v4772_v2 }
 0x580   :  { %3701 = vmatprep.subr.bf16.mxu1 %v4738_v59 }
 0x645   :  { %v731_v10 = vpop.f32.mrb[6].mxu1 }
 0x646   :  { %v732_v12 = vadd.f32 %v731_v10, %v658_v9  ;;  %v733_v13 = vpop.f32.mrb[7].mxu1 }
 0x647   :  { %v734_v16 = vadd.f32 %v733_v13, %v659_v11 }
 0x648   :  { %3965 = vtanh.f32 %v732_v12  ;;  %v3347_v20 = vmul.f32 -1.442695, %v732_v12 }
 0x649   :  { %3967 = vtanh.f32 %v734_v16  ;;  %v3348_v21 = vmul.f32 -1.442695, %v734_v16 }
 0x64a   :  { %3969 = vpow2.f32 %v3347_v20 }
 0x64b   :  { %3971 = vpow2.f32 %v3348_v21 }
 0x652   :  { %v3966_v18 = vpop.eup %3965 }
 0x653   :  { %v3968_v19 = vpop.eup %3967  ;;  %752 = vrot.lane.b32.xlu1 %v3966_v18, %s4341_s6 }
 0x654   :  { %763 = vrot.lane.b32.xlu0 %v3968_v19, %s4341_s6  ;;  %v3970_v22 = vpop.eup %3969 }
 0x655   :  { %v3972_v24 = vpop.eup %3971  ;;  %v742_v26 = vadd.f32 1.0, %v3970_v22 }
 0x656   :  { %v743_v27 = vadd.f32 1.0, %v3972_v24 }
 0x657   :  { %3973 = vrcp.f32 %v742_v26 }
 0x658   :  { %3975 = vrcp.f32 %v743_v27 }
 0x661   :  { %v3974_v29 = vpop.eup %3973 }
 0x662   :  { %v3976_v35 = vpop.eup %3975  ;;  %v750_v39 = vmul.f32 %v3974_v29, %v4822_v54 }
 0x663   :  { %v761_v44 = vmul.f32 %v3976_v35, %v4826_v57 }
 0x6c5   :  { %v753_v33 = vpop.permute.xlu1 %752 }
 0x6c6   :  { %v755_v36 = vmul.f32 %v3974_v29, %v753_v33  ;;  %v764_v37 = vpop.permute.xlu0 %763 }
 0x6c7   :  { %v766_v38 = vmul.f32 %v3976_v35, %v764_v37 }
 0x6c8   :  { %757 = vrot.lane.b32.xlu1 %v755_v36, %s4342_s1 }
 0x6c9   :  { %768 = vrot.lane.b32.xlu0 %v766_v38, %s4342_s1 }
 0x73a   :  { %v758_v41 = vpop.permute.xlu1 %757 }
 0x73b   :  { %v760_v42 = vadd.f32 %v758_v41, %v750_v39  ;;  %v769_v43 = vpop.permute.xlu0 %768 }
 0x73c   :  { %v4858_v45 = vadd.f32 %v769_v43, %v761_v44 }
 0x73d   :  { %773 = vrot.lane.b32.xlu1 %v760_v42, %s4343_s5 }
 0x7af   :  { %v774_v46 = vpop.permute.xlu1 %773 }
 0x7b0   :  { %v776_v47 = vsel %vm631_vm0, %v774_v46, %v4858_v45 }
 0x7b1   :  { %3977 = vtanh.f32 %v776_v47  ;;  %v939_v47 = vrot.slane %v656_v8, 6 }
 0x7bb   :  { %v3978_v48 = vpop.eup %3977 }
 0x7bc   :  { %783 = vrot.lane.b32.xlu1 %v3978_v48, %s4341_s6  ;;  %779 = vrot.lane.b32.xlu0 %v3978_v48, %s4343_s5 }
 0x82e   :  { %v784_v49 = vpop.permute.xlu1 %783  ;;  %v780_v50 = vpop.permute.xlu0 %779 }
 0x82f   :  { %v786_v53 = vmul.f32 %v3976_v35, %v784_v49  ;;  %v782_v54 = vmul.f32 %v3974_v29, %v780_v50 }
 0x831   :  { %793 = vrot.lane.b32.xlu1 %v786_v53, %s4341_s6  ;;  %788 = vrot.lane.b32.xlu0 %v782_v54, %s4342_s1 }
 0x8a3   :  { %v794_v55 = vpop.permute.xlu1 %793  ;;  %v789_v56 = vpop.permute.xlu0 %788 }
 0x8a4   :  { %796 = vst.msk [vmem:[#allocation2 + $0xc] sm:$0x3] %vm653_vm1, %v794_v55  ;;  %v797_v57 = vsel %vm631_vm0, %v789_v56, %v794_v55 }
 0x8a5   :  { %791 = vst.msk [vmem:[#allocation2 + $0x2] sm:$0x3] %vm647_vm2, %v789_v56  ;;  %3349 = vmatmul.mubr.msk.f32.vlgmr.msra.gmra.mrb[8].mxu0 %vm516_vm3, %v797_v57 }
 0x8a6   :  { %3687 = vmatpush1.bf16.msra.mxu0 %v4754_v30  ;;  %1148 = vmatprep.mubr.f32.mxu0 %v4340_v1 }
 0x8a7   :  { %3689 = vmatprep.subr.bf16.mxu0 %v4756_v34 }
 0x8aa   :  { %3691 = vmatpush1.bf16.msra.mxu0 %v4759_v40 }
 0x8ab   :  { %3693 = vmatprep.subr.bf16.mxu0 %v4764_v51 }
 0x8ae   :  { %3695 = vmatpush1.bf16.msra.mxu0 %v4766_v52 }
 0x8af   :  { %3697 = vmatprep.subr.bf16.mxu0 %v4770_v0 }
 0x8b2   :  { %3699 = vmatpush1.bf16.msra.mxu0 %v4772_v2 }
 0x8b3   :  { %3717 = vmatprep.subr.bf16.mxu0 %v4738_v59 }
 0x978   :  { %v871_v60 = vpop.f32.mrb[8].mxu0 }
 0x979   :  { %v872_v62 = vadd.f32 %v871_v60, %v798_v58  ;;  %v873_v63 = vpop.f32.mrb[9].mxu0 }
 0x97a   :  { %v874_v3 = vadd.f32 %v873_v63, %v799_v61 }
 0x97b   :  { %3979 = vtanh.f32 %v872_v62  ;;  %v3350_v6 = vmul.f32 -1.442695, %v872_v62 }
 0x97c   :  { %3981 = vtanh.f32 %v874_v3  ;;  %v3351_v7 = vmul.f32 -1.442695, %v874_v3 }
 0x97d   :  { %3983 = vpow2.f32 %v3350_v6 }
 0x97e   :  { %3985 = vpow2.f32 %v3351_v7 }
 0x985   :  { %v3980_v4 = vpop.eup %3979 }
 0x986   :  { %v3982_v5 = vpop.eup %3981  ;;  %892 = vrot.lane.b32.xlu0 %v3980_v4, %s4341_s6 }
 0x987   :  { %903 = vrot.lane.b32.xlu1 %v3982_v5, %s4341_s6  ;;  %v3984_v9 = vpop.eup %3983 }
 0x988   :  { %v3986_v10 = vpop.eup %3985  ;;  %v882_v11 = vadd.f32 1.0, %v3984_v9 }
 0x989   :  { %v883_v12 = vadd.f32 1.0, %v3986_v10 }
 0x98a   :  { %3987 = vrcp.f32 %v882_v11 }
 0x98b   :  { %3989 = vrcp.f32 %v883_v12 }
 0x994   :  { %v3988_v32 = vpop.eup %3987 }
 0x995   :  { %v3990_v16 = vpop.eup %3989  ;;  %v890_v21 = vmul.f32 %v3988_v32, %v760_v42 }
 0x996   :  { %v901_v27 = vmul.f32 %v3990_v16, %v4858_v45  ;;  %v938_v45 = vrot.slane %v4806_v23, 6 }
 0x9f8   :  { %v893_v13 = vpop.permute.xlu0 %892 }
 0x9f9   :  { %v895_v18 = vmul.f32 %v3988_v32, %v893_v13  ;;  %v904_v19 = vpop.permute.xlu1 %903 }
 0x9fa   :  { %v906_v20 = vmul.f32 %v3990_v16, %v904_v19 }
 0x9fb   :  { %897 = vrot.lane.b32.xlu0 %v895_v18, %s4342_s1 }
 0x9fc   :  { %908 = vrot.lane.b32.xlu1 %v906_v20, %s4342_s1 }
 0xa6d   :  { %v898_v22 = vpop.permute.xlu0 %897 }
 0xa6e   :  { %v900_v24 = vadd.f32 %v898_v22, %v890_v21  ;;  %v909_v26 = vpop.permute.xlu1 %908 }
 0xa6f   :  { %v4888_v29 = vadd.f32 %v909_v26, %v901_v27 }
 0xa70   :  { %913 = vrot.lane.b32.xlu0 %v900_v24, %s4343_s5 }
 0xae2   :  { %v914_v33 = vpop.permute.xlu0 %913 }
 0xae3   :  { %v916_v35 = vsel %vm631_vm0, %v914_v33, %v4888_v29 }
 0xae4   :  { %3991 = vtanh.f32 %v916_v35 }
 0xaee   :  { %v3992_v36 = vpop.eup %3991 }
 0xaef   :  { %923 = vrot.lane.b32.xlu0 %v3992_v36, %s4341_s6  ;;  %919 = vrot.lane.b32.xlu1 %v3992_v36, %s4343_s5 }
 0xb61   :  { %v924_v37 = vpop.permute.xlu0 %923  ;;  %v920_v38 = vpop.permute.xlu1 %919 }
 0xb62   :  { %v926_v39 = vmul.f32 %v3990_v16, %v924_v37  ;;  %v922_v41 = vmul.f32 %v3988_v32, %v920_v38 }
 0xb64   :  { %933 = vrot.lane.b32.xlu0 %v926_v39, %s4341_s6  ;;  %928 = vrot.lane.b32.xlu1 %v922_v41, %s4342_s1 }
 0xbd6   :  { %v934_v42 = vpop.permute.xlu0 %933  ;;  %v929_v43 = vpop.permute.xlu1 %928 }
 0xbd7   :  { %936 = vst.msk [vmem:[#allocation2 + $0xa] sm:$0x3] %vm653_vm1, %v934_v42  ;;  %v937_v44 = vsel %vm631_vm0, %v929_v43, %v934_v42 }
 0xbd8   :  { %931 = vst.msk [vmem:[#allocation2 + $0x4] sm:$0x3] %vm647_vm2, %v929_v43  ;;  %3352 = vmatmul.mubr.msk.f32.vlgmr.msra.gmra.mrb[8].mxu1 %vm516_vm3, %v937_v44 }
 0xbd9   :  { %3703 = vmatpush1.bf16.msra.mxu1 %v4754_v30  ;;  %1290 = vmatprep.mubr.f32.mxu1 %v4340_v1 }
 0xbda   :  { %3705 = vmatprep.subr.bf16.mxu1 %v4756_v34 }
 0xbdd   :  { %3707 = vmatpush1.bf16.msra.mxu1 %v4759_v40 }
 0xbde   :  { %3709 = vmatprep.subr.bf16.mxu1 %v4764_v51 }
 0xbe1   :  { %3711 = vmatpush1.bf16.msra.mxu1 %v4766_v52 }
 0xbe2   :  { %3713 = vmatprep.subr.bf16.mxu1 %v4770_v0 }
 0xbe5   :  { %3715 = vmatpush1.bf16.msra.mxu1 %v4772_v2 }
 0xbe6   :  { %3733 = vmatprep.subr.bf16.mxu1 %v4738_v59 }
 0xcab   :  { %v1011_v46 = vpop.f32.mrb[8].mxu1 }
 0xcac   :  { %v1012_v48 = vadd.f32 %v1011_v46, %v938_v45  ;;  %v1013_v49 = vpop.f32.mrb[9].mxu1 }
 0xcad   :  { %v1014_v50 = vadd.f32 %v1013_v49, %v939_v47 }
 0xcae   :  { %3993 = vtanh.f32 %v1012_v48  ;;  %v3353_v55 = vmul.f32 -1.442695, %v1012_v48 }
 0xcaf   :  { %3995 = vtanh.f32 %v1014_v50  ;;  %v3354_v56 = vmul.f32 -1.442695, %v1014_v50 }
 0xcb0   :  { %3997 = vpow2.f32 %v3353_v55 }
 0xcb1   :  { %3999 = vpow2.f32 %v3354_v56 }
 0xcb8   :  { %v3994_v53 = vpop.eup %3993 }
 0xcb9   :  { %v3996_v54 = vpop.eup %3995  ;;  %1032 = vrot.lane.b32.xlu1 %v3994_v53, %s4341_s6 }
 0xcba   :  { %1043 = vrot.lane.b32.xlu0 %v3996_v54, %s4341_s6  ;;  %v3998_v59 = vpop.eup %3997 }
 0xcbb   :  { %v4000_v23 = vpop.eup %3999  ;;  %v1022_v57 = vadd.f32 1.0, %v3998_v59 }
 0xcbc   :  { %v1023_v31 = vadd.f32 1.0, %v4000_v23 }
 0xcbd   :  { %4001 = vrcp.f32 %v1022_v57 }
 0xcbe   :  { %4003 = vrcp.f32 %v1023_v31 }
 0xcc7   :  { %v4002_v8 = vpop.eup %4001 }
 0xcc8   :  { %v4004_v60 = vpop.eup %4003  ;;  %v1030_v3 = vmul.f32 %v4002_v8, %v900_v24  ;;  %v1079_v24 = vrot.slane %v4808_v25, 6 }
 0xcc9   :  { %v1041_v7 = vmul.f32 %v4004_v60, %v4888_v29 }
 0xd2b   :  { %v1033_v58 = vpop.permute.xlu1 %1032 }
 0xd2c   :  { %v1035_v61 = vmul.f32 %v4002_v8, %v1033_v58  ;;  %v1044_v62 = vpop.permute.xlu0 %1043 }
 0xd2d   :  { %v1046_v63 = vmul.f32 %v4004_v60, %v1044_v62 }
 0xd2e   :  { %1037 = vrot.lane.b32.xlu1 %v1035_v61, %s4342_s1 }
 0xd2f   :  { %1048 = vrot.lane.b32.xlu0 %v1046_v63, %s4342_s1 }
 0xda0   :  { %v1038_v4 = vpop.permute.xlu1 %1037 }
 0xda1   :  { %v1040_v5 = vadd.f32 %v1038_v4, %v1030_v3  ;;  %v1049_v6 = vpop.permute.xlu0 %1048  ;;  %v1217_v3 = vrot.slane %v4808_v25, 2  ;;  %v1219_v4 = vrot.slane %v4811_v28, 2 }
 0xda2   :  { %v1051_v9 = vadd.f32 %v1049_v6, %v1041_v7 }
 0xda3   :  { %1053 = vrot.lane.b32.xlu1 %v1040_v5, %s4343_s5 }
 0xe15   :  { %v1054_v10 = vpop.permute.xlu1 %1053 }
 0xe16   :  { %v1056_v11 = vsel %vm631_vm0, %v1054_v10, %v1051_v9 }
 0xe17   :  { %4005 = vtanh.f32 %v1056_v11 }
 0xe21   :  { %v4006_v12 = vpop.eup %4005 }
 0xe22   :  { %1063 = vrot.lane.b32.xlu1 %v4006_v12, %s4341_s6  ;;  %1059 = vrot.lane.b32.xlu0 %v4006_v12, %s4343_s5 }
 0xe94   :  { %v1064_v32 = vpop.permute.xlu1 %1063  ;;  %v1060_v13 = vpop.permute.xlu0 %1059 }
 0xe95   :  { %v1066_v16 = vmul.f32 %v4004_v60, %v1064_v32  ;;  %v1062_v18 = vmul.f32 %v4002_v8, %v1060_v13 }
 0xe97   :  { %1073 = vrot.lane.b32.xlu1 %v1066_v16, %s4341_s6  ;;  %1068 = vrot.lane.b32.xlu0 %v1062_v18, %s4342_s1 }
 0xf09   :  { %v1074_v19 = vpop.permute.xlu1 %1073  ;;  %v1069_v20 = vpop.permute.xlu0 %1068 }
 0xf0a   :  { %1076 = vst.msk [vmem:[#allocation2 + $0x8] sm:$0x3] %vm653_vm1, %v1074_v19  ;;  %v1077_v21 = vsel %vm631_vm0, %v1069_v20, %v1074_v19 }
 0xf0b   :  { %1071 = vst.msk [vmem:[#allocation2 + $0x6] sm:$0x3] %vm647_vm2, %v1069_v20  ;;  %3355 = vmatmul.mubr.msk.f32.vlgmr.msra.gmra.mrb[10].mxu0 %vm516_vm3, %v1077_v21 }
 0xf0c   :  { %3719 = vmatpush1.bf16.msra.mxu0 %v4754_v30  ;;  %1430 = vmatprep.mubr.f32.mxu0 %v4340_v1 }
 0xf0d   :  { %3721 = vmatprep.subr.bf16.mxu0 %v4756_v34 }
 0xf10   :  { %3723 = vmatpush1.bf16.msra.mxu0 %v4759_v40 }
 0xf11   :  { %3725 = vmatprep.subr.bf16.mxu0 %v4764_v51 }
 0xf14   :  { %3727 = vmatpush1.bf16.msra.mxu0 %v4766_v52 }
 0xf15   :  { %3729 = vmatprep.subr.bf16.mxu0 %v4770_v0 }
 0xf18   :  { %3731 = vmatpush1.bf16.msra.mxu0 %v4772_v2 }
 0xfde   :  { %v1150_v22 = vpop.f32.mrb[10].mxu0 }
 0xfdf   :  { %v1151_v26 = vadd.f32 %v1150_v22, %v4811_v28  ;;  %v1152_v27 = vpop.f32.mrb[11].mxu0 }
 0xfe0   :  { %v1153_v29 = vadd.f32 %v1152_v27, %v1079_v24 }
 0xfe1   :  { %4007 = vtanh.f32 %v1151_v26  ;;  %v3356_v36 = vmul.f32 -1.442695, %v1151_v26 }
 0xfe2   :  { %4009 = vtanh.f32 %v1153_v29  ;;  %v3357_v37 = vmul.f32 -1.442695, %v1153_v29 }
 0xfe3   :  { %4011 = vpow2.f32 %v3356_v36 }
 0xfe4   :  { %4013 = vpow2.f32 %v3357_v37 }
 0xfeb   :  { %v4008_v33 = vpop.eup %4007 }
 0xfec   :  { %v4010_v35 = vpop.eup %4009  ;;  %1171 = vrot.lane.b32.xlu0 %v4008_v33, %s4341_s6 }
 0xfed   :  { %1182 = vrot.lane.b32.xlu1 %v4010_v35, %s4341_s6  ;;  %v4012_v38 = vpop.eup %4011 }
 0xfee   :  { %v4014_v39 = vpop.eup %4013  ;;  %v1161_v41 = vadd.f32 1.0, %v4012_v38 }
 0xfef   :  { %v1162_v42 = vadd.f32 1.0, %v4014_v39 }
 0xff0   :  { %4015 = vrcp.f32 %v1161_v41 }
 0xff1   :  { %4017 = vrcp.f32 %v1162_v42 }
 0xffa   :  { %v4016_v43 = vpop.eup %4015 }
 0xffb   :  { %v4018_v45 = vpop.eup %4017  ;;  %v1169_v49 = vmul.f32 %v4016_v43, %v1040_v5 }
 0xffc   :  { %v1180_v55 = vmul.f32 %v4018_v45, %v1051_v9 }
0x105e   :  { %v1172_v44 = vpop.permute.xlu0 %1171 }
0x105f   :  { %v1174_v46 = vmul.f32 %v4016_v43, %v1172_v44  ;;  %v1183_v47 = vpop.permute.xlu1 %1182 }
0x1060   :  { %v1185_v48 = vmul.f32 %v4018_v45, %v1183_v47  ;;  %v1360_v47 = vrot.slane %v1079_v24, 4 }
0x1061   :  { %1176 = vrot.lane.b32.xlu0 %v1174_v46, %s4342_s1 }
0x1062   :  { %1187 = vrot.lane.b32.xlu1 %v1185_v48, %s4342_s1 }
0x10d3   :  { %v1177_v50 = vpop.permute.xlu0 %1176 }
0x10d4   :  { %v1179_v53 = vadd.f32 %v1177_v50, %v1169_v49  ;;  %v1188_v54 = vpop.permute.xlu1 %1187 }
0x10d5   :  { %v4944_v56 = vadd.f32 %v1188_v54, %v1180_v55 }
0x10d6   :  { %1192 = vrot.lane.b32.xlu0 %v1179_v53, %s4343_s5 }
0x1148   :  { %v1193_v59 = vpop.permute.xlu0 %1192 }
0x1149   :  { %v1195_v23 = vsel %vm631_vm0, %v1193_v59, %v4944_v56 }
0x114a   :  { %4019 = vtanh.f32 %v1195_v23 }
0x1154   :  { %v4020_v57 = vpop.eup %4019 }
0x1155   :  { %1202 = vrot.lane.b32.xlu0 %v4020_v57, %s4341_s6  ;;  %1198 = vrot.lane.b32.xlu1 %v4020_v57, %s4343_s5 }
0x11c7   :  { %v1203_v31 = vpop.permute.xlu0 %1202  ;;  %v1199_v8 = vpop.permute.xlu1 %1198 }
0x11c8   :  { %v1205_v58 = vmul.f32 %v4018_v45, %v1203_v31  ;;  %v1201_v60 = vmul.f32 %v4016_v43, %v1199_v8  ;;  %v1359_v45 = vrot.slane %v4811_v28, 4 }
0x11ca   :  { %1212 = vrot.lane.b32.xlu0 %v1205_v58, %s4341_s6  ;;  %1207 = vrot.lane.b32.xlu1 %v1201_v60, %s4342_s1 }
0x123c   :  { %v1213_v61 = vpop.permute.xlu0 %1212  ;;  %v1208_v62 = vpop.permute.xlu1 %1207 }
0x123d   :  { %1215 = vst.msk [vmem:[#allocation2 + $0x6] sm:$0x3] %vm653_vm1, %v1213_v61  ;;  %v1216_v63 = vsel %vm631_vm0, %v1208_v62, %v1213_v61 }
0x123e   :  { %1210 = vst.msk [vmem:[#allocation2 + $0x8] sm:$0x3] %vm647_vm2, %v1208_v62  ;;  %3358 = vmatmul.mubr.msk.f32.vlgmr.msra.gmra.mrb[10].mxu1 %vm516_vm3, %v1216_v63 }
0x123f   :  { %3735 = vmatpush1.bf16.msra.mxu1 %v4754_v30  ;;  %1570 = vmatprep.mubr.f32.mxu1 %v4340_v1  ;;  %v1220_v30 = vrot.slane %v1217_v3, 2 }
0x1240   :  { %3737 = vmatprep.subr.bf16.mxu1 %v4756_v34 }
0x1243   :  { %3739 = vmatpush1.bf16.msra.mxu1 %v4759_v40 }
0x1244   :  { %3741 = vmatprep.subr.bf16.mxu1 %v4764_v51 }
0x1247   :  { %3743 = vmatpush1.bf16.msra.mxu1 %v4766_v52 }
0x1248   :  { %3745 = vmatprep.subr.bf16.mxu1 %v4770_v0 }
0x124b   :  { %3747 = vmatpush1.bf16.msra.mxu1 %v4772_v2 }
0x1311   :  { %v1292_v5 = vpop.f32.mrb[10].mxu1 }
0x1312   :  { %v1293_v6 = vadd.f32 %v1292_v5, %v1219_v4  ;;  %v1294_v34 = vpop.f32.mrb[11].mxu1 }
0x1313   :  { %v1295_v7 = vadd.f32 %v1294_v34, %v1220_v30 }
0x1314   :  { %4021 = vtanh.f32 %v1293_v6  ;;  %v3359_v52 = vmul.f32 -1.442695, %v1293_v6 }
0x1315   :  { %4023 = vtanh.f32 %v1295_v7  ;;  %v3360_v0 = vmul.f32 -1.442695, %v1295_v7 }
0x1316   :  { %4025 = vpow2.f32 %v3359_v52 }
0x1317   :  { %4027 = vpow2.f32 %v3360_v0 }
0x131e   :  { %v4022_v40 = vpop.eup %4021 }
0x131f   :  { %v4024_v51 = vpop.eup %4023  ;;  %1313 = vrot.lane.b32.xlu1 %v4022_v40, %s4341_s6 }
0x1320   :  { %1324 = vrot.lane.b32.xlu0 %v4024_v51, %s4341_s6  ;;  %v4026_v2 = vpop.eup %4025 }
0x1321   :  { %v4028_v9 = vpop.eup %4027  ;;  %v1303_v10 = vadd.f32 1.0, %v4026_v2 }
0x1322   :  { %v1304_v11 = vadd.f32 1.0, %v4028_v9 }
0x1323   :  { %4029 = vrcp.f32 %v1303_v10 }
0x1324   :  { %4031 = vrcp.f32 %v1304_v11 }
0x132d   :  { %v4030_v12 = vpop.eup %4029 }
0x132e   :  { %v4032_v13 = vpop.eup %4031  ;;  %v1311_v20 = vmul.f32 %v4030_v12, %v1179_v53 }
0x132f   :  { %v1322_v27 = vmul.f32 %v4032_v13, %v4944_v56 }
0x1391   :  { %v1314_v32 = vpop.permute.xlu1 %1313 }
0x1392   :  { %v1316_v16 = vmul.f32 %v4030_v12, %v1314_v32  ;;  %v1325_v18 = vpop.permute.xlu0 %1324  ;;  %v1499_v32 = vrot.slane %v4811_v28, 6 }
0x1393   :  { %v1327_v19 = vmul.f32 %v4032_v13, %v1325_v18 }
0x1394   :  { %1318 = vrot.lane.b32.xlu1 %v1316_v16, %s4342_s1  ;;  %v1500_v16 = vrot.slane %v1217_v3, 6 }
0x1395   :  { %1329 = vrot.lane.b32.xlu0 %v1327_v19, %s4342_s1 }
0x1406   :  { %v1319_v21 = vpop.permute.xlu1 %1318 }
0x1407   :  { %v1321_v22 = vadd.f32 %v1319_v21, %v1311_v20  ;;  %v1330_v26 = vpop.permute.xlu0 %1329 }
0x1408   :  { %v1332_v29 = vadd.f32 %v1330_v26, %v1322_v27 }
0x1409   :  { %1334 = vrot.lane.b32.xlu1 %v1321_v22, %s4343_s5 }
0x147b   :  { %v1335_v33 = vpop.permute.xlu1 %1334 }
0x147c   :  { %v1337_v35 = vsel %vm631_vm0, %v1335_v33, %v1332_v29 }
0x147d   :  { %4033 = vtanh.f32 %v1337_v35 }
0x1487   :  { %v4034_v36 = vpop.eup %4033 }
0x1488   :  { %1344 = vrot.lane.b32.xlu1 %v4034_v36, %s4341_s6  ;;  %1340 = vrot.lane.b32.xlu0 %v4034_v36, %s4343_s5 }
0x14fa   :  { %v1345_v37 = vpop.permute.xlu1 %1344  ;;  %v1341_v38 = vpop.permute.xlu0 %1340 }
0x14fb   :  { %v1347_v39 = vmul.f32 %v4032_v13, %v1345_v37  ;;  %v1343_v41 = vmul.f32 %v4030_v12, %v1341_v38 }
0x14fd   :  { %1354 = vrot.lane.b32.xlu1 %v1347_v39, %s4341_s6  ;;  %1349 = vrot.lane.b32.xlu0 %v1343_v41, %s4342_s1 }
0x156f   :  { %v1355_v42 = vpop.permute.xlu1 %1354  ;;  %v1350_v43 = vpop.permute.xlu0 %1349 }
0x1570   :  { %1357 = vst.msk [vmem:[#allocation2 + $0x4] sm:$0x3] %vm653_vm1, %v1355_v42  ;;  %v1358_v44 = vsel %vm631_vm0, %v1350_v43, %v1355_v42 }
0x1571   :  { %1352 = vst.msk [vmem:[#allocation2 + $0xa] sm:$0x3] %vm647_vm2, %v1350_v43  ;;  %3361 = vmatmul.mubr.msk.f32.vlgmr.msra.gmra.mrb[12].mxu0 %vm516_vm3, %v1358_v44 }
0x1572   :  { %1738 = vmatprep.mubr.f32.mxu0 %v4340_v1 }
0x1644   :  { %v1432_v46 = vpop.f32.mrb[12].mxu0 }
0x1645   :  { %v1433_v48 = vadd.f32 %v1432_v46, %v1359_v45  ;;  %v1434_v49 = vpop.f32.mrb[13].mxu0 }
0x1646   :  { %v1435_v50 = vadd.f32 %v1434_v49, %v1360_v47  ;;  %v1641_v49 = vld [vmem:[#allocation9 + $0x8] sm:$0xff] }
0x1647   :  { %4035 = vtanh.f32 %v1433_v48  ;;  %v3362_v55 = vmul.f32 -1.442695, %v1433_v48 }
0x1648   :  { %4037 = vtanh.f32 %v1435_v50  ;;  %v3363_v56 = vmul.f32 -1.442695, %v1435_v50  ;;  %v1643_v50 = vld [vmem:[#allocation9 + $0x18] sm:$0xff] }
0x1649   :  { %4039 = vpow2.f32 %v3362_v55  ;;  %v1642_v55 = vld [vmem:[#allocation9 + $0x10] sm:$0xff] }
0x164a   :  { %4041 = vpow2.f32 %v3363_v56  ;;  %v1752_v56 = vld [vmem:[#allocation10 + $0x8] sm:$0xff] }
0x1651   :  { %v4036_v53 = vpop.eup %4035 }
0x1652   :  { %v4038_v54 = vpop.eup %4037  ;;  %1453 = vrot.lane.b32.xlu0 %v4036_v53, %s4341_s6  ;;  %v1640_v53 = vld [vmem:[#allocation9] sm:$0xff] }
0x1653   :  { %1464 = vrot.lane.b32.xlu1 %v4038_v54, %s4341_s6  ;;  %v4040_v59 = vpop.eup %4039  ;;  %v3748_v54 = vpack.c.bf16 %v1643_v50, %v1641_v49 }
0x1654   :  { %v4042_v23 = vpop.eup %4041  ;;  %v1443_v57 = vadd.f32 1.0, %v4040_v59  ;;  %v1754_v59 = vld [vmem:[#allocation10 + $0x18] sm:$0xff] }
0x1655   :  { %v1444_v31 = vadd.f32 1.0, %v4042_v23  ;;  %v3750_v23 = vpack.c.bf16 %v1642_v55, %v1640_v53  ;;  %3749 = vmatprep.subr.bf16.mxu0 %v3748_v54 }
0x1656   :  { %4043 = vrcp.f32 %v1443_v57  ;;  %v5019_v57 = vpack.c.bf16 %v1754_v59, %v1752_v56 }
0x1657   :  { %4045 = vrcp.f32 %v1444_v31  ;;  %v1751_v31 = vld [vmem:[#allocation10] sm:$0xff]  ;;  %3751 = vmatpush1.bf16.msra.mxu0 %v3750_v23 }
0x1658   :  { %3765 = vmatprep.subr.bf16.mxu1 %v5019_v57 }
0x1660   :  { %v4044_v24 = vpop.eup %4043 }
0x1661   :  { %v4046_v58 = vpop.eup %4045  ;;  %v1451_v63 = vmul.f32 %v4044_v24, %v1321_v22 }
0x1662   :  { %v1462_v6 = vmul.f32 %v4046_v58, %v1332_v29 }
0x16c4   :  { %v1454_v8 = vpop.permute.xlu0 %1453 }
0x16c5   :  { %v1456_v60 = vmul.f32 %v4044_v24, %v1454_v8  ;;  %v1465_v61 = vpop.permute.xlu1 %1464  ;;  %v1645_v8 = vld [vmem:[#allocation9 + $0x28] sm:$0xff] }
0x16c6   :  { %v1467_v62 = vmul.f32 %v4046_v58, %v1465_v61  ;;  %v1644_v61 = vld [vmem:[#allocation9 + $0x20] sm:$0xff] }
0x16c7   :  { %1458 = vrot.lane.b32.xlu0 %v1456_v60, %s4342_s1  ;;  %v1647_v60 = vld [vmem:[#allocation9 + $0x38] sm:$0xff] }
0x16c8   :  { %1469 = vrot.lane.b32.xlu1 %v1467_v62, %s4342_s1  ;;  %v1646_v62 = vld [vmem:[#allocation9 + $0x30] sm:$0xff] }
0x1739   :  { %v1459_v4 = vpop.permute.xlu0 %1458 }
0x173a   :  { %v1461_v5 = vadd.f32 %v1459_v4, %v1451_v63  ;;  %v1470_v30 = vpop.permute.xlu1 %1469  ;;  %v3752_v63 = vpack.c.bf16 %v1647_v60, %v1645_v8  ;;  %v3754_v4 = vpack.c.bf16 %v1646_v62, %v1644_v61 }
0x173b   :  { %v1472_v34 = vadd.f32 %v1470_v30, %v1462_v6  ;;  %v1758_v30 = vld [vmem:[#allocation10 + $0x38] sm:$0xff]  ;;  %v1755_v6 = vld [vmem:[#allocation10 + $0x20] sm:$0xff] }
0x173c   :  { %1474 = vrot.lane.b32.xlu0 %v1461_v5, %s4343_s5  ;;  %3753 = vmatprep.subr.bf16.mxu0 %v3752_v63 }
0x173d   :  { %3755 = vmatpush1.bf16.msra.mxu0 %v3754_v4 }
0x17ae   :  { %v1475_v7 = vpop.permute.xlu0 %1474 }
0x17af   :  { %v1477_v40 = vsel %vm631_vm0, %v1475_v7, %v1472_v34  ;;  %v1757_v7 = vld [vmem:[#allocation10 + $0x30] sm:$0xff] }
0x17b0   :  { %4047 = vtanh.f32 %v1477_v40  ;;  %v5027_v40 = vpack.c.bf16 %v1757_v7, %v1755_v6 }
0x17ba   :  { %v4048_v51 = vpop.eup %4047 }
0x17bb   :  { %1484 = vrot.lane.b32.xlu0 %v4048_v51, %s4341_s6  ;;  %1480 = vrot.lane.b32.xlu1 %v4048_v51, %s4343_s5 }
0x182d   :  { %v1485_v52 = vpop.permute.xlu0 %1484  ;;  %v1481_v0 = vpop.permute.xlu1 %1480 }
0x182e   :  { %v1487_v2 = vmul.f32 %v4046_v58, %v1485_v52  ;;  %v1483_v9 = vmul.f32 %v4044_v24, %v1481_v0  ;;  %v1753_v24 = vld [vmem:[#allocation10 + $0x10] sm:$0xff]  ;;  %v1649_v52 = vld [vmem:[#allocation9 + $0x48] sm:$0xff]  ;;  %v1651_v0 = vld [vmem:[#allocation9 + $0x58] sm:$0xff] }
0x182f   :  { %v5021_v58 = vpack.c.bf16 %v1753_v24, %v1751_v31 }
0x1830   :  { %1494 = vrot.lane.b32.xlu0 %v1487_v2, %s4341_s6  ;;  %1489 = vrot.lane.b32.xlu1 %v1483_v9, %s4342_s1  ;;  %v3756_v2 = vpack.c.bf16 %v1651_v0, %v1649_v52  ;;  %v1648_v9 = vld [vmem:[#allocation9 + $0x40] sm:$0xff] }
0x1832   :  { %3757 = vmatprep.subr.bf16.mxu0 %v3756_v2 }
0x18a2   :  { %v1495_v10 = vpop.permute.xlu0 %1494  ;;  %v1490_v11 = vpop.permute.xlu1 %1489 }
0x18a3   :  { %1497 = vst.msk [vmem:[#allocation2 + $0x2] sm:$0x3] %vm653_vm1, %v1495_v10  ;;  %v1498_v12 = vsel %vm631_vm0, %v1490_v11, %v1495_v10  ;;  %v1650_v10 = vld [vmem:[#allocation9 + $0x50] sm:$0xff] }
0x18a4   :  { %1492 = vst.msk [vmem:[#allocation2 + $0xc] sm:$0x3] %vm647_vm2, %v1490_v11  ;;  %3364 = vmatmul.mubr.msk.f32.vlgmr.msra.gmra.mrb[12].mxu1 %vm516_vm3, %v1498_v12  ;;  %v1760_v11 = vld [vmem:[#allocation10 + $0x48] sm:$0xff]  ;;  %v3758_v12 = vpack.c.bf16 %v1650_v10, %v1648_v9 }
0x18a5   :  { %1834 = vmatprep.mubr.f32.mxu1 %v4340_v1  ;;  %3767 = vmatpush1.bf16.msra.mxu1 %v5021_v58 }
0x18a6   :  { %3759 = vmatpush1.bf16.msra.mxu0 %v3758_v12 }
0x1977   :  { %v1572_v13 = vpop.f32.mrb[12].mxu1 }
0x1978   :  { %v1573_v18 = vadd.f32 %v1572_v13, %v1499_v32  ;;  %v1574_v19 = vpop.f32.mrb[13].mxu1  ;;  %v1762_v32 = vld [vmem:[#allocation10 + $0x58] sm:$0xff]  ;;  %v1759_v13 = vld [vmem:[#allocation10 + $0x40] sm:$0xff] }
0x1979   :  { %v1575_v20 = vadd.f32 %v1574_v19, %v1500_v16  ;;  %v1761_v16 = vld [vmem:[#allocation10 + $0x50] sm:$0xff] }
0x197a   :  { %4049 = vtanh.f32 %v1573_v18  ;;  %v3365_v26 = vmul.f32 -1.442695, %v1573_v18  ;;  %v5033_v18 = vpack.c.bf16 %v1762_v32, %v1760_v11  ;;  %v5035_v19 = vpack.c.bf16 %v1761_v16, %v1759_v13 }
0x197b   :  { %4051 = vtanh.f32 %v1575_v20  ;;  %v3366_v27 = vmul.f32 -1.442695, %v1575_v20  ;;  %v1653_v20 = vld [vmem:[#allocation9 + $0x68] sm:$0xff] }
0x197c   :  { %4053 = vpow2.f32 %v3365_v26 }
0x197d   :  { %4055 = vpow2.f32 %v3366_v27  ;;  %v1654_v27 = vld [vmem:[#allocation9 + $0x70] sm:$0xff] }
0x1984   :  { %v4050_v21 = vpop.eup %4049 }
0x1985   :  { %v4052_v22 = vpop.eup %4051  ;;  %1593 = vrot.lane.b32.xlu1 %v4050_v21, %s4341_s6  ;;  %v1655_v21 = vld [vmem:[#allocation9 + $0x78] sm:$0xff] }
0x1986   :  { %1604 = vrot.lane.b32.xlu0 %v4052_v22, %s4341_s6  ;;  %v4054_v28 = vpop.eup %4053  ;;  %v1652_v22 = vld [vmem:[#allocation9 + $0x60] sm:$0xff]  ;;  %v3760_v26 = vpack.c.bf16 %v1655_v21, %v1653_v20 }
0x1987   :  { %v4056_v29 = vpop.eup %4055  ;;  %v1583_v33 = vadd.f32 1.0, %v4054_v28  ;;  %v1764_v28 = vld [vmem:[#allocation10 + $0x68] sm:$0xff] }
0x1988   :  { %v1584_v25 = vadd.f32 1.0, %v4056_v29  ;;  %v1766_v29 = vld [vmem:[#allocation10 + $0x78] sm:$0xff]  ;;  %3761 = vmatprep.subr.bf16.mxu0 %v3760_v26 }
0x1989   :  { %4057 = vrcp.f32 %v1583_v33  ;;  %v3762_v33 = vpack.c.bf16 %v1654_v27, %v1652_v22 }
0x198a   :  { %4059 = vrcp.f32 %v1584_v25  ;;  %v5038_v25 = vpack.c.bf16 %v1766_v29, %v1764_v28 }
0x198b   :  { %3763 = vmatpush1.bf16.msra.mxu0 %v3762_v33 }
0x198c   :  { %3781 = vmatprep.subr.bf16.mxu0 %v5019_v57 }
0x1993   :  { %v5007_v3 = vpop.eup %4057 }
0x1994   :  { %v5009_v36 = vpop.eup %4059  ;;  %v1591_v41 = vmul.f32 %v5007_v3, %v1461_v5  ;;  %v1756_v5 = vld [vmem:[#allocation10 + $0x28] sm:$0xff] }
0x1995   :  { %v1602_v45 = vmul.f32 %v5009_v36, %v1472_v34  ;;  %v5025_v34 = vpack.c.bf16 %v1758_v30, %v1756_v5 }
0x1997   :  { %3769 = vmatprep.subr.bf16.mxu1 %v5025_v34 }
0x1998   :  { %3771 = vmatpush1.bf16.msra.mxu1 %v5027_v40 }
0x1999   :  { %3773 = vmatprep.subr.bf16.mxu1 %v5033_v18 }
0x199c   :  { %3775 = vmatpush1.bf16.msra.mxu1 %v5035_v19 }
0x199d   :  { %3777 = vmatprep.subr.bf16.mxu1 %v5038_v25 }
0x19f7   :  { %v1594_v35 = vpop.permute.xlu1 %1593 }
0x19f8   :  { %v1596_v37 = vmul.f32 %v5007_v3, %v1594_v35  ;;  %v1605_v38 = vpop.permute.xlu0 %1604  ;;  %v1763_v35 = vld [vmem:[#allocation10 + $0x60] sm:$0xff] }
0x19f9   :  { %v1607_v39 = vmul.f32 %v5009_v36, %v1605_v38 }
0x19fa   :  { %1598 = vrot.lane.b32.xlu1 %v1596_v37, %s4342_s1  ;;  %v1765_v37 = vld [vmem:[#allocation10 + $0x70] sm:$0xff] }
0x19fb   :  { %1609 = vrot.lane.b32.xlu0 %v1607_v39, %s4342_s1  ;;  %v5041_v38 = vpack.c.bf16 %v1765_v37, %v1763_v35 }
0x19fd   :  { %3779 = vmatpush1.bf16.msra.mxu1 %v5041_v38 }
0x19fe   :  { %3797 = vmatprep.subr.bf16.mxu1 %v5019_v57 }
0x1a00   :  { %1835 = vmatmul.mubr.f32.vlgmr.msra.gmra.mrb[14].mxu1 %v4340_v1 }
0x1a01   :  { %3799 = vmatpush1.bf16.msra.mxu1 %v5021_v58  ;;  %2116 = vmatprep.mubr.f32.mxu1 %v4340_v1 }
0x1a02   :  { %3801 = vmatprep.subr.bf16.mxu1 %v5025_v34 }
0x1a05   :  { %3803 = vmatpush1.bf16.msra.mxu1 %v5027_v40 }
0x1a06   :  { %3805 = vmatprep.subr.bf16.mxu1 %v5033_v18 }
0x1a09   :  { %3807 = vmatpush1.bf16.msra.mxu1 %v5035_v19 }
0x1a0a   :  { %3809 = vmatprep.subr.bf16.mxu1 %v5038_v25 }
0x1a0d   :  { %3811 = vmatpush1.bf16.msra.mxu1 %v5041_v38 }
0x1a0e   :  { %3829 = vmatprep.subr.bf16.mxu1 %v5019_v57 }
0x1a6c   :  { %v1599_v42 = vpop.permute.xlu1 %1598 }
0x1a6d   :  { %v1601_v43 = vadd.f32 %v1599_v42, %v1591_v41  ;;  %v1610_v44 = vpop.permute.xlu0 %1609 }
0x1a6e   :  { %v1612_v46 = vadd.f32 %v1610_v44, %v1602_v45 }
0x1a6f   :  { %1614 = vrot.lane.b32.xlu1 %v1601_v43, %s4343_s5 }
0x1ae1   :  { %v1615_v47 = vpop.permute.xlu1 %1614 }
0x1ae2   :  { %v1617_v48 = vsel %vm631_vm0, %v1615_v47, %v1612_v46  ;;  %v1836_v46 = vpop.f32.mrb[14].mxu1 }
0x1ae3   :  { %4061 = vtanh.f32 %v1617_v48  ;;  %v1838_v47 = vpop.f32.mrb[15].mxu1  ;;  %v1656_v48 = vld [vmem:[%s5434_s9] sm:$0x3] }
0x1ae4   :  { %v1661_v49 = vrot.slane %v1656_v48, %v4744_v15  ;;  %v1665_v50 = vrot.slane %v1656_v48, %v4750_v17 }
0x1aed   :  { %v4062_v51 = vpop.eup %4061 }
0x1aee   :  { %1620 = vrot.lane.b32.xlu1 %v4062_v51, %s4343_s5  ;;  %1624 = vrot.lane.b32.xlu0 %v4062_v51, %s4341_s6 }
0x1b60   :  { %v1621_v39 = vpop.permute.xlu1 %1620  ;;  %v1625_v41 = vpop.permute.xlu0 %1624 }
0x1b61   :  { %v1623_v42 = vmul.f32 %v5007_v3, %v1621_v39  ;;  %v1627_v43 = vmul.f32 %v5009_v36, %v1625_v41 }
0x1b63   :  { %1629 = vrot.lane.b32.xlu1 %v1623_v42, %s4342_s1  ;;  %1634 = vrot.lane.b32.xlu0 %v1627_v43, %s4341_s6 }
0x1bd5   :  { %v1630_v3 = vpop.permute.xlu1 %1629  ;;  %v1635_v36 = vpop.permute.xlu0 %1634 }
0x1bd6   :  { %1632 = vst.msk [vmem:[#allocation2 + $0xe] sm:$0x3] %vm647_vm2, %v1630_v3 }
0x1bd7   :  { %1637 = vst.msk [vmem:[#allocation2] sm:$0x3] %vm653_vm1, %v1635_v36 }
0x1bdd   :  { %v1639_v45 = vld [vmem:[#allocation2 + $0x8] sm:$0xff] }
0x1bde   :  { %v1638_v44 = vld [vmem:[#allocation2] sm:$0xff] }
0x1bdf   :  { %3367 = vmatmul.mubr.msk.f32.vlgmr.msra.gmra.mrb[14].mxu0 %vm516_vm3, %v1638_v44 }
0x1be0   :  { %1744 = vmatprep.mubr.f32.mxu0 %v4340_v1  ;;  %3783 = vmatpush1.bf16.msra.mxu0 %v5021_v58 }
0x1be1   :  { %3785 = vmatprep.subr.bf16.mxu0 %v5025_v34 }
0x1be3   :  { %3368 = vmatmul.mubr.msk.f32.gmra.mrb[16].mxu0 %vm516_vm3, %v1639_v45 }
0x1be4   :  { %3787 = vmatpush1.bf16.msra.mxu0 %v5027_v40  ;;  %1976 = vmatprep.mubr.f32.mxu0 %v4340_v1 }
0x1be5   :  { %3789 = vmatprep.subr.bf16.mxu0 %v5033_v18 }
0x1be8   :  { %3791 = vmatpush1.bf16.msra.mxu0 %v5035_v19 }
0x1be9   :  { %3793 = vmatprep.subr.bf16.mxu0 %v5038_v25 }
0x1bec   :  { %3795 = vmatpush1.bf16.msra.mxu0 %v5041_v38 }
0x1bed   :  { %3813 = vmatprep.subr.bf16.mxu0 %v5019_v57 }
0x1cb2   :  { %v1740_v53 = vpop.f32.mrb[14].mxu0 }
0x1cb3   :  { %v5080_v54 = vadd.f32 %v1740_v53, %v1661_v49  ;;  %v1742_v55 = vpop.f32.mrb[15].mxu0 }
0x1cb4   :  { %v5082_v56 = vadd.f32 %v1742_v55, %v1665_v50 }
0x1cb5   :  { %v1837_v59 = vadd.f32 %v1836_v46, %v5080_v54  ;;  %v1905_v41 = vrot.slane %v5080_v54, 2 }
0x1cb6   :  { %v1746_v23 = vpop.f32.mrb[16].mxu0 }
0x1cb7   :  { %4063 = vtanh.f32 %v1837_v59  ;;  %v5085_v31 = vadd.f32 %v1746_v23, %v1661_v49  ;;  %v1748_v24 = vpop.f32.mrb[17].mxu0  ;;  %v3369_v62 = vmul.f32 -1.442695, %v1837_v59 }
0x1cb8   :  { %v5087_v8 = vadd.f32 %v1748_v24, %v1665_v50 }
0x1cba   :  { %v1768_v60 = vrot.slane %v5087_v8, 6  ;;  %v1903_v39 = vrot.slane %v5087_v8, 2 }
0x1cbc   :  { %v1839_v15 = vadd.f32 %v1838_v47, %v1768_v60  ;;  %v1906_v43 = vrot.slane %v1903_v39, 2 }
0x1cbe   :  { %4065 = vtanh.f32 %v1839_v15  ;;  %v3370_v63 = vmul.f32 -1.442695, %v1839_v15 }
0x1cbf   :  { %4067 = vpow2.f32 %v3369_v62 }
0x1cc0   :  { %4069 = vpow2.f32 %v3370_v63 }
0x1cc1   :  { %v4064_v17 = vpop.eup %4063 }
0x1cc2   :  { %1857 = vrot.lane.b32.xlu0 %v4064_v17, %s4341_s6 }
0x1cc8   :  { %v4066_v61 = vpop.eup %4065 }
0x1cc9   :  { %1868 = vrot.lane.b32.xlu1 %v4066_v61, %s4341_s6  ;;  %v4068_v4 = vpop.eup %4067 }
0x1cca   :  { %v1847_v5 = vadd.f32 1.0, %v4068_v4  ;;  %v4070_v30 = vpop.eup %4069 }
0x1ccb   :  { %v1848_v6 = vadd.f32 1.0, %v4070_v30 }
0x1ccc   :  { %4071 = vrcp.f32 %v1847_v5 }
0x1ccd   :  { %4073 = vrcp.f32 %v1848_v6 }
0x1cd6   :  { %v4072_v7 = vpop.eup %4071 }
0x1cd7   :  { %v4074_v0 = vpop.eup %4073  ;;  %v1855_v10 = vmul.f32 0.0, %v4072_v7 }
0x1cd8   :  { %v1866_v13 = vmul.f32 0.0, %v4074_v0 }
0x1d34   :  { %v1858_v51 = vpop.permute.xlu0 %1857 }
0x1d35   :  { %v1860_v52 = vmul.f32 %v4072_v7, %v1858_v51 }
0x1d37   :  { %1862 = vrot.lane.b32.xlu0 %v1860_v52, %s4342_s1 }
0x1d3b   :  { %v1869_v2 = vpop.permute.xlu1 %1868 }
0x1d3c   :  { %v1871_v9 = vmul.f32 %v4074_v0, %v1869_v2 }
0x1d3e   :  { %1873 = vrot.lane.b32.xlu1 %v1871_v9, %s4342_s1 }
0x1da9   :  { %v1863_v11 = vpop.permute.xlu0 %1862 }
0x1daa   :  { %v5096_v12 = vadd.f32 %v1863_v11, %v1855_v10 }
0x1dac   :  { %1878 = vrot.lane.b32.xlu0 %v5096_v12, %s4343_s5 }
0x1db0   :  { %v1874_v32 = vpop.permute.xlu1 %1873 }
0x1db1   :  { %v5100_v16 = vadd.f32 %v1874_v32, %v1866_v13  ;;  %v2045_v13 = vrot.slane %v5080_v54, 4 }
0x1e1e   :  { %v1879_v20 = vpop.permute.xlu0 %1878 }
0x1e1f   :  { %v1881_v21 = vsel %vm631_vm0, %v1879_v20, %v5100_v16  ;;  %v2046_v20 = vrot.slane %v1768_v60, 4 }
0x1e20   :  { %4075 = vtanh.f32 %v1881_v21 }
0x1e2a   :  { %v4076_v22 = vpop.eup %4075 }
0x1e2b   :  { %1888 = vrot.lane.b32.xlu0 %v4076_v22, %s4341_s6  ;;  %1884 = vrot.lane.b32.xlu1 %v4076_v22, %s4343_s5 }
0x1e9d   :  { %v1889_v26 = vpop.permute.xlu0 %1888  ;;  %v1885_v27 = vpop.permute.xlu1 %1884 }
0x1e9e   :  { %v1891_v28 = vmul.f32 %v4074_v0, %v1889_v26  ;;  %v1887_v29 = vmul.f32 %v4072_v7, %v1885_v27 }
0x1ea0   :  { %1898 = vrot.lane.b32.xlu0 %v1891_v28, %s4341_s6  ;;  %1893 = vrot.lane.b32.xlu1 %v1887_v29, %s4342_s1 }
0x1f12   :  { %v1899_v33 = vpop.permute.xlu0 %1898  ;;  %v1894_v35 = vpop.permute.xlu1 %1893 }
0x1f13   :  { %1901 = vst.msk [vmem:[#allocation2 + $0xe] sm:$0x3] %vm653_vm1, %v1899_v33  ;;  %v1902_v37 = vsel %vm631_vm0, %v1894_v35, %v1899_v33 }
0x1f14   :  { %1896 = vst.msk [vmem:[#allocation2] sm:$0x3] %vm647_vm2, %v1894_v35  ;;  %3371 = vmatmul.mubr.msk.f32.vlgmr.msra.gmra.mrb[18].mxu0 %vm516_vm3, %v1902_v37 }
0x1f15   :  { %3815 = vmatpush1.bf16.msra.mxu0 %v5021_v58  ;;  %2256 = vmatprep.mubr.f32.mxu0 %v4340_v1 }
0x1f16   :  { %3817 = vmatprep.subr.bf16.mxu0 %v5025_v34 }
0x1f19   :  { %3819 = vmatpush1.bf16.msra.mxu0 %v5027_v40 }
0x1f1a   :  { %3821 = vmatprep.subr.bf16.mxu0 %v5033_v18 }
0x1f1d   :  { %3823 = vmatpush1.bf16.msra.mxu0 %v5035_v19 }
0x1f1e   :  { %3825 = vmatprep.subr.bf16.mxu0 %v5038_v25 }
0x1f21   :  { %3827 = vmatpush1.bf16.msra.mxu0 %v5041_v38 }
0x1f22   :  { %3845 = vmatprep.subr.bf16.mxu0 %v5019_v57 }
0x1fe7   :  { %v1978_v42 = vpop.f32.mrb[18].mxu0 }
0x1fe8   :  { %v1979_v3 = vadd.f32 %v1978_v42, %v1905_v41  ;;  %v1980_v36 = vpop.f32.mrb[19].mxu0 }
0x1fe9   :  { %v1981_v44 = vadd.f32 %v1980_v36, %v1906_v43 }
0x1fea   :  { %4077 = vtanh.f32 %v1979_v3  ;;  %v3372_v47 = vmul.f32 -1.442695, %v1979_v3 }
0x1feb   :  { %4079 = vtanh.f32 %v1981_v44  ;;  %v3373_v48 = vmul.f32 -1.442695, %v1981_v44 }
0x1fec   :  { %4081 = vpow2.f32 %v3372_v47 }
0x1fed   :  { %4083 = vpow2.f32 %v3373_v48 }
0x1ff4   :  { %v4078_v45 = vpop.eup %4077 }
0x1ff5   :  { %v4080_v46 = vpop.eup %4079  ;;  %1999 = vrot.lane.b32.xlu1 %v4078_v45, %s4341_s6 }
0x1ff6   :  { %2010 = vrot.lane.b32.xlu0 %v4080_v46, %s4341_s6  ;;  %v4082_v49 = vpop.eup %4081 }
0x1ff7   :  { %v4084_v50 = vpop.eup %4083  ;;  %v1989_v53 = vadd.f32 1.0, %v4082_v49 }
0x1ff8   :  { %v1990_v55 = vadd.f32 1.0, %v4084_v50 }
0x1ff9   :  { %4085 = vrcp.f32 %v1989_v53 }
0x1ffa   :  { %4087 = vrcp.f32 %v1990_v55 }
0x2003   :  { %v4086_v59 = vpop.eup %4085 }
0x2004   :  { %v4088_v24 = vpop.eup %4087  ;;  %v1997_v62 = vmul.f32 %v4086_v59, %v5096_v12 }
0x2005   :  { %v2008_v30 = vmul.f32 %v4088_v24, %v5100_v16 }
0x2067   :  { %v2000_v23 = vpop.permute.xlu1 %1999 }
0x2068   :  { %v2002_v15 = vmul.f32 %v4086_v59, %v2000_v23  ;;  %v2011_v17 = vpop.permute.xlu0 %2010 }
0x2069   :  { %v2013_v61 = vmul.f32 %v4088_v24, %v2011_v17 }
0x206a   :  { %2004 = vrot.lane.b32.xlu1 %v2002_v15, %s4342_s1 }
0x206b   :  { %2015 = vrot.lane.b32.xlu0 %v2013_v61, %s4342_s1 }
0x20dc   :  { %v2005_v63 = vpop.permute.xlu1 %2004 }
0x20dd   :  { %v2007_v4 = vadd.f32 %v2005_v63, %v1997_v62  ;;  %v2016_v5 = vpop.permute.xlu0 %2015 }
0x20de   :  { %v5132_v6 = vadd.f32 %v2016_v5, %v2008_v30  ;;  %v2185_v5 = vrot.slane %v5080_v54, 6 }
0x20df   :  { %2020 = vrot.lane.b32.xlu1 %v2007_v4, %s4343_s5 }
0x2151   :  { %v2021_v7 = vpop.permute.xlu1 %2020 }
0x2152   :  { %v2023_v51 = vsel %vm631_vm0, %v2021_v7, %v5132_v6 }
0x2153   :  { %4089 = vtanh.f32 %v2023_v51 }
0x215d   :  { %v4090_v52 = vpop.eup %4089 }
0x215e   :  { %2030 = vrot.lane.b32.xlu1 %v4090_v52, %s4341_s6  ;;  %2026 = vrot.lane.b32.xlu0 %v4090_v52, %s4343_s5 }
0x21d0   :  { %v2031_v0 = vpop.permute.xlu1 %2030  ;;  %v2027_v2 = vpop.permute.xlu0 %2026 }
0x21d1   :  { %v2033_v9 = vmul.f32 %v4088_v24, %v2031_v0  ;;  %v2029_v10 = vmul.f32 %v4086_v59, %v2027_v2 }
0x21d3   :  { %2040 = vrot.lane.b32.xlu1 %v2033_v9, %s4341_s6  ;;  %2035 = vrot.lane.b32.xlu0 %v2029_v10, %s4342_s1 }
0x2245   :  { %v2041_v11 = vpop.permute.xlu1 %2040  ;;  %v2036_v12 = vpop.permute.xlu0 %2035 }
0x2246   :  { %2043 = vst.msk [vmem:[#allocation2 + $0xc] sm:$0x3] %vm653_vm1, %v2041_v11  ;;  %v2044_v32 = vsel %vm631_vm0, %v2036_v12, %v2041_v11 }
0x2247   :  { %2038 = vst.msk [vmem:[#allocation2 + $0x2] sm:$0x3] %vm647_vm2, %v2036_v12  ;;  %3374 = vmatmul.mubr.msk.f32.vlgmr.msra.gmra.mrb[16].mxu1 %vm516_vm3, %v2044_v32 }
0x2248   :  { %3831 = vmatpush1.bf16.msra.mxu1 %v5021_v58  ;;  %2395 = vmatprep.mubr.f32.mxu1 %v4340_v1 }
0x2249   :  { %3833 = vmatprep.subr.bf16.mxu1 %v5025_v34 }
0x224c   :  { %3835 = vmatpush1.bf16.msra.mxu1 %v5027_v40 }
0x224d   :  { %3837 = vmatprep.subr.bf16.mxu1 %v5033_v18 }
0x2250   :  { %3839 = vmatpush1.bf16.msra.mxu1 %v5035_v19 }
0x2251   :  { %3841 = vmatprep.subr.bf16.mxu1 %v5038_v25 }
0x2254   :  { %3843 = vmatpush1.bf16.msra.mxu1 %v5041_v38 }
0x2255   :  { %3861 = vmatprep.subr.bf16.mxu1 %v5019_v57 }
0x231a   :  { %v2118_v16 = vpop.f32.mrb[16].mxu1 }
0x231b   :  { %v2119_v21 = vadd.f32 %v2118_v16, %v2045_v13  ;;  %v2120_v22 = vpop.f32.mrb[17].mxu1 }
0x231c   :  { %v2121_v26 = vadd.f32 %v2120_v22, %v2046_v20 }
0x231d   :  { %4091 = vtanh.f32 %v2119_v21  ;;  %v3375_v29 = vmul.f32 -1.442695, %v2119_v21 }
0x231e   :  { %4093 = vtanh.f32 %v2121_v26  ;;  %v3376_v33 = vmul.f32 -1.442695, %v2121_v26 }
0x231f   :  { %4095 = vpow2.f32 %v3375_v29 }
0x2320   :  { %4097 = vpow2.f32 %v3376_v33 }
0x2327   :  { %v4092_v27 = vpop.eup %4091 }
0x2328   :  { %v4094_v28 = vpop.eup %4093  ;;  %2139 = vrot.lane.b32.xlu0 %v4092_v27, %s4341_s6 }
0x2329   :  { %2150 = vrot.lane.b32.xlu1 %v4094_v28, %s4341_s6  ;;  %v4096_v35 = vpop.eup %4095 }
0x232a   :  { %v4098_v37 = vpop.eup %4097  ;;  %v2129_v41 = vadd.f32 1.0, %v4096_v35 }
0x232b   :  { %v2130_v42 = vadd.f32 1.0, %v4098_v37 }
0x232c   :  { %4099 = vrcp.f32 %v2129_v41 }
0x232d   :  { %4101 = vrcp.f32 %v2130_v42 }
0x2336   :  { %v4100_v60 = vpop.eup %4099 }
0x2337   :  { %v4102_v3 = vpop.eup %4101  ;;  %v2137_v46 = vmul.f32 %v4100_v60, %v2007_v4 }
0x2338   :  { %v2148_v50 = vmul.f32 %v4102_v3, %v5132_v6  ;;  %v2186_v6 = vrot.slane %v1903_v39, 6 }
0x239a   :  { %v2140_v43 = vpop.permute.xlu0 %2139 }
0x239b   :  { %v2142_v36 = vmul.f32 %v4100_v60, %v2140_v43  ;;  %v2151_v44 = vpop.permute.xlu1 %2150 }
0x239c   :  { %v2153_v45 = vmul.f32 %v4102_v3, %v2151_v44 }
0x239d   :  { %2144 = vrot.lane.b32.xlu0 %v2142_v36, %s4342_s1 }
0x239e   :  { %2155 = vrot.lane.b32.xlu1 %v2153_v45, %s4342_s1 }
0x240f   :  { %v2145_v47 = vpop.permute.xlu0 %2144 }
0x2410   :  { %v2147_v48 = vadd.f32 %v2145_v47, %v2137_v46  ;;  %v2156_v49 = vpop.permute.xlu1 %2155  ;;  %v2326_v46 = vrot.slane %v5082_v56, 6 }
0x2411   :  { %v5162_v53 = vadd.f32 %v2156_v49, %v2148_v50 }
0x2412   :  { %2160 = vrot.lane.b32.xlu0 %v2147_v48, %s4343_s5 }
0x2484   :  { %v2161_v55 = vpop.permute.xlu0 %2160 }
0x2485   :  { %v2163_v59 = vsel %vm631_vm0, %v2161_v55, %v5162_v53 }
0x2486   :  { %4103 = vtanh.f32 %v2163_v59 }
0x2490   :  { %v4104_v23 = vpop.eup %4103 }
0x2491   :  { %2170 = vrot.lane.b32.xlu0 %v4104_v23, %s4341_s6  ;;  %2166 = vrot.lane.b32.xlu1 %v4104_v23, %s4343_s5 }
0x2503   :  { %v2171_v24 = vpop.permute.xlu0 %2170  ;;  %v2167_v15 = vpop.permute.xlu1 %2166 }
0x2504   :  { %v2173_v17 = vmul.f32 %v4102_v3, %v2171_v24  ;;  %v2169_v61 = vmul.f32 %v4100_v60, %v2167_v15 }
0x2506   :  { %2180 = vrot.lane.b32.xlu0 %v2173_v17, %s4341_s6  ;;  %2175 = vrot.lane.b32.xlu1 %v2169_v61, %s4342_s1 }
0x2578   :  { %v2181_v62 = vpop.permute.xlu0 %2180  ;;  %v2176_v63 = vpop.permute.xlu1 %2175 }
0x2579   :  { %2183 = vst.msk [vmem:[#allocation2 + $0xa] sm:$0x3] %vm653_vm1, %v2181_v62  ;;  %v2184_v4 = vsel %vm631_vm0, %v2176_v63, %v2181_v62 }
0x257a   :  { %2178 = vst.msk [vmem:[#allocation2 + $0x4] sm:$0x3] %vm647_vm2, %v2176_v63  ;;  %3377 = vmatmul.mubr.msk.f32.vlgmr.msra.gmra.mrb[20].mxu0 %vm516_vm3, %v2184_v4 }
0x257b   :  { %3847 = vmatpush1.bf16.msra.mxu0 %v5021_v58  ;;  %2537 = vmatprep.mubr.f32.mxu0 %v4340_v1 }
0x257c   :  { %3849 = vmatprep.subr.bf16.mxu0 %v5025_v34 }
0x257f   :  { %3851 = vmatpush1.bf16.msra.mxu0 %v5027_v40 }
0x2580   :  { %3853 = vmatprep.subr.bf16.mxu0 %v5033_v18 }
0x2583   :  { %3855 = vmatpush1.bf16.msra.mxu0 %v5035_v19 }
0x2584   :  { %3857 = vmatprep.subr.bf16.mxu0 %v5038_v25 }
0x2587   :  { %3859 = vmatpush1.bf16.msra.mxu0 %v5041_v38 }
0x2588   :  { %3877 = vmatprep.subr.bf16.mxu0 %v5019_v57 }
0x264d   :  { %v2258_v30 = vpop.f32.mrb[20].mxu0 }
0x264e   :  { %v2259_v7 = vadd.f32 %v2258_v30, %v2185_v5  ;;  %v2260_v51 = vpop.f32.mrb[21].mxu0 }
0x264f   :  { %v2261_v52 = vadd.f32 %v2260_v51, %v2186_v6 }
0x2650   :  { %4105 = vtanh.f32 %v2259_v7  ;;  %v3378_v9 = vmul.f32 -1.442695, %v2259_v7 }
0x2651   :  { %4107 = vtanh.f32 %v2261_v52  ;;  %v3379_v10 = vmul.f32 -1.442695, %v2261_v52 }
0x2652   :  { %4109 = vpow2.f32 %v3378_v9 }
0x2653   :  { %4111 = vpow2.f32 %v3379_v10 }
0x265a   :  { %v4106_v0 = vpop.eup %4105 }
0x265b   :  { %v4108_v2 = vpop.eup %4107  ;;  %2279 = vrot.lane.b32.xlu1 %v4106_v0, %s4341_s6 }
0x265c   :  { %2290 = vrot.lane.b32.xlu0 %v4108_v2, %s4341_s6  ;;  %v4110_v57 = vpop.eup %4109 }
0x265d   :  { %v4112_v54 = vpop.eup %4111  ;;  %v2269_v11 = vadd.f32 1.0, %v4110_v57 }
0x265e   :  { %v2270_v8 = vadd.f32 1.0, %v4112_v54 }
0x265f   :  { %4113 = vrcp.f32 %v2269_v11 }
0x2660   :  { %4115 = vrcp.f32 %v2270_v8 }
0x2669   :  { %v4114_v39 = vpop.eup %4113 }
0x266a   :  { %v4116_v32 = vpop.eup %4115  ;;  %v2277_v21 = vmul.f32 %v4114_v39, %v2147_v48 }
0x266b   :  { %v2288_v28 = vmul.f32 %v4116_v32, %v5162_v53 }
0x26cd   :  { %v2280_v12 = vpop.permute.xlu1 %2279 }
0x26ce   :  { %v2282_v13 = vmul.f32 %v4114_v39, %v2280_v12  ;;  %v2291_v16 = vpop.permute.xlu0 %2290 }
0x26cf   :  { %v2293_v20 = vmul.f32 %v4116_v32, %v2291_v16  ;;  %v2464_v16 = vrot.slane %v5082_v56, 2 }
0x26d0   :  { %2284 = vrot.lane.b32.xlu1 %v2282_v13, %s4342_s1 }
0x26d1   :  { %2295 = vrot.lane.b32.xlu0 %v2293_v20, %s4342_s1  ;;  %v2466_v20 = vrot.slane %v5085_v31, 2 }
0x2742   :  { %v2285_v22 = vpop.permute.xlu1 %2284 }
0x2743   :  { %v2287_v26 = vadd.f32 %v2285_v22, %v2277_v21  ;;  %v2296_v27 = vpop.permute.xlu0 %2295 }
0x2744   :  { %v2298_v29 = vadd.f32 %v2296_v27, %v2288_v28 }
0x2745   :  { %2300 = vrot.lane.b32.xlu1 %v2287_v26, %s4343_s5 }
0x27b7   :  { %v2301_v33 = vpop.permute.xlu1 %2300 }
0x27b8   :  { %v2303_v35 = vsel %vm631_vm0, %v2301_v33, %v2298_v29 }
0x27b9   :  { %4117 = vtanh.f32 %v2303_v35 }
0x27c3   :  { %v4118_v37 = vpop.eup %4117 }
0x27c4   :  { %2310 = vrot.lane.b32.xlu1 %v4118_v37, %s4341_s6  ;;  %2306 = vrot.lane.b32.xlu0 %v4118_v37, %s4343_s5 }
0x2836   :  { %v2311_v41 = vpop.permute.xlu1 %2310  ;;  %v2307_v42 = vpop.permute.xlu0 %2306 }
0x2837   :  { %v2313_v60 = vmul.f32 %v4116_v32, %v2311_v41  ;;  %v2309_v43 = vmul.f32 %v4114_v39, %v2307_v42 }
0x2839   :  { %2320 = vrot.lane.b32.xlu1 %v2313_v60, %s4341_s6  ;;  %2315 = vrot.lane.b32.xlu0 %v2309_v43, %s4342_s1 }
0x28ab   :  { %v2321_v3 = vpop.permute.xlu1 %2320  ;;  %v2316_v36 = vpop.permute.xlu0 %2315 }
0x28ac   :  { %2323 = vst.msk [vmem:[#allocation2 + $0x8] sm:$0x3] %vm653_vm1, %v2321_v3  ;;  %v2324_v44 = vsel %vm631_vm0, %v2316_v36, %v2321_v3 }
0x28ad   :  { %2318 = vst.msk [vmem:[#allocation2 + $0x6] sm:$0x3] %vm647_vm2, %v2316_v36  ;;  %3380 = vmatmul.mubr.msk.f32.vlgmr.msra.gmra.mrb[18].mxu1 %vm516_vm3, %v2324_v44 }
0x28ae   :  { %3863 = vmatpush1.bf16.msra.mxu1 %v5021_v58  ;;  %2677 = vmatprep.mubr.f32.mxu1 %v4340_v1 }
0x28af   :  { %3865 = vmatprep.subr.bf16.mxu1 %v5025_v34 }
0x28b2   :  { %3867 = vmatpush1.bf16.msra.mxu1 %v5027_v40 }
0x28b3   :  { %3869 = vmatprep.subr.bf16.mxu1 %v5033_v18 }
0x28b6   :  { %3871 = vmatpush1.bf16.msra.mxu1 %v5035_v19 }
0x28b7   :  { %3873 = vmatprep.subr.bf16.mxu1 %v5038_v25 }
0x28ba   :  { %3875 = vmatpush1.bf16.msra.mxu1 %v5041_v38 }
0x2980   :  { %v2397_v45 = vpop.f32.mrb[18].mxu1 }
0x2981   :  { %v2398_v47 = vadd.f32 %v2397_v45, %v5085_v31  ;;  %v2399_v48 = vpop.f32.mrb[19].mxu1 }
0x2982   :  { %v2400_v49 = vadd.f32 %v2399_v48, %v2326_v46 }
0x2983   :  { %4119 = vtanh.f32 %v2398_v47  ;;  %v3381_v55 = vmul.f32 -1.442695, %v2398_v47 }
0x2984   :  { %4121 = vtanh.f32 %v2400_v49  ;;  %v3382_v59 = vmul.f32 -1.442695, %v2400_v49 }
0x2985   :  { %4123 = vpow2.f32 %v3381_v55 }
0x2986   :  { %4125 = vpow2.f32 %v3382_v59 }
0x298d   :  { %v4120_v50 = vpop.eup %4119 }
0x298e   :  { %v4122_v53 = vpop.eup %4121  ;;  %2418 = vrot.lane.b32.xlu0 %v4120_v50, %s4341_s6 }
0x298f   :  { %2429 = vrot.lane.b32.xlu1 %v4122_v53, %s4341_s6  ;;  %v4124_v23 = vpop.eup %4123 }
0x2990   :  { %v4126_v24 = vpop.eup %4125  ;;  %v2408_v15 = vadd.f32 1.0, %v4124_v23 }
0x2991   :  { %v2409_v17 = vadd.f32 1.0, %v4126_v24 }
0x2992   :  { %4127 = vrcp.f32 %v2408_v15 }
0x2993   :  { %4129 = vrcp.f32 %v2409_v17 }
0x299c   :  { %v4128_v61 = vpop.eup %4127 }
0x299d   :  { %v4130_v63 = vpop.eup %4129  ;;  %v2416_v6 = vmul.f32 %v4128_v61, %v2287_v26 }
0x299e   :  { %v2427_v0 = vmul.f32 %v4130_v63, %v2298_v29 }
0x2a00   :  { %v2419_v62 = vpop.permute.xlu0 %2418 }
0x2a01   :  { %v2421_v4 = vmul.f32 %v4128_v61, %v2419_v62  ;;  %v2430_v5 = vpop.permute.xlu1 %2429 }
0x2a02   :  { %v2432_v30 = vmul.f32 %v4130_v63, %v2430_v5 }
0x2a03   :  { %2423 = vrot.lane.b32.xlu0 %v2421_v4, %s4342_s1 }
0x2a04   :  { %2434 = vrot.lane.b32.xlu1 %v2432_v30, %s4342_s1 }
0x2a75   :  { %v2424_v7 = vpop.permute.xlu0 %2423 }
0x2a76   :  { %v2426_v51 = vadd.f32 %v2424_v7, %v2416_v6  ;;  %v2435_v52 = vpop.permute.xlu1 %2434 }
0x2a77   :  { %v5218_v2 = vadd.f32 %v2435_v52, %v2427_v0 }
0x2a78   :  { %2439 = vrot.lane.b32.xlu0 %v2426_v51, %s4343_s5 }
0x2aea   :  { %v2440_v9 = vpop.permute.xlu0 %2439 }
0x2aeb   :  { %v2442_v10 = vsel %vm631_vm0, %v2440_v9, %v5218_v2 }
0x2aec   :  { %4131 = vtanh.f32 %v2442_v10 }
0x2af6   :  { %v4132_v57 = vpop.eup %4131 }
0x2af7   :  { %2449 = vrot.lane.b32.xlu0 %v4132_v57, %s4341_s6  ;;  %2445 = vrot.lane.b32.xlu1 %v4132_v57, %s4343_s5 }
0x2b69   :  { %v2450_v54 = vpop.permute.xlu0 %2449  ;;  %v2446_v11 = vpop.permute.xlu1 %2445 }
0x2b6a   :  { %v2452_v8 = vmul.f32 %v4130_v63, %v2450_v54  ;;  %v2448_v39 = vmul.f32 %v4128_v61, %v2446_v11  ;;  %v2606_v61 = vrot.slane %v5085_v31, 4  ;;  %v2607_v63 = vrot.slane %v2326_v46, 4 }
0x2b6c   :  { %2459 = vrot.lane.b32.xlu0 %v2452_v8, %s4341_s6  ;;  %2454 = vrot.lane.b32.xlu1 %v2448_v39, %s4342_s1 }
0x2bde   :  { %v2460_v12 = vpop.permute.xlu0 %2459  ;;  %v2455_v32 = vpop.permute.xlu1 %2454 }
0x2bdf   :  { %2462 = vst.msk [vmem:[#allocation2 + $0x6] sm:$0x3] %vm653_vm1, %v2460_v12  ;;  %v2463_v13 = vsel %vm631_vm0, %v2455_v32, %v2460_v12 }
0x2be0   :  { %2457 = vst.msk [vmem:[#allocation2 + $0x8] sm:$0x3] %vm647_vm2, %v2455_v32  ;;  %3383 = vmatmul.mubr.msk.f32.vlgmr.msra.gmra.mrb[22].mxu0 %vm516_vm3, %v2463_v13 }
0x2be1   :  { %3879 = vmatpush1.bf16.msra.mxu0 %v5021_v58  ;;  %2817 = vmatprep.mubr.f32.mxu0 %v4340_v1  ;;  %v2467_v58 = vrot.slane %v2464_v16, 2 }
0x2be2   :  { %3881 = vmatprep.subr.bf16.mxu0 %v5025_v34 }
0x2be5   :  { %3883 = vmatpush1.bf16.msra.mxu0 %v5027_v40 }
0x2be6   :  { %3885 = vmatprep.subr.bf16.mxu0 %v5033_v18 }
0x2be9   :  { %3887 = vmatpush1.bf16.msra.mxu0 %v5035_v19 }
0x2bea   :  { %3889 = vmatprep.subr.bf16.mxu0 %v5038_v25 }
0x2bed   :  { %3891 = vmatpush1.bf16.msra.mxu0 %v5041_v38 }
0x2cb3   :  { %v2539_v21 = vpop.f32.mrb[22].mxu0 }
0x2cb4   :  { %v2540_v22 = vadd.f32 %v2539_v21, %v2466_v20  ;;  %v2541_v34 = vpop.f32.mrb[23].mxu0 }
0x2cb5   :  { %v2542_v26 = vadd.f32 %v2541_v34, %v2467_v58 }
0x2cb6   :  { %4133 = vtanh.f32 %v2540_v22  ;;  %v3384_v19 = vmul.f32 -1.442695, %v2540_v22 }
0x2cb7   :  { %4135 = vtanh.f32 %v2542_v26  ;;  %v3385_v25 = vmul.f32 -1.442695, %v2542_v26 }
0x2cb8   :  { %4137 = vpow2.f32 %v3384_v19 }
0x2cb9   :  { %4139 = vpow2.f32 %v3385_v25 }
0x2cc0   :  { %v4134_v40 = vpop.eup %4133 }
0x2cc1   :  { %v4136_v18 = vpop.eup %4135  ;;  %2560 = vrot.lane.b32.xlu1 %v4134_v40, %s4341_s6 }
0x2cc2   :  { %2571 = vrot.lane.b32.xlu0 %v4136_v18, %s4341_s6  ;;  %v4138_v38 = vpop.eup %4137 }
0x2cc3   :  { %v4140_v27 = vpop.eup %4139  ;;  %v2550_v28 = vadd.f32 1.0, %v4138_v38 }
0x2cc4   :  { %v2551_v29 = vadd.f32 1.0, %v4140_v27 }
0x2cc5   :  { %4141 = vrcp.f32 %v2550_v28 }
0x2cc6   :  { %4143 = vrcp.f32 %v2551_v29  ;;  %v2746_v29 = vrot.slane %v5085_v31, 6 }
0x2ccf   :  { %v4142_v33 = vpop.eup %4141 }
0x2cd0   :  { %v4144_v37 = vpop.eup %4143  ;;  %v2558_v43 = vmul.f32 %v4142_v33, %v2426_v51 }
0x2cd1   :  { %v2569_v45 = vmul.f32 %v4144_v37, %v5218_v2 }
0x2d33   :  { %v2561_v35 = vpop.permute.xlu1 %2560 }
0x2d34   :  { %v2563_v41 = vmul.f32 %v4142_v33, %v2561_v35  ;;  %v2572_v42 = vpop.permute.xlu0 %2571  ;;  %v2747_v35 = vrot.slane %v2464_v16, 6 }
0x2d35   :  { %v2574_v60 = vmul.f32 %v4144_v37, %v2572_v42 }
0x2d36   :  { %2565 = vrot.lane.b32.xlu1 %v2563_v41, %s4342_s1 }
0x2d37   :  { %2576 = vrot.lane.b32.xlu0 %v2574_v60, %s4342_s1 }
0x2da8   :  { %v2566_v3 = vpop.permute.xlu1 %2565 }
0x2da9   :  { %v2568_v36 = vadd.f32 %v2566_v3, %v2558_v43  ;;  %v2577_v44 = vpop.permute.xlu0 %2576 }
0x2daa   :  { %v2579_v47 = vadd.f32 %v2577_v44, %v2569_v45 }
0x2dab   :  { %2581 = vrot.lane.b32.xlu1 %v2568_v36, %s4343_s5 }
0x2e1d   :  { %v2582_v48 = vpop.permute.xlu1 %2581 }
0x2e1e   :  { %v2584_v49 = vsel %vm631_vm0, %v2582_v48, %v2579_v47 }
0x2e1f   :  { %4145 = vtanh.f32 %v2584_v49 }
0x2e29   :  { %v4146_v50 = vpop.eup %4145 }
0x2e2a   :  { %2591 = vrot.lane.b32.xlu1 %v4146_v50, %s4341_s6  ;;  %2587 = vrot.lane.b32.xlu0 %v4146_v50, %s4343_s5 }
0x2e9c   :  { %v2592_v53 = vpop.permute.xlu1 %2591  ;;  %v2588_v55 = vpop.permute.xlu0 %2587 }
0x2e9d   :  { %v2594_v59 = vmul.f32 %v4144_v37, %v2592_v53  ;;  %v2590_v23 = vmul.f32 %v4142_v33, %v2588_v55 }
0x2e9f   :  { %2601 = vrot.lane.b32.xlu1 %v2594_v59, %s4341_s6  ;;  %2596 = vrot.lane.b32.xlu0 %v2590_v23, %s4342_s1 }
0x2f11   :  { %v2602_v24 = vpop.permute.xlu1 %2601  ;;  %v2597_v15 = vpop.permute.xlu0 %2596 }
0x2f12   :  { %2604 = vst.msk [vmem:[#allocation2 + $0x4] sm:$0x3] %vm653_vm1, %v2602_v24  ;;  %v2605_v17 = vsel %vm631_vm0, %v2597_v15, %v2602_v24 }
0x2f13   :  { %2599 = vst.msk [vmem:[#allocation2 + $0xa] sm:$0x3] %vm647_vm2, %v2597_v15  ;;  %3386 = vmatmul.mubr.msk.f32.vlgmr.msra.gmra.mrb[20].mxu1 %vm516_vm3, %v2605_v17 }
0x2fe6   :  { %v2679_v62 = vpop.f32.mrb[20].mxu1 }
0x2fe7   :  { %v2680_v4 = vadd.f32 %v2679_v62, %v2606_v61  ;;  %v2681_v5 = vpop.f32.mrb[21].mxu1 }
0x2fe8   :  { %v2682_v30 = vadd.f32 %v2681_v5, %v2607_v63  ;;  %v2887_v63 = vld [vmem:[%s5436_s11] sm:$0xff]  ;;  %v2889_v5 = vld [vmem:[%s5436_s11 + $0x10] sm:$0xff] }
0x2fe9   :  { %4147 = vtanh.f32 %v2680_v4  ;;  %v3387_v51 = vmul.f32 -1.442695, %v2680_v4  ;;  %v2888_v4 = vld [vmem:[%s5436_s11 + $0x8] sm:$0xff] }
0x2fea   :  { %4149 = vtanh.f32 %v2682_v30  ;;  %v3388_v52 = vmul.f32 -1.442695, %v2682_v30  ;;  %v3892_v30 = vpack.c.bf16 %v2888_v4, %v2887_v63 }
0x2feb   :  { %4151 = vpow2.f32 %v3387_v51 }
0x2fec   :  { %4153 = vpow2.f32 %v3388_v52  ;;  %3893 = vmatprep.subr.bf16.mxu1 %v3892_v30  ;;  %v2891_v52 = vld [vmem:[%s5436_s11 + $0x20] sm:$0xff] }
0x2fed   :  { %3895 = vmatpush3.bf16.msra.mxu1 %v3892_v30 }
0x2ff3   :  { %v4148_v6 = vpop.eup %4147 }
0x2ff4   :  { %v4150_v7 = vpop.eup %4149  ;;  %2700 = vrot.lane.b32.xlu0 %v4148_v6, %s4341_s6  ;;  %v2890_v6 = vld [vmem:[%s5436_s11 + $0x18] sm:$0xff] }
0x2ff5   :  { %2711 = vrot.lane.b32.xlu1 %v4150_v7, %s4341_s6  ;;  %v4152_v0 = vpop.eup %4151  ;;  %v3896_v7 = vpack.c.bf16 %v2890_v6, %v2889_v5 }
0x2ff6   :  { %v4154_v2 = vpop.eup %4153  ;;  %v2690_v9 = vadd.f32 1.0, %v4152_v0  ;;  %v2892_v0 = vld [vmem:[%s5436_s11 + $0x28] sm:$0xff] }
0x2ff7   :  { %v2691_v10 = vadd.f32 1.0, %v4154_v2  ;;  %3897 = vmatprep.subr.bf16.mxu1 %v3896_v7  ;;  %v3900_v2 = vpack.c.bf16 %v2892_v0, %v2891_v52 }
0x2ff8   :  { %4155 = vrcp.f32 %v2690_v9  ;;  %3899 = vmatpush3.bf16.msra.mxu1 %v3896_v7  ;;  %v2893_v9 = vld [vmem:[%s5436_s11 + $0x30] sm:$0xff] }
0x2ff9   :  { %4157 = vrcp.f32 %v2691_v10  ;;  %v2894_v10 = vld [vmem:[%s5436_s11 + $0x38] sm:$0xff]  ;;  %3901 = vmatprep.subr.bf16.mxu1 %v3900_v2 }
0x2ffc   :  { %3903 = vmatpush3.bf16.msra.mxu1 %v3900_v2 }
0x3002   :  { %v4156_v46 = vpop.eup %4155 }
0x3003   :  { %v4158_v54 = vpop.eup %4157  ;;  %v2698_v12 = vmul.f32 %v4156_v46, %v2568_v36 }
0x3004   :  { %v2709_v21 = vmul.f32 %v4158_v54, %v2579_v47 }
0x3066   :  { %v2701_v57 = vpop.permute.xlu0 %2700 }
0x3067   :  { %v2703_v11 = vmul.f32 %v4156_v46, %v2701_v57  ;;  %v2712_v8 = vpop.permute.xlu1 %2711 }
0x3068   :  { %v2714_v39 = vmul.f32 %v4158_v54, %v2712_v8 }
0x3069   :  { %2705 = vrot.lane.b32.xlu0 %v2703_v11, %s4342_s1 }
0x306a   :  { %2716 = vrot.lane.b32.xlu1 %v2714_v39, %s4342_s1 }
0x30db   :  { %v2706_v32 = vpop.permute.xlu0 %2705 }
0x30dc   :  { %v2708_v13 = vadd.f32 %v2706_v32, %v2698_v12  ;;  %v2717_v20 = vpop.permute.xlu1 %2716 }
0x30dd   :  { %v2719_v58 = vadd.f32 %v2717_v20, %v2709_v21  ;;  %v3392_v20 = vld [vmem:[%s5437_s12] ss:$0 sm:$0xff] }
0x30de   :  { %2721 = vrot.lane.b32.xlu0 %v2708_v13, %s4343_s5 }
0x3150   :  { %v2722_v22 = vpop.permute.xlu0 %2721 }
0x3151   :  { %v2724_v34 = vsel %vm631_vm0, %v2722_v22, %v2719_v58 }
0x3152   :  { %4159 = vtanh.f32 %v2724_v34 }
0x315c   :  { %v4160_v26 = vpop.eup %4159 }
0x315d   :  { %2731 = vrot.lane.b32.xlu0 %v4160_v26, %s4341_s6  ;;  %2727 = vrot.lane.b32.xlu1 %v4160_v26, %s4343_s5  ;;  %v3395_v26 = vld [vmem:[%s5438_s13] ss:$0 sm:$0xff] }
0x31cf   :  { %v2732_v40 = vpop.permute.xlu0 %2731  ;;  %v2728_v18 = vpop.permute.xlu1 %2727 }
0x31d0   :  { %v2734_v19 = vmul.f32 %v4158_v54, %v2732_v40  ;;  %v2730_v25 = vmul.f32 %v4156_v46, %v2728_v18  ;;  %v3904_v46 = vpack.c.bf16 %v2894_v10, %v2893_v9 }
0x31d2   :  { %2741 = vrot.lane.b32.xlu0 %v2734_v19, %s4341_s6  ;;  %2736 = vrot.lane.b32.xlu1 %v2730_v25, %s4342_s1 }
0x31d3   :  { %3905 = vmatprep.subr.bf16.mxu1 %v3904_v46 }
0x31d4   :  { %3907 = vmatpush3.bf16.msra.mxu1 %v3904_v46 }
0x3244   :  { %v2742_v38 = vpop.permute.xlu0 %2741  ;;  %v2737_v27 = vpop.permute.xlu1 %2736 }
0x3245   :  { %2744 = vst.msk [vmem:[#allocation2 + $0x2] sm:$0x3] %vm653_vm1, %v2742_v38  ;;  %v2745_v28 = vsel %vm631_vm0, %v2737_v27, %v2742_v38 }
0x3246   :  { %2739 = vst.msk [vmem:[#allocation2 + $0xc] sm:$0x3] %vm647_vm2, %v2737_v27  ;;  %3389 = vmatmul.mubr.msk.f32.vlgmr.msra.gmra.mrb[24].mxu0 %vm516_vm3, %v2745_v28  ;;  %v4344_v28 = vmov 0  }
0x3247   :  { %3950 = vset.pattern.permute.xlu1 %v4344_v28  ;;  %3949 = vset.pattern.permute.xlu0 %v4344_v28 }
0x3248   :  { %3502 = vmatprep.mubr.msk.f32.mxu0 %vm4346_vm9, %v4340_v1 }
0x3319   :  { %v2819_v33 = vpop.f32.mrb[24].mxu0 }
0x331a   :  { %v2820_v37 = vadd.f32 %v2819_v33, %v2746_v29  ;;  %v2821_v41 = vpop.f32.mrb[25].mxu0  ;;  %v3011_v29 = vadd.s32 8, %v4741_v14 }
0x331b   :  { %v2822_v42 = vadd.f32 %v2821_v41, %v2747_v35  ;;  %v3016_v35 = vand.u32 1, %v4741_v14 }
0x331c   :  { %4161 = vtanh.f32 %v2820_v37  ;;  %v3390_v3 = vmul.f32 -1.442695, %v2820_v37  ;;  %v3023_v33 = vand.u32 1, %v3011_v29  ;;  %v3396_v37 = vld [vmem:[#allocation3] ss:$0 sm:$0xff] }
0x331d   :  { %4163 = vtanh.f32 %v2822_v42  ;;  %v3391_v36 = vmul.f32 -1.442695, %v2822_v42  ;;  %vm5339_vm7 = vcmp.eq.s32.totalorder %v3016_v35, 0  ;;  %vm5343_vm8 = vcmp.eq.s32.totalorder %v3016_v35, 1 }
0x331e   :  { %4165 = vpow2.f32 %v3390_v3  ;;  %vm5331_vm4 = vcmp.eq.s32.totalorder %v3023_v33, 0  ;;  %vm5335_vm5 = vcmp.eq.s32.totalorder %v3023_v33, 1 }
0x331f   :  { %4167 = vpow2.f32 %v3391_v36 }
0x3326   :  { %v4162_v60 = vpop.eup %4161 }
0x3327   :  { %v4164_v43 = vpop.eup %4163  ;;  %2840 = vrot.lane.b32.xlu1 %v4162_v60, %s4341_s6 }
0x3328   :  { %2851 = vrot.lane.b32.xlu0 %v4164_v43, %s4341_s6  ;;  %v4166_v31 = vpop.eup %4165 }
0x3329   :  { %v4168_v44 = vpop.eup %4167  ;;  %v2830_v45 = vadd.f32 1.0, %v4166_v31 }
0x332a   :  { %v2831_v56 = vadd.f32 1.0, %v4168_v44 }
0x332b   :  { %4169 = vrcp.f32 %v2830_v45 }
0x332c   :  { %4171 = vrcp.f32 %v2831_v56 }
0x3335   :  { %v4170_v16 = vpop.eup %4169 }
0x3336   :  { %v4172_v48 = vpop.eup %4171  ;;  %v2838_v55 = vmul.f32 %v4170_v16, %v2708_v13 }
0x3337   :  { %v2849_v15 = vmul.f32 %v4172_v48, %v2719_v58 }
0x3399   :  { %v2841_v47 = vpop.permute.xlu1 %2840 }
0x339a   :  { %v2843_v49 = vmul.f32 %v4170_v16, %v2841_v47  ;;  %v2852_v50 = vpop.permute.xlu0 %2851 }
0x339b   :  { %v2854_v53 = vmul.f32 %v4172_v48, %v2852_v50 }
0x339c   :  { %2845 = vrot.lane.b32.xlu1 %v2843_v49, %s4342_s1 }
0x339d   :  { %2856 = vrot.lane.b32.xlu0 %v2854_v53, %s4342_s1 }
0x340e   :  { %v2846_v59 = vpop.permute.xlu1 %2845 }
0x340f   :  { %v2848_v23 = vadd.f32 %v2846_v59, %v2838_v55  ;;  %v2857_v24 = vpop.permute.xlu0 %2856 }
0x3410   :  { %v2859_v17 = vadd.f32 %v2857_v24, %v2849_v15 }
0x3411   :  { %2861 = vrot.lane.b32.xlu1 %v2848_v23, %s4343_s5 }
0x3483   :  { %v2862_v61 = vpop.permute.xlu1 %2861 }
0x3484   :  { %v2864_v62 = vsel %vm631_vm0, %v2862_v61, %v2859_v17 }
0x3485   :  { %4173 = vtanh.f32 %v2864_v62 }
0x348f   :  { %v4174_v51 = vpop.eup %4173 }
0x3490   :  { %2867 = vrot.lane.b32.xlu1 %v4174_v51, %s4343_s5  ;;  %2871 = vrot.lane.b32.xlu0 %v4174_v51, %s4341_s6 }
0x3502   :  { %v2868_v57 = vpop.permute.xlu1 %2867  ;;  %v2872_v54 = vpop.permute.xlu0 %2871 }
0x3503   :  { %v2870_v11 = vmul.f32 %v4170_v16, %v2868_v57  ;;  %v2874_v8 = vmul.f32 %v4172_v48, %v2872_v54 }
0x3505   :  { %2876 = vrot.lane.b32.xlu1 %v2870_v11, %s4342_s1  ;;  %2881 = vrot.lane.b32.xlu0 %v2874_v8, %s4341_s6 }
0x3577   :  { %v2877_v39 = vpop.permute.xlu1 %2876  ;;  %v2882_v12 = vpop.permute.xlu0 %2881 }
0x3578   :  { %2879 = vst.msk [vmem:[#allocation2 + $0xe] sm:$0x3] %vm647_vm2, %v2877_v39 }
0x3579   :  { %2884 = vst.msk [vmem:[#allocation2] sm:$0x3] %vm653_vm1, %v2882_v12 }
0x357f   :  { %v5315_v13 = vld [vmem:[#allocation2 + $0x8] sm:$0xff] }
0x3580   :  { %v5313_v32 = vld [vmem:[#allocation2] sm:$0xff] }
0x3581   :  { %3483 = vmatprep.mubr.msk.f32.mxu1 %vm516_vm3, %v5313_v32 }
0x3582   :  { %3484 = vmatmul.mubr.msk.f32.vlgmr.msra.gmra.mrb[22].mxu1 %vm516_vm3, %v5315_v13 }
0x3583   :  { %3521 = vmatprep.mubr.msk.f32.mxu1 %vm4346_vm9, %v4340_v1 }
0x3655   :  { %v3485_v21 = vpop.f32.mrb[22].mxu1 }
0x3656   :  { %v2980_v58 = vadd.f32 %v3485_v21, %v3392_v20  ;;  %v2974_v22 = vpop.f32.mrb[23].mxu1 }
0x3657   :  { %v2975_v34 = vadd.f32 %v3392_v20, %v2974_v22 }
0x3658   :  { %4175 = vtanh.f32 %v2980_v58 }
0x3659   :  { %4177 = vtanh.f32 %v2975_v34 }
0x3662   :  { %v4176_v40 = vpop.eup %4175 }
0x3663   :  { %v4178_v18 = vpop.eup %4177  ;;  %v2993_v19 = vmul.f32 %v4176_v40, %v3395_v26 }
0x3664   :  { %v2992_v25 = vmul.f32 %v4178_v18, %v3395_v26 }
0x3665   :  { %v2997_v38 = vsel %vm631_vm0, %v2993_v19, 0.0 }
0x3666   :  { %2998 = vadd.xlane.f32.xlu1 %v2997_v38  ;;  %v2994_v27 = vsel %vm631_vm0, %v2992_v25, 0.0 }
0x3667   :  { %2995 = vadd.xlane.f32.xlu0 %v2994_v27 }
0x36f3   :  { %v2999_v60 = vpop.xlane.xlu1 %2998 }
0x36f4   :  { %v3008_v43 = vadd.f32 %v3396_v37, %v2999_v60  ;;  %v2996_v14 = vpop.xlane.xlu0 %2995 }
0x36f5   :  { %v3007_v31 = vadd.f32 %v3396_v37, %v2996_v14 }
0x36f6   :  { %v3039_v44 = vsel %vm5331_vm4, %v3008_v43, -inf  ;;  %v3094_v45 = vsel %vm5335_vm5, %v3008_v43, -inf }
0x36f7   :  { %v3042_v56 = vsel %vm3040_vm6, %v3039_v44, -inf  ;;  %v3096_v16 = vsel %vm3040_vm6, %v3094_v45, -inf  ;;  %v3038_v47 = vsel %vm5339_vm7, %v3007_v31, -inf  ;;  %v3093_v48 = vsel %vm5343_vm8, %v3007_v31, -inf  ;;  %v3147_v45 = vld [vmem:[#allocation12] sm:$0xff] }
0x36f8   :  { %v3041_v49 = vsel %vm3040_vm6, %v3038_v47, -inf  ;;  %v3095_v50 = vsel %vm3040_vm6, %v3093_v48, -inf  ;;  %v4345_v47 = vmov 0.0|0.0   ;;  %v3149_v48 = vld [vmem:[#allocation12 + $0x10] sm:$0xff] }
0x36f9   :  { %v3043_v53 = vmax.f32 %v3041_v49, %v3042_v56  ;;  %v3097_v55 = vmax.f32 %v3095_v50, %v3096_v16  ;;  %v3148_v56 = vld [vmem:[#allocation12 + $0x8] sm:$0xff]  ;;  %3908 = vmatprep.subr.bf16.mxu0 %v4345_v47  ;;  %3920 = vmatprep.subr.bf16.mxu1 %v4345_v47  ;;  %v3150_v49 = vld [vmem:[#allocation12 + $0x18] sm:$0xff] }
0x36fa   :  { %v3909_v16 = vpack.c.bf16 %v3148_v56, %v3147_v45  ;;  %v3912_v50 = vpack.c.bf16 %v3150_v49, %v3149_v48 }
0x36fb   :  { %v3044_v59 = vrot.slane %v3043_v53, 4  ;;  %v3098_v23 = vrot.slane %v3097_v55, 4 }
0x36fc   :  { %3910 = vmatpush3.bf16.msra.mxu0 %v3909_v16 }
0x36fd   :  { %v3045_v24 = vmax.f32 %v3043_v53, %v3044_v59  ;;  %v3099_v15 = vmax.f32 %v3097_v55, %v3098_v23  ;;  %3911 = vmatprep.subr.bf16.mxu0 %v4345_v47  ;;  %v3151_v53 = vld [vmem:[#allocation12 + $0x20] sm:$0xff]  ;;  %v3152_v55 = vld [vmem:[#allocation12 + $0x28] sm:$0xff]  ;;  %v3153_v23 = vld [vmem:[#allocation12 + $0x30] sm:$0xff] }
0x36fe   :  { %v3915_v59 = vpack.c.bf16 %v3152_v55, %v3151_v53 }
0x36ff   :  { %v3046_v17 = vrot.slane %v3045_v24, 2  ;;  %v3100_v61 = vrot.slane %v3099_v15, 2 }
0x3700   :  { %3913 = vmatpush3.bf16.msra.mxu0 %v3912_v50 }
0x3701   :  { %v3047_v62 = vmax.f32 %v3045_v24, %v3046_v17  ;;  %v3101_v63 = vmax.f32 %v3099_v15, %v3100_v61  ;;  %3914 = vmatprep.subr.bf16.mxu0 %v4345_v47  ;;  %v3154_v24 = vld [vmem:[#allocation12 + $0x38] sm:$0xff]  ;;  %v3236_v17 = vld [vmem:[%s5442_s17] sm:$0xff] }
0x3702   :  { %v3918_v15 = vpack.c.bf16 %v3154_v24, %v3153_v23  ;;  %v3237_v61 = vld [vmem:[%s5442_s17 + $0x8] sm:$0xff] }
0x3703   :  { %v3048_v4 = vrot.slane %v3047_v62, 1  ;;  %v3102_v5 = vrot.slane %v3101_v63, 1 }
0x3704   :  { %3916 = vmatpush3.bf16.msra.mxu0 %v3915_v59 }
0x3705   :  { %v3049_v30 = vmax.f32 %v3047_v62, %v3048_v4  ;;  %v3103_v6 = vmax.f32 %v3101_v63, %v3102_v5  ;;  %3917 = vmatprep.subr.bf16.mxu0 %v4345_v47  ;;  %v3238_v62 = vld [vmem:[%s5442_s17 + $0x10] sm:$0xff]  ;;  %v3921_v63 = vpack.c.bf16 %v3237_v61, %v3236_v17  ;;  %v3239_v4 = vld [vmem:[%s5442_s17 + $0x18] sm:$0xff]  ;;  %v3240_v5 = vld [vmem:[%s5442_s17 + $0x20] sm:$0xff] }
0x3706   :  { %v3924_v1 = vpack.c.bf16 %v3239_v4, %v3238_v62 }
0x3707   :  { %v3050_v7 = vsub.f32 %v3007_v31, %v3049_v30  ;;  %v3051_v51 = vsub.f32 %v3008_v43, %v3049_v30  ;;  %v3104_v52 = vsub.f32 %v3007_v31, %v3103_v6  ;;  %v3105_v0 = vsub.f32 %v3008_v43, %v3103_v6  ;;  %3922 = vmatpush3.bf16.msra.mxu1 %v3921_v63  ;;  %v3241_v30 = vld [vmem:[%s5442_s17 + $0x28] sm:$0xff] }
0x3708   :  { %3919 = vmatpush3.bf16.msra.mxu0 %v3918_v15  ;;  %3923 = vmatprep.subr.bf16.mxu1 %v4345_v47  ;;  %v3927_v6 = vpack.c.bf16 %v3241_v30, %v3240_v5 }
0x3709   :  { %v3052_v2 = vsel %vm5339_vm7, %v3050_v7, -inf  ;;  %v3053_v9 = vsel %vm5331_vm4, %v3051_v51, -inf  ;;  %v3106_v10 = vsel %vm5343_vm8, %v3104_v52, -inf  ;;  %v3107_v46 = vsel %vm5335_vm5, %v3105_v0, -inf }
0x370a   :  { %v3054_v57 = vmul.f32 1.442695, %v3052_v2  ;;  %v3056_v54 = vmul.f32 1.442695, %v3053_v9  ;;  %v3108_v11 = vmul.f32 1.442695, %v3106_v10 }
0x370b   :  { %v3110_v8 = vmul.f32 1.442695, %v3107_v46  ;;  %3925 = vmatpush3.bf16.msra.mxu1 %v3924_v1 }
0x370c   :  { %4179 = vpow2.f32 %v3054_v57  ;;  %3926 = vmatprep.subr.bf16.mxu1 %v4345_v47 }
0x370d   :  { %4181 = vpow2.f32 %v3056_v54 }
0x370e   :  { %4183 = vpow2.f32 %v3108_v11 }
0x370f   :  { %4185 = vpow2.f32 %v3110_v8  ;;  %3928 = vmatpush3.bf16.msra.mxu1 %v3927_v6 }
0x3710   :  { %3929 = vmatprep.subr.bf16.mxu1 %v4345_v47 }
0x3716   :  { %v4180_v39 = vpop.eup %4179 }
0x3717   :  { %v4182_v12 = vpop.eup %4181  ;;  %v3058_v20 = vsel %vm3040_vm6, %v4180_v39, 0.0 }
0x3718   :  { %v4184_v21 = vpop.eup %4183  ;;  %v3059_v58 = vsel %vm3040_vm6, %v4182_v12, 0.0 }
0x3719   :  { %v4186_v22 = vpop.eup %4185  ;;  %v3060_v34 = vadd.f32 %v3059_v58, %v3058_v20  ;;  %v3112_v26 = vsel %vm3040_vm6, %v4184_v21, 0.0 }
0x371a   :  { %v3113_v40 = vsel %vm3040_vm6, %v4186_v22, 0.0 }
0x371b   :  { %v3114_v18 = vadd.f32 %v3113_v40, %v3112_v26  ;;  %v3061_v19 = vrot.slane %v3060_v34, 4 }
0x371d   :  { %v3062_v25 = vadd.f32 %v3061_v19, %v3060_v34  ;;  %v3115_v38 = vrot.slane %v3114_v18, 4 }
0x371f   :  { %v3063_v27 = vrot.slane %v3062_v25, 2  ;;  %v3116_v28 = vadd.f32 %v3115_v38, %v3114_v18 }
0x3721   :  { %v3064_v29 = vadd.f32 %v3063_v27, %v3062_v25  ;;  %v3117_v33 = vrot.slane %v3116_v28, 2 }
0x3723   :  { %v3065_v35 = vrot.slane %v3064_v29, 1  ;;  %v3118_v37 = vadd.f32 %v3117_v33, %v3116_v28  ;;  %v3243_v28 = vld [vmem:[%s5442_s17 + $0x38] sm:$0xff]  ;;  %v3397_v33 = vld [vmem:[%s5441_s16] ss:$0 sm:$0xff] }
0x3725   :  { %v3066_v41 = vadd.f32 %v3065_v35, %v3064_v29  ;;  %v3119_v42 = vrot.slane %v3118_v37, 1 }
0x3727   :  { %4187 = vrcp.f32 %v3066_v41  ;;  %v3120_v60 = vadd.f32 %v3119_v42, %v3118_v37 }
0x3729   :  { %4189 = vrcp.f32 %v3120_v60  ;;  %v3399_v60 = vld [vmem:[%s5443_s18] ss:$0 sm:$0xff] }
0x3731   :  { %v4188_v43 = vpop.eup %4187 }
0x3732   :  { %v3069_v3 = vmul.f32 %v4188_v43, %v4182_v12  ;;  %v3068_v36 = vmul.f32 %v4188_v43, %v4180_v39 }
0x3733   :  { %v4190_v14 = vpop.eup %4189 }
0x3734   :  { %3077 = vperm.xlu1 %3950, %v3069_v3   ;;  %3072 = vperm.xlu0 %3949, %v3068_v36   ;;  %v3122_v31 = vmul.f32 %v4190_v14, %v4184_v21  ;;  %v3123_v44 = vmul.f32 %v4190_v14, %v4186_v22 }
0x3738   :  { %3126 = vperm.xlu1 %3950, %v3122_v31  }
0x373c   :  { %3131 = vperm.xlu1 %3950, %v3123_v44  }
0x37b3   :  { %v3078_v7 = vpop.permute.xlu1 %3077  ;;  %v3073_v51 = vpop.permute.xlu0 %3072 }
0x37b4   :  { %v3081_v52 = vmul.f32 %v3078_v7, %v5315_v13  ;;  %v3080_v0 = vmul.f32 %v3073_v51, %v5313_v32 }
0x37b6   :  { %v3083_v2 = vsel %vm516_vm3, %v3081_v52, 0.0  ;;  %v3082_v9 = vsel %vm516_vm3, %v3080_v0, 0.0 }
0x37b7   :  { %v3084_v10 = vadd.f32 %v3083_v2, %v3082_v9  ;;  %v3127_v46 = vpop.permute.xlu1 %3126 }
0x37b8   :  { %v3134_v54 = vmul.f32 %v3127_v46, %v5313_v32 }
0x37b9   :  { %v3085_v57 = vrot.slane %v3084_v10, 4 }
0x37ba   :  { %v3136_v12 = vsel %vm516_vm3, %v3134_v54, 0.0 }
0x37bb   :  { %v3086_v11 = vadd.f32 %v3085_v57, %v3084_v10  ;;  %v3132_v8 = vpop.permute.xlu1 %3131 }
0x37bc   :  { %v3135_v39 = vmul.f32 %v3132_v8, %v5315_v13  ;;  %v3242_v13 = vld [vmem:[%s5442_s17 + $0x30] sm:$0xff]  ;;  %s4301_s17 = scalar_lea.vmem %s3333_s28, 32 }
0x37bd   :  { %v3087_v21 = vrot.slane %v3086_v11, 2  ;;  %v3930_v29 = vpack.c.bf16 %v3243_v28, %v3242_v13  ;;  %p4302_p12 = scmp.ne.s32.totalorder %s3333_s28, %s4301_s17  ;;  %p4307_p0 = scmp.lt.s32.totalorder %s4301_s17, %s4301_s17 }
0x37be   :  { %v3137_v20 = vsel %vm516_vm3, %v3135_v39, 0.0 }
0x37bf   :  { %v3138_v58 = vadd.f32 %v3137_v20, %v3136_v12  ;;  %v3088_v34 = vadd.f32 %v3087_v21, %v3086_v11  ;;  %3931 = vmatpush3.bf16.msra.mxu1 %v3930_v29  ;;  %p4308_p1 = por %p4307_p0, %p4306_p13 }
0x37c1   :  { %v3139_v22 = vrot.slane %v3138_v58, 4  ;;  %v3089_v18 = vrot.slane %v3088_v34, 1  ;;  %p4309_p2 = pnand %p4308_p1, %p4302_p12 }
0x37c3   :  { %v3140_v26 = vadd.f32 %v3139_v22, %v3138_v58  ;;  %v3090_v38 = vadd.f32 %v3089_v18, %v3088_v34 }
0x37c5   :  { %v3141_v40 = vrot.slane %v3140_v26, 2 }
0x37c7   :  { %v3142_v19 = vadd.f32 %v3141_v40, %v3140_v26 }
0x37c9   :  { %v3143_v25 = vrot.slane %v3142_v19, 1 }
0x37cb   :  { %v3144_v32 = vadd.f32 %v3143_v25, %v3142_v19 }
0x37cd   :  { %v3146_v27 = vsel %vm3145_vm10, %v3090_v38, %v3144_v32 }
0x37ce   :  { %3503 = vmatmul.mubr.msk.f32.vlgmr.msra.gmra.mrb[26].mxu0 %vm516_vm3, %v3146_v27 }
0x38a1   :  { %v3231_v35 = vpop.f32.mrb[26].mxu0 }
0x38a2   :  { %v3232_v37 = vadd.f32 %v3397_v33, %v3231_v35  ;;  %v3504_v41 = vpop.f32.mrb[27].mxu0 }
0x38a4   :  { %v3235_v42 = vmax.f32 %v3232_v37, 0.0 }
0x38a6   :  { %3522 = vmatmul.mubr.msk.f32.vlgmr.msra.gmra.mrb[24].mxu1 %vm516_vm3, %v3235_v42 }
0x3979   :  { %v3320_v43 = vpop.f32.mrb[24].mxu1 }
0x397a   :  { %v3321_v3 = vadd.f32 %v3399_v60, %v3320_v43  ;;  %v3523_v36 = vpop.f32.mrb[25].mxu1 }
0x397c   :  { %3325 = vst.msk [vmem:[#allocation13] sm:$0x3] %vm3324_vm11, %v3321_v3 }
0x397d   :  { %4312 = shalt.err (!%p4309_p2)
}
0x397e   :  { %s4313_s11 = scalar_lea.hbm %s5444_s19, 32 }
0x397f   :  { %p4314_p3 = scmp.ne.s32.totalorder %s5444_s19, %s4313_s11  ;;  %p4317_p4 = scmp.lt.u32.totalorder %s4313_s11, %s5444_s19 }
0x3981   :  { %p4319_p5 = pnand %p4317_p4, %p4314_p3 }
0x3983   :  { %4322 = shalt.err (!%p4319_p5)
}
0x3984   :  { %3335 = dma.vmem_to_hbm [thread:$0]  %s3333_s28, 32, %s5444_s19, [#allocation6]  }
0x3985   :  { %4329 = dma.done.wait [#allocation6], 32  }
0x3986   :  { %4330 = vsyncadd [#allocation6], 4294967264 }
0x3987   :  { %3339 = vsyncpa [#allocation5], 1 }
0x3988   :  { %3340 = vsyncpa [#allocation8], 1 }
0x3989   :  { %3341 = vsyncpa [#allocation11], 1 }
0x398a   :  { %3342 = vsyncpa [#allocation6], 1 }

</bundles_post_ra>
